<compile_context>
chip_gen: v7x
topology: tpu7x:2x2x1
jax: 0.10.0
libtpu: 0.0.40
codegen_flags: <defaults>
</compile_context>

<pallas_src>
import functools

import jax
import jax.numpy as jnp
from jax import lax
from jax.experimental import pallas as pl
from jax.experimental.pallas import tpu as pltpu


def _round_up(x, m):
    return (x + m - 1) // m * m


# ---------------------------------------------------------------------------
# Pallas kernels
# ---------------------------------------------------------------------------
def _matmul_kernel(a_ref, b_ref, o_ref, acc_ref, *, apply_tanh):
    @pl.when(pl.program_id(2) == 0)
    def _():
        acc_ref[...] = jnp.zeros_like(acc_ref)

    acc_ref[...] += jnp.dot(a_ref[...], b_ref[...],
                            preferred_element_type=jnp.float32)

    @pl.when(pl.program_id(2) == pl.num_programs(2) - 1)
    def _():
        y = acc_ref[...]
        if apply_tanh:          # fused tanh epilogue (EUP slot, ~free vs MXU)
            y = jnp.tanh(y)
        o_ref[...] = y.astype(o_ref.dtype)


def pallas_matmul(a, b, *, tm=256, tn=256, tk=512, apply_tanh=False):
    """(M, K) @ (K, N) -> (M, N) f32.  bf16 operands, f32 VMEM accumulator."""
    M, K = a.shape
    K2, N = b.shape
    assert K == K2
    a = a.astype(jnp.bfloat16)
    b = b.astype(jnp.bfloat16)

    tm_ = min(tm, _round_up(M, 8))
    tn_ = min(tn, _round_up(N, 128))          # lane-dense output columns
    tk_ = K if K <= tk else tk                # full-K block when K is small
    Mp, Np, Kp = _round_up(M, tm_), _round_up(N, tn_), _round_up(K, tk_)
    if (Mp, Kp) != (M, K):
        a = jnp.pad(a, ((0, Mp - M), (0, Kp - K)))
    if (Kp, Np) != (K, N):
        b = jnp.pad(b, ((0, Kp - K), (0, Np - N)))

    out = pl.pallas_call(
        functools.partial(_matmul_kernel, apply_tanh=apply_tanh),
        out_shape=jax.ShapeDtypeStruct((Mp, Np), jnp.float32),
        grid=(Mp // tm_, Np // tn_, Kp // tk_),
        in_specs=[
            pl.BlockSpec((tm_, tk_), lambda i, j, k: (i, k)),
            pl.BlockSpec((tk_, tn_), lambda i, j, k: (k, j)),
        ],
        out_specs=pl.BlockSpec((tm_, tn_), lambda i, j, k: (i, j)),
        scratch_shapes=[pltpu.VMEM((tm_, tn_), jnp.float32)],
        compiler_params=pltpu.CompilerParams(
            dimension_semantics=("parallel", "parallel", "arbitrary")),
    )(a, b)
    if (Mp, Np) != (M, N):
        out = out[:M, :N]
    return out


def _bn_stats_kernel(x_ref, sum_ref, ssq_ref):
    # Resident (1, C) accumulator outputs over an "arbitrary" M-tile axis.
    @pl.when(pl.program_id(0) == 0)
    def _():
        sum_ref[...] = jnp.zeros_like(sum_ref)
        ssq_ref[...] = jnp.zeros_like(ssq_ref)

    x = x_ref[...]
    sum_ref[...] += jnp.sum(x, axis=0, keepdims=True)
    ssq_ref[...] += jnp.sum(x * x, axis=0, keepdims=True)


def _affine_relu_kernel(x_ref, s_ref, b_ref, o_ref):
    o_ref[...] = jnp.maximum(x_ref[...] * s_ref[...] + b_ref[...], 0.0)


def pallas_bn_relu(x, gamma, beta, *, tile=512, eps=1e-5):
    """x: (M, C) f32 with M = B*H*W.  Training-mode BatchNorm2d (biased batch
    statistics, eps=1e-5) + ReLU, as two tiled Pallas passes over M."""
    M, C = x.shape
    tile_m = min(tile, _round_up(M, 8))
    Mp = _round_up(M, tile_m)
    x_p = x if Mp == M else jnp.pad(x, ((0, Mp - M), (0, 0)))  # zero pad rows
    n_tiles = Mp // tile_m

    s, ss = pl.pallas_call(
        _bn_stats_kernel,
        out_shape=(jax.ShapeDtypeStruct((1, C), jnp.float32),
                   jax.ShapeDtypeStruct((1, C), jnp.float32)),
        grid=(n_tiles,),
        in_specs=[pl.BlockSpec((tile_m, C), lambda i: (i, 0))],
        out_specs=(pl.BlockSpec((1, C), lambda i: (0, 0)),
                   pl.BlockSpec((1, C), lambda i: (0, 0))),
        compiler_params=pltpu.CompilerParams(
            dimension_semantics=("arbitrary",)),
    )(x_p)

    mean = s[0] / M                      # zero-padded rows contribute nothing
    var = jnp.maximum(ss[0] / M - mean * mean, 0.0)
    scale = gamma * lax.rsqrt(var + eps)
    shift = beta - mean * scale

    y = pl.pallas_call(
        _affine_relu_kernel,
        out_shape=jax.ShapeDtypeStruct((Mp, C), jnp.float32),
        grid=(n_tiles,),
        in_specs=[
            pl.BlockSpec((tile_m, C), lambda i: (i, 0)),
            pl.BlockSpec((1, C), lambda i: (0, 0)),
            pl.BlockSpec((1, C), lambda i: (0, 0)),
        ],
        out_specs=pl.BlockSpec((tile_m, C), lambda i: (i, 0)),
        compiler_params=pltpu.CompilerParams(
            dimension_semantics=("parallel",)),
    )(x_p, scale.reshape(1, C), shift.reshape(1, C))
    return y if Mp == M else y[:M]


# ---------------------------------------------------------------------------
# Stride-2 ConvTranspose2d (k=4, p=1) via the sub-pixel 2x2 GEMM
# ---------------------------------------------------------------------------
def _subpixel_weight(w):
    """PyTorch ConvTranspose2d weight (Cin, Cout, 4, 4) -> (4*Cin, 4*Cout).
    Rows:    tap (dh, dw) in {0,1}^2, then cin     -> (dh*2+dw)*Cin + ci
    Columns: phase (r, s)  in {0,1}^2, then cout   -> (r*2+s)*Cout + co
    Kernel element used: (kh, kw) = (3 - r - 2*dh, 3 - s - 2*dw)."""
    row_blocks = []
    for dh in (0, 1):
        for dw in (0, 1):
            col_blocks = [w[:, :, 3 - r - 2 * dh, 3 - s - 2 * dw]
                          for r in (0, 1) for s in (0, 1)]
            row_blocks.append(jnp.concatenate(col_blocks, axis=1))
    return jnp.concatenate(row_blocks, axis=0)


def conv_transpose_s2(x_nhwc, w, *, apply_tanh=False):
    """ConvTranspose2d(Cin, Cout, 4, stride=2, padding=1, bias=False) on an
    NHWC input, as one GEMM: im2col of the 2x2 windows of the zero-padded
    input (K = Cin*4) against a (4*Cin, 4*Cout) phase-stacked weight matrix,
    followed by a pixel-shuffle gather.  Returns NHWC (B, 2H, 2W, Cout)."""
    B, H, W, Cin = x_nhwc.shape
    Cout = w.shape[1]
    xp = jnp.pad(x_nhwc.astype(jnp.bfloat16),
                 ((0, 0), (1, 1), (1, 1), (0, 0)))
    # im2col over all (H+1)*(W+1) 2x2 windows: (B, H+1, W+1, 4, Cin)
    cols = jnp.stack([xp[:, dh:dh + H + 1, dw:dw + W + 1, :]
                      for dh in (0, 1) for dw in (0, 1)], axis=3)
    a = cols.reshape(B * (H + 1) * (W + 1), 4 * Cin)
    bmat = _subpixel_weight(w)                          # (4*Cin, 4*Cout)
    y = pallas_matmul(a, bmat, apply_tanh=apply_tanh)   # (M, 4*Cout) f32
    y = y.reshape(B, H + 1, W + 1, 2, 2, Cout)
    # un-shuffle: out[b, 2m+r, 2n+s, c] = y[b, m+r, n+s, r, s, c]
    out = jnp.stack(
        [jnp.stack([y[:, r:r + H, s:s + W, r, s, :] for s in (0, 1)], axis=3)
         for r in (0, 1)], axis=2)                      # (B, H, 2, W, 2, Cout)
    return out.reshape(B, 2 * H, 2 * W, Cout)


# ---------------------------------------------------------------------------
# netG forward (channel-last internally; NCHW only at the boundary)
# ---------------------------------------------------------------------------
def netG_forward(z, params):
    """z: (B, nz, 1, 1) -> (B, nc, 64, 64)."""
    B, nz = z.shape[0], z.shape[1]

    # layer 1: ConvTranspose2d(nz, ngf*8, 4, 1, 0): 1x1 -> 4x4.  Tiny GEMM
    # (M = B*16) -> plain XLA per the perf review; result kept channel-last.
    w1 = params["w1"]
    c1 = w1.shape[1]
    w1_mat = jnp.transpose(w1, (0, 2, 3, 1)).reshape(nz, 16 * c1)
    h = jnp.dot(z.reshape(B, nz), w1_mat).reshape(B, 4, 4, c1)
    h = pallas_bn_relu(h.reshape(B * 16, c1), params["g1"], params["b1"])
    x = h.reshape(B, 4, 4, c1)

    # layers 2-4: sub-pixel ConvT GEMM + BN + ReLU (4->8->16->32)
    for wk, gk, bk in (("w2", "g2", "b2"),
                       ("w3", "g3", "b3"),
                       ("w4", "g4", "b4")):
        x = conv_transpose_s2(x, params[wk])
        Bc, Hc, Wc, Cc = x.shape
        h = pallas_bn_relu(x.reshape(Bc * Hc * Wc, Cc), params[gk], params[bk])
        x = h.reshape(Bc, Hc, Wc, Cc)

    # layer 5: ConvT(ngf, nc, 4, 2, 1) with tanh fused into the GEMM epilogue;
    # GEMM output columns are zero-padded to 128 lanes (lane-dense stores).
    x = conv_transpose_s2(x, params["w5"], apply_tanh=True)
    return jnp.transpose(x, (0, 3, 1, 2))       # single NHWC -> NCHW at the end


# ---------------------------------------------------------------------------
# Pure-JAX reference (f32) for a self-check
# ---------------------------------------------------------------------------
def netG_reference(z, params, eps=1e-5):
    def convT(x, w, stride, pad):
        k = w.shape[2]
        rhs = jnp.transpose(w, (1, 0, 2, 3))[:, :, ::-1, ::-1]  # OIHW, flipped
        return lax.conv_general_dilated(
            x, rhs, window_strides=(1, 1),
            padding=[(k - 1 - pad, k - 1 - pad)] * 2,
            lhs_dilation=(stride, stride),
            dimension_numbers=("NCHW", "OIHW", "NCHW"))

    def bn_relu(x, g, b):
        mean = jnp.mean(x, axis=(0, 2, 3), keepdims=True)
        var = jnp.mean((x - mean) ** 2, axis=(0, 2, 3), keepdims=True)
        y = (x - mean) * lax.rsqrt(var + eps)
        y = y * g.reshape(1, -1, 1, 1) + b.reshape(1, -1, 1, 1)
        return jnp.maximum(y, 0.0)

    h = bn_relu(convT(z, params["w1"], 1, 0), params["g1"], params["b1"])
    h = bn_relu(convT(h, params["w2"], 2, 1), params["g2"], params["b2"])
    h = bn_relu(convT(h, params["w3"], 2, 1), params["g3"], params["b3"])
    h = bn_relu(convT(h, params["w4"], 2, 1), params["g4"], params["b4"])
    return jnp.tanh(convT(h, params["w5"], 2, 1))


# ---------------------------------------------------------------------------
# Deterministic parameter init (weights_init semantics)
# ---------------------------------------------------------------------------
def make_params(key, nz, ngf, nc):
    keys = jax.random.split(key, 9)

    def conv_w(k, cin, cout):   # Conv*: normal(0, 0.02)
        return 0.02 * jax.random.normal(k, (cin, cout, 4, 4), jnp.float32)

    def bn_w(k, c):             # BatchNorm: weight ~ normal(1, 0.02), bias = 0
        return 1.0 + 0.02 * jax.random.normal(k, (c,), jnp.float32)

    return {
        "w1": conv_w(keys[0], nz, ngf * 8),
        "g1": bn_w(keys[1], ngf * 8), "b1": jnp.zeros((ngf * 8,), jnp.float32),
        "w2": conv_w(keys[2], ngf * 8, ngf * 4),
        "g2": bn_w(keys[3], ngf * 4), "b2": jnp.zeros((ngf * 4,), jnp.float32),
        "w3": conv_w(keys[4], ngf * 4, ngf * 2),
        "g3": bn_w(keys[5], ngf * 2), "b3": jnp.zeros((ngf * 2,), jnp.float32),
        "w4": conv_w(keys[6], ngf * 2, ngf),
        "g4": bn_w(keys[7], ngf), "b4": jnp.zeros((ngf,), jnp.float32),
        "w5": conv_w(keys[8], ngf, nc),
    }


if __name__ == "__main__":
    nz, ngf, nc, B = 16, 8, 3, 2
    key = jax.random.PRNGKey(0)
    pkey, zkey = jax.random.split(key)
    params = make_params(pkey, nz, ngf, nc)
    z = jax.random.normal(zkey, (B, nz, 1, 1), jnp.float32)

    out = jax.block_until_ready(jax.jit(netG_forward)(z, params))
    assert out.shape == (B, nc, 64, 64), out.shape
    assert bool(jnp.all(jnp.isfinite(out)))
    assert bool(jnp.all(jnp.abs(out) <= 1.0 + 1e-6))          # tanh range

    ref = jax.block_until_ready(jax.jit(netG_reference)(z, params))
    max_err = float(jnp.max(jnp.abs(out - ref)))
    assert max_err < 5e-2, f"mismatch vs f32 reference: max |diff| = {max_err}"

    print("KERNEL_OK")
</pallas_src>

<mosaic_0001>
module attributes {stable_mosaic.version = 11 : i64} {
  func.func @_bn_stats_kernel(%arg0: i32, %arg1: memref<32x64xf32, #tpu.memory_space<vmem>>, %arg2: memref<1x64xf32, #tpu.memory_space<vmem>>, %arg3: memref<1x64xf32, #tpu.memory_space<vmem>>) attributes {dimension_semantics = [#tpu.dimension_semantics<arbitrary>], iteration_bounds = array<i64: 1>, scalar_prefetch = 0 : i64, scratch_operands = 0 : i64, tpu.core_type = #tpu.core_type<tc>, window_params = [{transform_indices = @transform_0, window_bounds = array<i64: 32, 64>}, {pipeline_mode = #tpu.pipeline_mode<synchronous>, transform_indices = @transform_1, window_bounds = array<i64: 1, 64>}, {pipeline_mode = #tpu.pipeline_mode<synchronous>, transform_indices = @transform_2, window_bounds = array<i64: 1, 64>}]} {
    %c0_i32 = arith.constant 0 : i32
    %0 = arith.cmpi eq, %arg0, %c0_i32 : i32
    %1 = arith.extui %0 : i1 to i32
    %c0_i32_0 = arith.constant 0 : i32
    %2 = arith.cmpi ne, %1, %c0_i32_0 : i32
    scf.if %2 {
      %cst_11 = arith.constant 0.000000e+00 : f32
      %15 = vector.broadcast %cst_11 : f32 to vector<1x64xf32>
      %c0_12 = arith.constant 0 : index
      %c0_13 = arith.constant 0 : index
      %16 = vector.load %arg2[%c0_12, %c0_13] : memref<1x64xf32, #tpu.memory_space<vmem>>, vector<1x64xf32>
      tpu.vector_store %arg2[%c0_12, %c0_13], %15 {strides = array<i32>} : memref<1x64xf32, #tpu.memory_space<vmem>>, vector<1x64xf32>,
      %cst_14 = arith.constant 0.000000e+00 : f32
      %17 = vector.broadcast %cst_14 : f32 to vector<1x64xf32>
      %c0_15 = arith.constant 0 : index
      %c0_16 = arith.constant 0 : index
      %18 = vector.load %arg3[%c0_15, %c0_16] : memref<1x64xf32, #tpu.memory_space<vmem>>, vector<1x64xf32>
      tpu.vector_store %arg3[%c0_15, %c0_16], %17 {strides = array<i32>} : memref<1x64xf32, #tpu.memory_space<vmem>>, vector<1x64xf32>,
    } else {
    }
    %c0 = arith.constant 0 : index
    %c0_1 = arith.constant 0 : index
    %3 = vector.load %arg1[%c0, %c0_1] : memref<32x64xf32, #tpu.memory_space<vmem>>, vector<32x64xf32>
    %c0_2 = arith.constant 0 : index
    %c0_3 = arith.constant 0 : index
    %4 = vector.load %arg2[%c0_2, %c0_3] : memref<1x64xf32, #tpu.memory_space<vmem>>, vector<1x64xf32>
    %cst = arith.constant dense<0.000000e+00> : vector<64xf32>
    %5 = vector.multi_reduction <add>, %3, %cst [0] : vector<32x64xf32> to vector<64xf32>
    %6 = vector.shape_cast %5 : vector<64xf32> to vector<1x64xf32>
    %7 = arith.addf %4, %6 : vector<1x64xf32>
    %c0_4 = arith.constant 0 : index
    %c0_5 = arith.constant 0 : index
    %8 = vector.load %arg2[%c0_4, %c0_5] : memref<1x64xf32, #tpu.memory_space<vmem>>, vector<1x64xf32>
    tpu.vector_store %arg2[%c0_4, %c0_5], %7 {strides = array<i32>} : memref<1x64xf32, #tpu.memory_space<vmem>>, vector<1x64xf32>,
    %c0_6 = arith.constant 0 : index
    %c0_7 = arith.constant 0 : index
    %9 = vector.load %arg3[%c0_6, %c0_7] : memref<1x64xf32, #tpu.memory_space<vmem>>, vector<1x64xf32>
    %10 = arith.mulf %3, %3 : vector<32x64xf32>
    %cst_8 = arith.constant dense<0.000000e+00> : vector<64xf32>
    %11 = vector.multi_reduction <add>, %10, %cst_8 [0] : vector<32x64xf32> to vector<64xf32>
    %12 = vector.shape_cast %11 : vector<64xf32> to vector<1x64xf32>
    %13 = arith.addf %9, %12 : vector<1x64xf32>
    %c0_9 = arith.constant 0 : index
    %c0_10 = arith.constant 0 : index
    %14 = vector.load %arg3[%c0_9, %c0_10] : memref<1x64xf32, #tpu.memory_space<vmem>>, vector<1x64xf32>
    tpu.vector_store %arg3[%c0_9, %c0_10], %13 {strides = array<i32>} : memref<1x64xf32, #tpu.memory_space<vmem>>, vector<1x64xf32>,
    return
  }
  func.func @transform_0(%arg0: i32) -> (i32, i32) {
    %c0_i32 = arith.constant 0 : i32
    %c0_i32_0 = arith.constant 0 : i32
    return %arg0, %c0_i32 : i32, i32
  }
  func.func @transform_1(%arg0: i32) -> (i32, i32) {
    %c0_i32 = arith.constant 0 : i32
    %c0_i32_0 = arith.constant 0 : i32
    %c0_i32_1 = arith.constant 0 : i32
    return %c0_i32, %c0_i32_0 : i32, i32
  }
  func.func @transform_2(%arg0: i32) -> (i32, i32) {
    %c0_i32 = arith.constant 0 : i32
    %c0_i32_0 = arith.constant 0 : i32
    %c0_i32_1 = arith.constant 0 : i32
    return %c0_i32, %c0_i32_0 : i32, i32
  }
}

module attributes {stable_mosaic.version = 11 : i64} {
  func.func @_affine_relu_kernel(%arg0: i32, %arg1: memref<32x64xf32, #tpu.memory_space<vmem>>, %arg2: memref<1x64xf32, #tpu.memory_space<vmem>>, %arg3: memref<1x64xf32, #tpu.memory_space<vmem>>, %arg4: memref<32x64xf32, #tpu.memory_space<vmem>>) attributes {dimension_semantics = [#tpu.dimension_semantics<parallel>], iteration_bounds = array<i64: 1>, scalar_prefetch = 0 : i64, scratch_operands = 0 : i64, tpu.core_type = #tpu.core_type<tc>, window_params = [{transform_indices = @transform_0, window_bounds = array<i64: 32, 64>}, {pipeline_mode = #tpu.pipeline_mode<synchronous>, transform_indices = @transform_1, window_bounds = array<i64: 1, 64>}, {pipeline_mode = #tpu.pipeline_mode<synchronous>, transform_indices = @transform_2, window_bounds = array<i64: 1, 64>}, {transform_indices = @transform_3, window_bounds = array<i64: 32, 64>}]} {
    %c0 = arith.constant 0 : index
    %c0_0 = arith.constant 0 : index
    %0 = vector.load %arg1[%c0, %c0_0] : memref<32x64xf32, #tpu.memory_space<vmem>>, vector<32x64xf32>
    %c0_1 = arith.constant 0 : index
    %c0_2 = arith.constant 0 : index
    %1 = vector.load %arg2[%c0_1, %c0_2] : memref<1x64xf32, #tpu.memory_space<vmem>>, vector<1x64xf32>
    %2 = vector.broadcast %1 : vector<1x64xf32> to vector<32x64xf32>
    %3 = arith.mulf %0, %2 : vector<32x64xf32>
    %c0_3 = arith.constant 0 : index
    %c0_4 = arith.constant 0 : index
    %4 = vector.load %arg3[%c0_3, %c0_4] : memref<1x64xf32, #tpu.memory_space<vmem>>, vector<1x64xf32>
    %5 = vector.broadcast %4 : vector<1x64xf32> to vector<32x64xf32>
    %6 = arith.addf %3, %5 : vector<32x64xf32>
    %cst = arith.constant 0.000000e+00 : f32
    %7 = vector.broadcast %cst : f32 to vector<32x64xf32>
    %8 = arith.maximumf %6, %7 : vector<32x64xf32>
    %c0_5 = arith.constant 0 : index
    %c0_6 = arith.constant 0 : index
    %9 = vector.load %arg4[%c0_5, %c0_6] : memref<32x64xf32, #tpu.memory_space<vmem>>, vector<32x64xf32>
    tpu.vector_store %arg4[%c0_5, %c0_6], %8 {strides = array<i32>} : memref<32x64xf32, #tpu.memory_space<vmem>>, vector<32x64xf32>,
    return
  }
  func.func @transform_0(%arg0: i32) -> (i32, i32) {
    %c0_i32 = arith.constant 0 : i32
    %c0_i32_0 = arith.constant 0 : i32
    return %arg0, %c0_i32 : i32, i32
  }
  func.func @transform_1(%arg0: i32) -> (i32, i32) {
    %c0_i32 = arith.constant 0 : i32
    %c0_i32_0 = arith.constant 0 : i32
    %c0_i32_1 = arith.constant 0 : i32
    return %c0_i32, %c0_i32_0 : i32, i32
  }
  func.func @transform_2(%arg0: i32) -> (i32, i32) {
    %c0_i32 = arith.constant 0 : i32
    %c0_i32_0 = arith.constant 0 : i32
    %c0_i32_1 = arith.constant 0 : i32
    return %c0_i32, %c0_i32_0 : i32, i32
  }
  func.func @transform_3(%arg0: i32) -> (i32, i32) {
    %c0_i32 = arith.constant 0 : i32
    %c0_i32_0 = arith.constant 0 : i32
    return %arg0, %c0_i32 : i32, i32
  }
}

module attributes {stable_mosaic.version = 11 : i64} {
  func.func @_matmul_kernel(%arg0: i32, %arg1: i32, %arg2: i32, %arg3: memref<56x256xbf16, #tpu.memory_space<vmem>>, %arg4: memref<256x128xbf16, #tpu.memory_space<vmem>>, %arg5: memref<56x128xf32, #tpu.memory_space<vmem>>, %arg6: memref<56x128xf32, #tpu.memory_space<vmem>>) attributes {dimension_semantics = [#tpu.dimension_semantics<parallel>, #tpu.dimension_semantics<parallel>, #tpu.dimension_semantics<arbitrary>], iteration_bounds = array<i64: 1, 1, 1>, scalar_prefetch = 0 : i64, scratch_operands = 1 : i64, tpu.core_type = #tpu.core_type<tc>, window_params = [{transform_indices = @transform_0, window_bounds = array<i64: 56, 256>}, {transform_indices = @transform_1, window_bounds = array<i64: 256, 128>}, {transform_indices = @transform_2, window_bounds = array<i64: 56, 128>}]} {
    %c0_i32 = arith.constant 0 : i32
    %0 = arith.cmpi eq, %arg2, %c0_i32 : i32
    %1 = arith.extui %0 : i1 to i32
    %c0_i32_0 = arith.constant 0 : i32
    %2 = arith.cmpi ne, %1, %c0_i32_0 : i32
    scf.if %2 {
      %cst_10 = arith.constant 0.000000e+00 : f32
      %12 = vector.broadcast %cst_10 : f32 to vector<56x128xf32>
      %c0_11 = arith.constant 0 : index
      %c0_12 = arith.constant 0 : index
      %13 = vector.load %arg6[%c0_11, %c0_12] : memref<56x128xf32, #tpu.memory_space<vmem>>, vector<56x128xf32>
      tpu.vector_store %arg6[%c0_11, %c0_12], %12 {strides = array<i32>} : memref<56x128xf32, #tpu.memory_space<vmem>>, vector<56x128xf32>,
    } else {
    }
    %c0 = arith.constant 0 : index
    %c0_1 = arith.constant 0 : index
    %3 = vector.load %arg6[%c0, %c0_1] : memref<56x128xf32, #tpu.memory_space<vmem>>, vector<56x128xf32>
    %c0_2 = arith.constant 0 : index
    %c0_3 = arith.constant 0 : index
    %4 = vector.load %arg3[%c0_2, %c0_3] : memref<56x256xbf16, #tpu.memory_space<vmem>>, vector<56x256xbf16>
    %c0_4 = arith.constant 0 : index
    %c0_5 = arith.constant 0 : index
    %5 = vector.load %arg4[%c0_4, %c0_5] : memref<256x128xbf16, #tpu.memory_space<vmem>>, vector<256x128xbf16>
    %cst = arith.constant dense<0.000000e+00> : vector<56x128xf32>
    %6 = tpu.matmul %4, %5, %cst {dimension_numbers = #tpu.dot_dimension_numbers<[1], [0], [0], [1], [0, 0, 1, 1], [], []>} : vector<56x256xbf16>, vector<256x128xbf16>, vector<56x128xf32> -> vector<56x128xf32>
    %7 = arith.addf %3, %6 : vector<56x128xf32>
    %c0_6 = arith.constant 0 : index
    %c0_7 = arith.constant 0 : index
    %8 = vector.load %arg6[%c0_6, %c0_7] : memref<56x128xf32, #tpu.memory_space<vmem>>, vector<56x128xf32>
    tpu.vector_store %arg6[%c0_6, %c0_7], %7 {strides = array<i32>} : memref<56x128xf32, #tpu.memory_space<vmem>>, vector<56x128xf32>,
    %c0_i32_8 = arith.constant 0 : i32
    %9 = arith.cmpi eq, %arg2, %c0_i32_8 : i32
    %10 = arith.extui %9 : i1 to i32
    %c0_i32_9 = arith.constant 0 : i32
    %11 = arith.cmpi ne, %10, %c0_i32_9 : i32
    scf.if %11 {
      %c0_10 = arith.constant 0 : index
      %c0_11 = arith.constant 0 : index
      %12 = vector.load %arg6[%c0_10, %c0_11] : memref<56x128xf32, #tpu.memory_space<vmem>>, vector<56x128xf32>
      %c0_12 = arith.constant 0 : index
      %c0_13 = arith.constant 0 : index
      %13 = vector.load %arg5[%c0_12, %c0_13] : memref<56x128xf32, #tpu.memory_space<vmem>>, vector<56x128xf32>
      tpu.vector_store %arg5[%c0_12, %c0_13], %12 {strides = array<i32>} : memref<56x128xf32, #tpu.memory_space<vmem>>, vector<56x128xf32>,
    } else {
    }
    return
  }
  func.func @transform_0(%arg0: i32, %arg1: i32, %arg2: i32) -> (i32, i32) {
    %c0_i32 = arith.constant 0 : i32
    return %arg0, %arg2 : i32, i32
  }
  func.func @transform_1(%arg0: i32, %arg1: i32, %arg2: i32) -> (i32, i32) {
    %c0_i32 = arith.constant 0 : i32
    return %arg2, %arg1 : i32, i32
  }
  func.func @transform_2(%arg0: i32, %arg1: i32, %arg2: i32) -> (i32, i32) {
    %c0_i32 = arith.constant 0 : i32
    return %arg0, %arg1 : i32, i32
  }
}

module attributes {stable_mosaic.version = 11 : i64} {
  func.func @_bn_stats_kernel(%arg0: i32, %arg1: memref<128x32xf32, #tpu.memory_space<vmem>>, %arg2: memref<1x32xf32, #tpu.memory_space<vmem>>, %arg3: memref<1x32xf32, #tpu.memory_space<vmem>>) attributes {dimension_semantics = [#tpu.dimension_semantics<arbitrary>], iteration_bounds = array<i64: 1>, scalar_prefetch = 0 : i64, scratch_operands = 0 : i64, tpu.core_type = #tpu.core_type<tc>, window_params = [{transform_indices = @transform_0, window_bounds = array<i64: 128, 32>}, {pipeline_mode = #tpu.pipeline_mode<synchronous>, transform_indices = @transform_1, window_bounds = array<i64: 1, 32>}, {pipeline_mode = #tpu.pipeline_mode<synchronous>, transform_indices = @transform_2, window_bounds = array<i64: 1, 32>}]} {
    %c0_i32 = arith.constant 0 : i32
    %0 = arith.cmpi eq, %arg0, %c0_i32 : i32
    %1 = arith.extui %0 : i1 to i32
    %c0_i32_0 = arith.constant 0 : i32
    %2 = arith.cmpi ne, %1, %c0_i32_0 : i32
    scf.if %2 {
      %cst_11 = arith.constant 0.000000e+00 : f32
      %15 = vector.broadcast %cst_11 : f32 to vector<1x32xf32>
      %c0_12 = arith.constant 0 : index
      %c0_13 = arith.constant 0 : index
      %16 = vector.load %arg2[%c0_12, %c0_13] : memref<1x32xf32, #tpu.memory_space<vmem>>, vector<1x32xf32>
      tpu.vector_store %arg2[%c0_12, %c0_13], %15 {strides = array<i32>} : memref<1x32xf32, #tpu.memory_space<vmem>>, vector<1x32xf32>,
      %cst_14 = arith.constant 0.000000e+00 : f32
      %17 = vector.broadcast %cst_14 : f32 to vector<1x32xf32>
      %c0_15 = arith.constant 0 : index
      %c0_16 = arith.constant 0 : index
      %18 = vector.load %arg3[%c0_15, %c0_16] : memref<1x32xf32, #tpu.memory_space<vmem>>, vector<1x32xf32>
      tpu.vector_store %arg3[%c0_15, %c0_16], %17 {strides = array<i32>} : memref<1x32xf32, #tpu.memory_space<vmem>>, vector<1x32xf32>,
    } else {
    }
    %c0 = arith.constant 0 : index
    %c0_1 = arith.constant 0 : index
    %3 = vector.load %arg1[%c0, %c0_1] : memref<128x32xf32, #tpu.memory_space<vmem>>, vector<128x32xf32>
    %c0_2 = arith.constant 0 : index
    %c0_3 = arith.constant 0 : index
    %4 = vector.load %arg2[%c0_2, %c0_3] : memref<1x32xf32, #tpu.memory_space<vmem>>, vector<1x32xf32>
    %cst = arith.constant dense<0.000000e+00> : vector<32xf32>
    %5 = vector.multi_reduction <add>, %3, %cst [0] : vector<128x32xf32> to vector<32xf32>
    %6 = vector.shape_cast %5 : vector<32xf32> to vector<1x32xf32>
    %7 = arith.addf %4, %6 : vector<1x32xf32>
    %c0_4 = arith.constant 0 : index
    %c0_5 = arith.constant 0 : index
    %8 = vector.load %arg2[%c0_4, %c0_5] : memref<1x32xf32, #tpu.memory_space<vmem>>, vector<1x32xf32>
    tpu.vector_store %arg2[%c0_4, %c0_5], %7 {strides = array<i32>} : memref<1x32xf32, #tpu.memory_space<vmem>>, vector<1x32xf32>,
    %c0_6 = arith.constant 0 : index
    %c0_7 = arith.constant 0 : index
    %9 = vector.load %arg3[%c0_6, %c0_7] : memref<1x32xf32, #tpu.memory_space<vmem>>, vector<1x32xf32>
    %10 = arith.mulf %3, %3 : vector<128x32xf32>
    %cst_8 = arith.constant dense<0.000000e+00> : vector<32xf32>
    %11 = vector.multi_reduction <add>, %10, %cst_8 [0] : vector<128x32xf32> to vector<32xf32>
    %12 = vector.shape_cast %11 : vector<32xf32> to vector<1x32xf32>
    %13 = arith.addf %9, %12 : vector<1x32xf32>
    %c0_9 = arith.constant 0 : index
    %c0_10 = arith.constant 0 : index
    %14 = vector.load %arg3[%c0_9, %c0_10] : memref<1x32xf32, #tpu.memory_space<vmem>>, vector<1x32xf32>
    tpu.vector_store %arg3[%c0_9, %c0_10], %13 {strides = array<i32>} : memref<1x32xf32, #tpu.memory_space<vmem>>, vector<1x32xf32>,
    return
  }
  func.func @transform_0(%arg0: i32) -> (i32, i32) {
    %c0_i32 = arith.constant 0 : i32
    %c0_i32_0 = arith.constant 0 : i32
    return %arg0, %c0_i32 : i32, i32
  }
  func.func @transform_1(%arg0: i32) -> (i32, i32) {
    %c0_i32 = arith.constant 0 : i32
    %c0_i32_0 = arith.constant 0 : i32
    %c0_i32_1 = arith.constant 0 : i32
    return %c0_i32, %c0_i32_0 : i32, i32
  }
  func.func @transform_2(%arg0: i32) -> (i32, i32) {
    %c0_i32 = arith.constant 0 : i32
    %c0_i32_0 = arith.constant 0 : i32
    %c0_i32_1 = arith.constant 0 : i32
    return %c0_i32, %c0_i32_0 : i32, i32
  }
}

module attributes {stable_mosaic.version = 11 : i64} {
  func.func @_affine_relu_kernel(%arg0: i32, %arg1: memref<128x32xf32, #tpu.memory_space<vmem>>, %arg2: memref<1x32xf32, #tpu.memory_space<vmem>>, %arg3: memref<1x32xf32, #tpu.memory_space<vmem>>, %arg4: memref<128x32xf32, #tpu.memory_space<vmem>>) attributes {dimension_semantics = [#tpu.dimension_semantics<parallel>], iteration_bounds = array<i64: 1>, scalar_prefetch = 0 : i64, scratch_operands = 0 : i64, tpu.core_type = #tpu.core_type<tc>, window_params = [{transform_indices = @transform_0, window_bounds = array<i64: 128, 32>}, {pipeline_mode = #tpu.pipeline_mode<synchronous>, transform_indices = @transform_1, window_bounds = array<i64: 1, 32>}, {pipeline_mode = #tpu.pipeline_mode<synchronous>, transform_indices = @transform_2, window_bounds = array<i64: 1, 32>}, {transform_indices = @transform_3, window_bounds = array<i64: 128, 32>}]} {
    %c0 = arith.constant 0 : index
    %c0_0 = arith.constant 0 : index
    %0 = vector.load %arg1[%c0, %c0_0] : memref<128x32xf32, #tpu.memory_space<vmem>>, vector<128x32xf32>
    %c0_1 = arith.constant 0 : index
    %c0_2 = arith.constant 0 : index
    %1 = vector.load %arg2[%c0_1, %c0_2] : memref<1x32xf32, #tpu.memory_space<vmem>>, vector<1x32xf32>
    %2 = vector.broadcast %1 : vector<1x32xf32> to vector<128x32xf32>
    %3 = arith.mulf %0, %2 : vector<128x32xf32>
    %c0_3 = arith.constant 0 : index
    %c0_4 = arith.constant 0 : index
    %4 = vector.load %arg3[%c0_3, %c0_4] : memref<1x32xf32, #tpu.memory_space<vmem>>, vector<1x32xf32>
    %5 = vector.broadcast %4 : vector<1x32xf32> to vector<128x32xf32>
    %6 = arith.addf %3, %5 : vector<128x32xf32>
    %cst = arith.constant 0.000000e+00 : f32
    %7 = vector.broadcast %cst : f32 to vector<128x32xf32>
    %8 = arith.maximumf %6, %7 : vector<128x32xf32>
    %c0_5 = arith.constant 0 : index
    %c0_6 = arith.constant 0 : index
    %9 = vector.load %arg4[%c0_5, %c0_6] : memref<128x32xf32, #tpu.memory_space<vmem>>, vector<128x32xf32>
    tpu.vector_store %arg4[%c0_5, %c0_6], %8 {strides = array<i32>} : memref<128x32xf32, #tpu.memory_space<vmem>>, vector<128x32xf32>,
    return
  }
  func.func @transform_0(%arg0: i32) -> (i32, i32) {
    %c0_i32 = arith.constant 0 : i32
    %c0_i32_0 = arith.constant 0 : i32
    return %arg0, %c0_i32 : i32, i32
  }
  func.func @transform_1(%arg0: i32) -> (i32, i32) {
    %c0_i32 = arith.constant 0 : i32
    %c0_i32_0 = arith.constant 0 : i32
    %c0_i32_1 = arith.constant 0 : i32
    return %c0_i32, %c0_i32_0 : i32, i32
  }
  func.func @transform_2(%arg0: i32) -> (i32, i32) {
    %c0_i32 = arith.constant 0 : i32
    %c0_i32_0 = arith.constant 0 : i32
    %c0_i32_1 = arith.constant 0 : i32
    return %c0_i32, %c0_i32_0 : i32, i32
  }
  func.func @transform_3(%arg0: i32) -> (i32, i32) {
    %c0_i32 = arith.constant 0 : i32
    %c0_i32_0 = arith.constant 0 : i32
    return %arg0, %c0_i32 : i32, i32
  }
}

module attributes {stable_mosaic.version = 11 : i64} {
  func.func @_matmul_kernel(%arg0: i32, %arg1: i32, %arg2: i32, %arg3: memref<168x128xbf16, #tpu.memory_space<vmem>>, %arg4: memref<128x128xbf16, #tpu.memory_space<vmem>>, %arg5: memref<168x128xf32, #tpu.memory_space<vmem>>, %arg6: memref<168x128xf32, #tpu.memory_space<vmem>>) attributes {dimension_semantics = [#tpu.dimension_semantics<parallel>, #tpu.dimension_semantics<parallel>, #tpu.dimension_semantics<arbitrary>], iteration_bounds = array<i64: 1, 1, 1>, scalar_prefetch = 0 : i64, scratch_operands = 1 : i64, tpu.core_type = #tpu.core_type<tc>, window_params = [{transform_indices = @transform_0, window_bounds = array<i64: 168, 128>}, {transform_indices = @transform_1, window_bounds = array<i64: 128, 128>}, {transform_indices = @transform_2, window_bounds = array<i64: 168, 128>}]} {
    %c0_i32 = arith.constant 0 : i32
    %0 = arith.cmpi eq, %arg2, %c0_i32 : i32
    %1 = arith.extui %0 : i1 to i32
    %c0_i32_0 = arith.constant 0 : i32
    %2 = arith.cmpi ne, %1, %c0_i32_0 : i32
    scf.if %2 {
      %cst_10 = arith.constant 0.000000e+00 : f32
      %12 = vector.broadcast %cst_10 : f32 to vector<168x128xf32>
      %c0_11 = arith.constant 0 : index
      %c0_12 = arith.constant 0 : index
      %13 = vector.load %arg6[%c0_11, %c0_12] : memref<168x128xf32, #tpu.memory_space<vmem>>, vector<168x128xf32>
      tpu.vector_store %arg6[%c0_11, %c0_12], %12 {strides = array<i32>} : memref<168x128xf32, #tpu.memory_space<vmem>>, vector<168x128xf32>,
    } else {
    }
    %c0 = arith.constant 0 : index
    %c0_1 = arith.constant 0 : index
    %3 = vector.load %arg6[%c0, %c0_1] : memref<168x128xf32, #tpu.memory_space<vmem>>, vector<168x128xf32>
    %c0_2 = arith.constant 0 : index
    %c0_3 = arith.constant 0 : index
    %4 = vector.load %arg3[%c0_2, %c0_3] : memref<168x128xbf16, #tpu.memory_space<vmem>>, vector<168x128xbf16>
    %c0_4 = arith.constant 0 : index
    %c0_5 = arith.constant 0 : index
    %5 = vector.load %arg4[%c0_4, %c0_5] : memref<128x128xbf16, #tpu.memory_space<vmem>>, vector<128x128xbf16>
    %cst = arith.constant dense<0.000000e+00> : vector<168x128xf32>
    %6 = tpu.matmul %4, %5, %cst {dimension_numbers = #tpu.dot_dimension_numbers<[1], [0], [0], [1], [0, 0, 1, 1], [], []>} : vector<168x128xbf16>, vector<128x128xbf16>, vector<168x128xf32> -> vector<168x128xf32>
    %7 = arith.addf %3, %6 : vector<168x128xf32>
    %c0_6 = arith.constant 0 : index
    %c0_7 = arith.constant 0 : index
    %8 = vector.load %arg6[%c0_6, %c0_7] : memref<168x128xf32, #tpu.memory_space<vmem>>, vector<168x128xf32>
    tpu.vector_store %arg6[%c0_6, %c0_7], %7 {strides = array<i32>} : memref<168x128xf32, #tpu.memory_space<vmem>>, vector<168x128xf32>,
    %c0_i32_8 = arith.constant 0 : i32
    %9 = arith.cmpi eq, %arg2, %c0_i32_8 : i32
    %10 = arith.extui %9 : i1 to i32
    %c0_i32_9 = arith.constant 0 : i32
    %11 = arith.cmpi ne, %10, %c0_i32_9 : i32
    scf.if %11 {
      %c0_10 = arith.constant 0 : index
      %c0_11 = arith.constant 0 : index
      %12 = vector.load %arg6[%c0_10, %c0_11] : memref<168x128xf32, #tpu.memory_space<vmem>>, vector<168x128xf32>
      %c0_12 = arith.constant 0 : index
      %c0_13 = arith.constant 0 : index
      %13 = vector.load %arg5[%c0_12, %c0_13] : memref<168x128xf32, #tpu.memory_space<vmem>>, vector<168x128xf32>
      tpu.vector_store %arg5[%c0_12, %c0_13], %12 {strides = array<i32>} : memref<168x128xf32, #tpu.memory_space<vmem>>, vector<168x128xf32>,
    } else {
    }
    return
  }
  func.func @transform_0(%arg0: i32, %arg1: i32, %arg2: i32) -> (i32, i32) {
    %c0_i32 = arith.constant 0 : i32
    return %arg0, %arg2 : i32, i32
  }
  func.func @transform_1(%arg0: i32, %arg1: i32, %arg2: i32) -> (i32, i32) {
    %c0_i32 = arith.constant 0 : i32
    return %arg2, %arg1 : i32, i32
  }
  func.func @transform_2(%arg0: i32, %arg1: i32, %arg2: i32) -> (i32, i32) {
    %c0_i32 = arith.constant 0 : i32
    return %arg0, %arg1 : i32, i32
  }
}

module attributes {stable_mosaic.version = 11 : i64} {
  func.func @_bn_stats_kernel(%arg0: i32, %arg1: memref<512x16xf32, #tpu.memory_space<vmem>>, %arg2: memref<1x16xf32, #tpu.memory_space<vmem>>, %arg3: memref<1x16xf32, #tpu.memory_space<vmem>>) attributes {dimension_semantics = [#tpu.dimension_semantics<arbitrary>], iteration_bounds = array<i64: 1>, scalar_prefetch = 0 : i64, scratch_operands = 0 : i64, tpu.core_type = #tpu.core_type<tc>, window_params = [{transform_indices = @transform_0, window_bounds = array<i64: 512, 16>}, {pipeline_mode = #tpu.pipeline_mode<synchronous>, transform_indices = @transform_1, window_bounds = array<i64: 1, 16>}, {pipeline_mode = #tpu.pipeline_mode<synchronous>, transform_indices = @transform_2, window_bounds = array<i64: 1, 16>}]} {
    %c0_i32 = arith.constant 0 : i32
    %0 = arith.cmpi eq, %arg0, %c0_i32 : i32
    %1 = arith.extui %0 : i1 to i32
    %c0_i32_0 = arith.constant 0 : i32
    %2 = arith.cmpi ne, %1, %c0_i32_0 : i32
    scf.if %2 {
      %cst_11 = arith.constant 0.000000e+00 : f32
      %15 = vector.broadcast %cst_11 : f32 to vector<1x16xf32>
      %c0_12 = arith.constant 0 : index
      %c0_13 = arith.constant 0 : index
      %16 = vector.load %arg2[%c0_12, %c0_13] : memref<1x16xf32, #tpu.memory_space<vmem>>, vector<1x16xf32>
      tpu.vector_store %arg2[%c0_12, %c0_13], %15 {strides = array<i32>} : memref<1x16xf32, #tpu.memory_space<vmem>>, vector<1x16xf32>,
      %cst_14 = arith.constant 0.000000e+00 : f32
      %17 = vector.broadcast %cst_14 : f32 to vector<1x16xf32>
      %c0_15 = arith.constant 0 : index
      %c0_16 = arith.constant 0 : index
      %18 = vector.load %arg3[%c0_15, %c0_16] : memref<1x16xf32, #tpu.memory_space<vmem>>, vector<1x16xf32>
      tpu.vector_store %arg3[%c0_15, %c0_16], %17 {strides = array<i32>} : memref<1x16xf32, #tpu.memory_space<vmem>>, vector<1x16xf32>,
    } else {
    }
    %c0 = arith.constant 0 : index
    %c0_1 = arith.constant 0 : index
    %3 = vector.load %arg1[%c0, %c0_1] : memref<512x16xf32, #tpu.memory_space<vmem>>, vector<512x16xf32>
    %c0_2 = arith.constant 0 : index
    %c0_3 = arith.constant 0 : index
    %4 = vector.load %arg2[%c0_2, %c0_3] : memref<1x16xf32, #tpu.memory_space<vmem>>, vector<1x16xf32>
    %cst = arith.constant dense<0.000000e+00> : vector<16xf32>
    %5 = vector.multi_reduction <add>, %3, %cst [0] : vector<512x16xf32> to vector<16xf32>
    %6 = vector.shape_cast %5 : vector<16xf32> to vector<1x16xf32>
    %7 = arith.addf %4, %6 : vector<1x16xf32>
    %c0_4 = arith.constant 0 : index
    %c0_5 = arith.constant 0 : index
    %8 = vector.load %arg2[%c0_4, %c0_5] : memref<1x16xf32, #tpu.memory_space<vmem>>, vector<1x16xf32>
    tpu.vector_store %arg2[%c0_4, %c0_5], %7 {strides = array<i32>} : memref<1x16xf32, #tpu.memory_space<vmem>>, vector<1x16xf32>,
    %c0_6 = arith.constant 0 : index
    %c0_7 = arith.constant 0 : index
    %9 = vector.load %arg3[%c0_6, %c0_7] : memref<1x16xf32, #tpu.memory_space<vmem>>, vector<1x16xf32>
    %10 = arith.mulf %3, %3 : vector<512x16xf32>
    %cst_8 = arith.constant dense<0.000000e+00> : vector<16xf32>
    %11 = vector.multi_reduction <add>, %10, %cst_8 [0] : vector<512x16xf32> to vector<16xf32>
    %12 = vector.shape_cast %11 : vector<16xf32> to vector<1x16xf32>
    %13 = arith.addf %9, %12 : vector<1x16xf32>
    %c0_9 = arith.constant 0 : index
    %c0_10 = arith.constant 0 : index
    %14 = vector.load %arg3[%c0_9, %c0_10] : memref<1x16xf32, #tpu.memory_space<vmem>>, vector<1x16xf32>
    tpu.vector_store %arg3[%c0_9, %c0_10], %13 {strides = array<i32>} : memref<1x16xf32, #tpu.memory_space<vmem>>, vector<1x16xf32>,
    return
  }
  func.func @transform_0(%arg0: i32) -> (i32, i32) {
    %c0_i32 = arith.constant 0 : i32
    %c0_i32_0 = arith.constant 0 : i32
    return %arg0, %c0_i32 : i32, i32
  }
  func.func @transform_1(%arg0: i32) -> (i32, i32) {
    %c0_i32 = arith.constant 0 : i32
    %c0_i32_0 = arith.constant 0 : i32
    %c0_i32_1 = arith.constant 0 : i32
    return %c0_i32, %c0_i32_0 : i32, i32
  }
  func.func @transform_2(%arg0: i32) -> (i32, i32) {
    %c0_i32 = arith.constant 0 : i32
    %c0_i32_0 = arith.constant 0 : i32
    %c0_i32_1 = arith.constant 0 : i32
    return %c0_i32, %c0_i32_0 : i32, i32
  }
}

module attributes {stable_mosaic.version = 11 : i64} {
  func.func @_affine_relu_kernel(%arg0: i32, %arg1: memref<512x16xf32, #tpu.memory_space<vmem>>, %arg2: memref<1x16xf32, #tpu.memory_space<vmem>>, %arg3: memref<1x16xf32, #tpu.memory_space<vmem>>, %arg4: memref<512x16xf32, #tpu.memory_space<vmem>>) attributes {dimension_semantics = [#tpu.dimension_semantics<parallel>], iteration_bounds = array<i64: 1>, scalar_prefetch = 0 : i64, scratch_operands = 0 : i64, tpu.core_type = #tpu.core_type<tc>, window_params = [{transform_indices = @transform_0, window_bounds = array<i64: 512, 16>}, {pipeline_mode = #tpu.pipeline_mode<synchronous>, transform_indices = @transform_1, window_bounds = array<i64: 1, 16>}, {pipeline_mode = #tpu.pipeline_mode<synchronous>, transform_indices = @transform_2, window_bounds = array<i64: 1, 16>}, {transform_indices = @transform_3, window_bounds = array<i64: 512, 16>}]} {
    %c0 = arith.constant 0 : index
    %c0_0 = arith.constant 0 : index
    %0 = vector.load %arg1[%c0, %c0_0] : memref<512x16xf32, #tpu.memory_space<vmem>>, vector<512x16xf32>
    %c0_1 = arith.constant 0 : index
    %c0_2 = arith.constant 0 : index
    %1 = vector.load %arg2[%c0_1, %c0_2] : memref<1x16xf32, #tpu.memory_space<vmem>>, vector<1x16xf32>
    %2 = vector.broadcast %1 : vector<1x16xf32> to vector<512x16xf32>
    %3 = arith.mulf %0, %2 : vector<512x16xf32>
    %c0_3 = arith.constant 0 : index
    %c0_4 = arith.constant 0 : index
    %4 = vector.load %arg3[%c0_3, %c0_4] : memref<1x16xf32, #tpu.memory_space<vmem>>, vector<1x16xf32>
    %5 = vector.broadcast %4 : vector<1x16xf32> to vector<512x16xf32>
    %6 = arith.addf %3, %5 : vector<512x16xf32>
    %cst = arith.constant 0.000000e+00 : f32
    %7 = vector.broadcast %cst : f32 to vector<512x16xf32>
    %8 = arith.maximumf %6, %7 : vector<512x16xf32>
    %c0_5 = arith.constant 0 : index
    %c0_6 = arith.constant 0 : index
    %9 = vector.load %arg4[%c0_5, %c0_6] : memref<512x16xf32, #tpu.memory_space<vmem>>, vector<512x16xf32>
    tpu.vector_store %arg4[%c0_5, %c0_6], %8 {strides = array<i32>} : memref<512x16xf32, #tpu.memory_space<vmem>>, vector<512x16xf32>,
    return
  }
  func.func @transform_0(%arg0: i32) -> (i32, i32) {
    %c0_i32 = arith.constant 0 : i32
    %c0_i32_0 = arith.constant 0 : i32
    return %arg0, %c0_i32 : i32, i32
  }
  func.func @transform_1(%arg0: i32) -> (i32, i32) {
    %c0_i32 = arith.constant 0 : i32
    %c0_i32_0 = arith.constant 0 : i32
    %c0_i32_1 = arith.constant 0 : i32
    return %c0_i32, %c0_i32_0 : i32, i32
  }
  func.func @transform_2(%arg0: i32) -> (i32, i32) {
    %c0_i32 = arith.constant 0 : i32
    %c0_i32_0 = arith.constant 0 : i32
    %c0_i32_1 = arith.constant 0 : i32
    return %c0_i32, %c0_i32_0 : i32, i32
  }
  func.func @transform_3(%arg0: i32) -> (i32, i32) {
    %c0_i32 = arith.constant 0 : i32
    %c0_i32_0 = arith.constant 0 : i32
    return %arg0, %c0_i32 : i32, i32
  }
}

module attributes {stable_mosaic.version = 11 : i64} {
  func.func @_matmul_kernel(%arg0: i32, %arg1: i32, %arg2: i32, %arg3: memref<256x64xbf16, #tpu.memory_space<vmem>>, %arg4: memref<64x128xbf16, #tpu.memory_space<vmem>>, %arg5: memref<256x128xf32, #tpu.memory_space<vmem>>, %arg6: memref<256x128xf32, #tpu.memory_space<vmem>>) attributes {dimension_semantics = [#tpu.dimension_semantics<parallel>, #tpu.dimension_semantics<parallel>, #tpu.dimension_semantics<arbitrary>], iteration_bounds = array<i64: 3, 1, 1>, scalar_prefetch = 0 : i64, scratch_operands = 1 : i64, tpu.core_type = #tpu.core_type<tc>, window_params = [{transform_indices = @transform_0, window_bounds = array<i64: 256, 64>}, {transform_indices = @transform_1, window_bounds = array<i64: 64, 128>}, {transform_indices = @transform_2, window_bounds = array<i64: 256, 128>}]} {
    %c0_i32 = arith.constant 0 : i32
    %0 = arith.cmpi eq, %arg2, %c0_i32 : i32
    %1 = arith.extui %0 : i1 to i32
    %c0_i32_0 = arith.constant 0 : i32
    %2 = arith.cmpi ne, %1, %c0_i32_0 : i32
    scf.if %2 {
      %cst_10 = arith.constant 0.000000e+00 : f32
      %12 = vector.broadcast %cst_10 : f32 to vector<256x128xf32>
      %c0_11 = arith.constant 0 : index
      %c0_12 = arith.constant 0 : index
      %13 = vector.load %arg6[%c0_11, %c0_12] : memref<256x128xf32, #tpu.memory_space<vmem>>, vector<256x128xf32>
      tpu.vector_store %arg6[%c0_11, %c0_12], %12 {strides = array<i32>} : memref<256x128xf32, #tpu.memory_space<vmem>>, vector<256x128xf32>,
    } else {
    }
    %c0 = arith.constant 0 : index
    %c0_1 = arith.constant 0 : index
    %3 = vector.load %arg6[%c0, %c0_1] : memref<256x128xf32, #tpu.memory_space<vmem>>, vector<256x128xf32>
    %c0_2 = arith.constant 0 : index
    %c0_3 = arith.constant 0 : index
    %4 = vector.load %arg3[%c0_2, %c0_3] : memref<256x64xbf16, #tpu.memory_space<vmem>>, vector<256x64xbf16>
    %c0_4 = arith.constant 0 : index
    %c0_5 = arith.constant 0 : index
    %5 = vector.load %arg4[%c0_4, %c0_5] : memref<64x128xbf16, #tpu.memory_space<vmem>>, vector<64x128xbf16>
    %cst = arith.constant dense<0.000000e+00> : vector<256x128xf32>
    %6 = tpu.matmul %4, %5, %cst {dimension_numbers = #tpu.dot_dimension_numbers<[1], [0], [0], [1], [0, 0, 1, 1], [], []>} : vector<256x64xbf16>, vector<64x128xbf16>, vector<256x128xf32> -> vector<256x128xf32>
    %7 = arith.addf %3, %6 : vector<256x128xf32>
    %c0_6 = arith.constant 0 : index
    %c0_7 = arith.constant 0 : index
    %8 = vector.load %arg6[%c0_6, %c0_7] : memref<256x128xf32, #tpu.memory_space<vmem>>, vector<256x128xf32>
    tpu.vector_store %arg6[%c0_6, %c0_7], %7 {strides = array<i32>} : memref<256x128xf32, #tpu.memory_space<vmem>>, vector<256x128xf32>,
    %c0_i32_8 = arith.constant 0 : i32
    %9 = arith.cmpi eq, %arg2, %c0_i32_8 : i32
    %10 = arith.extui %9 : i1 to i32
    %c0_i32_9 = arith.constant 0 : i32
    %11 = arith.cmpi ne, %10, %c0_i32_9 : i32
    scf.if %11 {
      %c0_10 = arith.constant 0 : index
      %c0_11 = arith.constant 0 : index
      %12 = vector.load %arg6[%c0_10, %c0_11] : memref<256x128xf32, #tpu.memory_space<vmem>>, vector<256x128xf32>
      %c0_12 = arith.constant 0 : index
      %c0_13 = arith.constant 0 : index
      %13 = vector.load %arg5[%c0_12, %c0_13] : memref<256x128xf32, #tpu.memory_space<vmem>>, vector<256x128xf32>
      tpu.vector_store %arg5[%c0_12, %c0_13], %12 {strides = array<i32>} : memref<256x128xf32, #tpu.memory_space<vmem>>, vector<256x128xf32>,
    } else {
    }
    return
  }
  func.func @transform_0(%arg0: i32, %arg1: i32, %arg2: i32) -> (i32, i32) {
    %c0_i32 = arith.constant 0 : i32
    return %arg0, %arg2 : i32, i32
  }
  func.func @transform_1(%arg0: i32, %arg1: i32, %arg2: i32) -> (i32, i32) {
    %c0_i32 = arith.constant 0 : i32
    return %arg2, %arg1 : i32, i32
  }
  func.func @transform_2(%arg0: i32, %arg1: i32, %arg2: i32) -> (i32, i32) {
    %c0_i32 = arith.constant 0 : i32
    return %arg0, %arg1 : i32, i32
  }
}

module attributes {stable_mosaic.version = 11 : i64} {
  func.func @_bn_stats_kernel(%arg0: i32, %arg1: memref<512x8xf32, #tpu.memory_space<vmem>>, %arg2: memref<1x8xf32, #tpu.memory_space<vmem>>, %arg3: memref<1x8xf32, #tpu.memory_space<vmem>>) attributes {dimension_semantics = [#tpu.dimension_semantics<arbitrary>], iteration_bounds = array<i64: 4>, scalar_prefetch = 0 : i64, scratch_operands = 0 : i64, tpu.core_type = #tpu.core_type<tc>, window_params = [{transform_indices = @transform_0, window_bounds = array<i64: 512, 8>}, {pipeline_mode = #tpu.pipeline_mode<synchronous>, transform_indices = @transform_1, window_bounds = array<i64: 1, 8>}, {pipeline_mode = #tpu.pipeline_mode<synchronous>, transform_indices = @transform_2, window_bounds = array<i64: 1, 8>}]} {
    %c0_i32 = arith.constant 0 : i32
    %0 = arith.cmpi eq, %arg0, %c0_i32 : i32
    %1 = arith.extui %0 : i1 to i32
    %c0_i32_0 = arith.constant 0 : i32
    %2 = arith.cmpi ne, %1, %c0_i32_0 : i32
    scf.if %2 {
      %cst_11 = arith.constant 0.000000e+00 : f32
      %15 = vector.broadcast %cst_11 : f32 to vector<1x8xf32>
      %c0_12 = arith.constant 0 : index
      %c0_13 = arith.constant 0 : index
      %16 = vector.load %arg2[%c0_12, %c0_13] : memref<1x8xf32, #tpu.memory_space<vmem>>, vector<1x8xf32>
      tpu.vector_store %arg2[%c0_12, %c0_13], %15 {strides = array<i32>} : memref<1x8xf32, #tpu.memory_space<vmem>>, vector<1x8xf32>,
      %cst_14 = arith.constant 0.000000e+00 : f32
      %17 = vector.broadcast %cst_14 : f32 to vector<1x8xf32>
      %c0_15 = arith.constant 0 : index
      %c0_16 = arith.constant 0 : index
      %18 = vector.load %arg3[%c0_15, %c0_16] : memref<1x8xf32, #tpu.memory_space<vmem>>, vector<1x8xf32>
      tpu.vector_store %arg3[%c0_15, %c0_16], %17 {strides = array<i32>} : memref<1x8xf32, #tpu.memory_space<vmem>>, vector<1x8xf32>,
    } else {
    }
    %c0 = arith.constant 0 : index
    %c0_1 = arith.constant 0 : index
    %3 = vector.load %arg1[%c0, %c0_1] : memref<512x8xf32, #tpu.memory_space<vmem>>, vector<512x8xf32>
    %c0_2 = arith.constant 0 : index
    %c0_3 = arith.constant 0 : index
    %4 = vector.load %arg2[%c0_2, %c0_3] : memref<1x8xf32, #tpu.memory_space<vmem>>, vector<1x8xf32>
    %cst = arith.constant dense<0.000000e+00> : vector<8xf32>
    %5 = vector.multi_reduction <add>, %3, %cst [0] : vector<512x8xf32> to vector<8xf32>
    %6 = vector.shape_cast %5 : vector<8xf32> to vector<1x8xf32>
    %7 = arith.addf %4, %6 : vector<1x8xf32>
    %c0_4 = arith.constant 0 : index
    %c0_5 = arith.constant 0 : index
    %8 = vector.load %arg2[%c0_4, %c0_5] : memref<1x8xf32, #tpu.memory_space<vmem>>, vector<1x8xf32>
    tpu.vector_store %arg2[%c0_4, %c0_5], %7 {strides = array<i32>} : memref<1x8xf32, #tpu.memory_space<vmem>>, vector<1x8xf32>,
    %c0_6 = arith.constant 0 : index
    %c0_7 = arith.constant 0 : index
    %9 = vector.load %arg3[%c0_6, %c0_7] : memref<1x8xf32, #tpu.memory_space<vmem>>, vector<1x8xf32>
    %10 = arith.mulf %3, %3 : vector<512x8xf32>
    %cst_8 = arith.constant dense<0.000000e+00> : vector<8xf32>
    %11 = vector.multi_reduction <add>, %10, %cst_8 [0] : vector<512x8xf32> to vector<8xf32>
    %12 = vector.shape_cast %11 : vector<8xf32> to vector<1x8xf32>
    %13 = arith.addf %9, %12 : vector<1x8xf32>
    %c0_9 = arith.constant 0 : index
    %c0_10 = arith.constant 0 : index
    %14 = vector.load %arg3[%c0_9, %c0_10] : memref<1x8xf32, #tpu.memory_space<vmem>>, vector<1x8xf32>
    tpu.vector_store %arg3[%c0_9, %c0_10], %13 {strides = array<i32>} : memref<1x8xf32, #tpu.memory_space<vmem>>, vector<1x8xf32>,
    return
  }
  func.func @transform_0(%arg0: i32) -> (i32, i32) {
    %c0_i32 = arith.constant 0 : i32
    %c0_i32_0 = arith.constant 0 : i32
    return %arg0, %c0_i32 : i32, i32
  }
  func.func @transform_1(%arg0: i32) -> (i32, i32) {
    %c0_i32 = arith.constant 0 : i32
    %c0_i32_0 = arith.constant 0 : i32
    %c0_i32_1 = arith.constant 0 : i32
    return %c0_i32, %c0_i32_0 : i32, i32
  }
  func.func @transform_2(%arg0: i32) -> (i32, i32) {
    %c0_i32 = arith.constant 0 : i32
    %c0_i32_0 = arith.constant 0 : i32
    %c0_i32_1 = arith.constant 0 : i32
    return %c0_i32, %c0_i32_0 : i32, i32
  }
}

module attributes {stable_mosaic.version = 11 : i64} {
  func.func @_affine_relu_kernel(%arg0: i32, %arg1: memref<512x8xf32, #tpu.memory_space<vmem>>, %arg2: memref<1x8xf32, #tpu.memory_space<vmem>>, %arg3: memref<1x8xf32, #tpu.memory_space<vmem>>, %arg4: memref<512x8xf32, #tpu.memory_space<vmem>>) attributes {dimension_semantics = [#tpu.dimension_semantics<parallel>], iteration_bounds = array<i64: 4>, scalar_prefetch = 0 : i64, scratch_operands = 0 : i64, tpu.core_type = #tpu.core_type<tc>, window_params = [{transform_indices = @transform_0, window_bounds = array<i64: 512, 8>}, {pipeline_mode = #tpu.pipeline_mode<synchronous>, transform_indices = @transform_1, window_bounds = array<i64: 1, 8>}, {pipeline_mode = #tpu.pipeline_mode<synchronous>, transform_indices = @transform_2, window_bounds = array<i64: 1, 8>}, {transform_indices = @transform_3, window_bounds = array<i64: 512, 8>}]} {
    %c0 = arith.constant 0 : index
    %c0_0 = arith.constant 0 : index
    %0 = vector.load %arg1[%c0, %c0_0] : memref<512x8xf32, #tpu.memory_space<vmem>>, vector<512x8xf32>
    %c0_1 = arith.constant 0 : index
    %c0_2 = arith.constant 0 : index
    %1 = vector.load %arg2[%c0_1, %c0_2] : memref<1x8xf32, #tpu.memory_space<vmem>>, vector<1x8xf32>
    %2 = vector.broadcast %1 : vector<1x8xf32> to vector<512x8xf32>
    %3 = arith.mulf %0, %2 : vector<512x8xf32>
    %c0_3 = arith.constant 0 : index
    %c0_4 = arith.constant 0 : index
    %4 = vector.load %arg3[%c0_3, %c0_4] : memref<1x8xf32, #tpu.memory_space<vmem>>, vector<1x8xf32>
    %5 = vector.broadcast %4 : vector<1x8xf32> to vector<512x8xf32>
    %6 = arith.addf %3, %5 : vector<512x8xf32>
    %cst = arith.constant 0.000000e+00 : f32
    %7 = vector.broadcast %cst : f32 to vector<512x8xf32>
    %8 = arith.maximumf %6, %7 : vector<512x8xf32>
    %c0_5 = arith.constant 0 : index
    %c0_6 = arith.constant 0 : index
    %9 = vector.load %arg4[%c0_5, %c0_6] : memref<512x8xf32, #tpu.memory_space<vmem>>, vector<512x8xf32>
    tpu.vector_store %arg4[%c0_5, %c0_6], %8 {strides = array<i32>} : memref<512x8xf32, #tpu.memory_space<vmem>>, vector<512x8xf32>,
    return
  }
  func.func @transform_0(%arg0: i32) -> (i32, i32) {
    %c0_i32 = arith.constant 0 : i32
    %c0_i32_0 = arith.constant 0 : i32
    return %arg0, %c0_i32 : i32, i32
  }
  func.func @transform_1(%arg0: i32) -> (i32, i32) {
    %c0_i32 = arith.constant 0 : i32
    %c0_i32_0 = arith.constant 0 : i32
    %c0_i32_1 = arith.constant 0 : i32
    return %c0_i32, %c0_i32_0 : i32, i32
  }
  func.func @transform_2(%arg0: i32) -> (i32, i32) {
    %c0_i32 = arith.constant 0 : i32
    %c0_i32_0 = arith.constant 0 : i32
    %c0_i32_1 = arith.constant 0 : i32
    return %c0_i32, %c0_i32_0 : i32, i32
  }
  func.func @transform_3(%arg0: i32) -> (i32, i32) {
    %c0_i32 = arith.constant 0 : i32
    %c0_i32_0 = arith.constant 0 : i32
    return %arg0, %c0_i32 : i32, i32
  }
}

module attributes {stable_mosaic.version = 11 : i64} {
  func.func @_matmul_kernel(%arg0: i32, %arg1: i32, %arg2: i32, %arg3: memref<256x32xbf16, #tpu.memory_space<vmem>>, %arg4: memref<32x128xbf16, #tpu.memory_space<vmem>>, %arg5: memref<256x128xf32, #tpu.memory_space<vmem>>, %arg6: memref<256x128xf32, #tpu.memory_space<vmem>>) attributes {dimension_semantics = [#tpu.dimension_semantics<parallel>, #tpu.dimension_semantics<parallel>, #tpu.dimension_semantics<arbitrary>], iteration_bounds = array<i64: 9, 1, 1>, scalar_prefetch = 0 : i64, scratch_operands = 1 : i64, tpu.core_type = #tpu.core_type<tc>, window_params = [{transform_indices = @transform_0, window_bounds = array<i64: 256, 32>}, {transform_indices = @transform_1, window_bounds = array<i64: 32, 128>}, {transform_indices = @transform_2, window_bounds = array<i64: 256, 128>}]} {
    %c0_i32 = arith.constant 0 : i32
    %0 = arith.cmpi eq, %arg2, %c0_i32 : i32
    %1 = arith.extui %0 : i1 to i32
    %c0_i32_0 = arith.constant 0 : i32
    %2 = arith.cmpi ne, %1, %c0_i32_0 : i32
    scf.if %2 {
      %cst_10 = arith.constant 0.000000e+00 : f32
      %12 = vector.broadcast %cst_10 : f32 to vector<256x128xf32>
      %c0_11 = arith.constant 0 : index
      %c0_12 = arith.constant 0 : index
      %13 = vector.load %arg6[%c0_11, %c0_12] : memref<256x128xf32, #tpu.memory_space<vmem>>, vector<256x128xf32>
      tpu.vector_store %arg6[%c0_11, %c0_12], %12 {strides = array<i32>} : memref<256x128xf32, #tpu.memory_space<vmem>>, vector<256x128xf32>,
    } else {
    }
    %c0 = arith.constant 0 : index
    %c0_1 = arith.constant 0 : index
    %3 = vector.load %arg6[%c0, %c0_1] : memref<256x128xf32, #tpu.memory_space<vmem>>, vector<256x128xf32>
    %c0_2 = arith.constant 0 : index
    %c0_3 = arith.constant 0 : index
    %4 = vector.load %arg3[%c0_2, %c0_3] : memref<256x32xbf16, #tpu.memory_space<vmem>>, vector<256x32xbf16>
    %c0_4 = arith.constant 0 : index
    %c0_5 = arith.constant 0 : index
    %5 = vector.load %arg4[%c0_4, %c0_5] : memref<32x128xbf16, #tpu.memory_space<vmem>>, vector<32x128xbf16>
    %cst = arith.constant dense<0.000000e+00> : vector<256x128xf32>
    %6 = tpu.matmul %4, %5, %cst {dimension_numbers = #tpu.dot_dimension_numbers<[1], [0], [0], [1], [0, 0, 1, 1], [], []>} : vector<256x32xbf16>, vector<32x128xbf16>, vector<256x128xf32> -> vector<256x128xf32>
    %7 = arith.addf %3, %6 : vector<256x128xf32>
    %c0_6 = arith.constant 0 : index
    %c0_7 = arith.constant 0 : index
    %8 = vector.load %arg6[%c0_6, %c0_7] : memref<256x128xf32, #tpu.memory_space<vmem>>, vector<256x128xf32>
    tpu.vector_store %arg6[%c0_6, %c0_7], %7 {strides = array<i32>} : memref<256x128xf32, #tpu.memory_space<vmem>>, vector<256x128xf32>,
    %c0_i32_8 = arith.constant 0 : i32
    %9 = arith.cmpi eq, %arg2, %c0_i32_8 : i32
    %10 = arith.extui %9 : i1 to i32
    %c0_i32_9 = arith.constant 0 : i32
    %11 = arith.cmpi ne, %10, %c0_i32_9 : i32
    scf.if %11 {
      %c0_10 = arith.constant 0 : index
      %c0_11 = arith.constant 0 : index
      %12 = vector.load %arg6[%c0_10, %c0_11] : memref<256x128xf32, #tpu.memory_space<vmem>>, vector<256x128xf32>
      %13 = math.tanh %12 : vector<256x128xf32>
      %c0_12 = arith.constant 0 : index
      %c0_13 = arith.constant 0 : index
      %14 = vector.load %arg5[%c0_12, %c0_13] : memref<256x128xf32, #tpu.memory_space<vmem>>, vector<256x128xf32>
      tpu.vector_store %arg5[%c0_12, %c0_13], %13 {strides = array<i32>} : memref<256x128xf32, #tpu.memory_space<vmem>>, vector<256x128xf32>,
    } else {
    }
    return
  }
  func.func @transform_0(%arg0: i32, %arg1: i32, %arg2: i32) -> (i32, i32) {
    %c0_i32 = arith.constant 0 : i32
    return %arg0, %arg2 : i32, i32
  }
  func.func @transform_1(%arg0: i32, %arg1: i32, %arg2: i32) -> (i32, i32) {
    %c0_i32 = arith.constant 0 : i32
    return %arg2, %arg1 : i32, i32
  }
  func.func @transform_2(%arg0: i32, %arg1: i32, %arg2: i32) -> (i32, i32) {
    %c0_i32 = arith.constant 0 : i32
    return %arg0, %arg1 : i32, i32
  }
}

</mosaic_0001>

<bundles_post_ra>
// kernel: netG_forward.12
= control target key start
LH: loop header
LB: loop body
LE: loop exit
PB: predicated region body
PF: predicated region fallthrough
CT: control target
= control target key end

     0   :  { %vm14_vm0 = vcmask 516096   ;;  %vm22_vm1 = vcmask 523264   ;;  %v68_v0 = vmov 0.0   ;;  %s126_s0 = inlined_call_operand.vmem [shape: f32[32,64], index: 0, kind: input, shape index: {}]   ;;  %s127_s1 = inlined_call_operand.vmem [shape: f32[1,64], index: 1, kind: output, shape index: {0}]   ;;  %s128_s2 = inlined_call_operand.vmem [shape: f32[1,64], index: 2, kind: output, shape index: {1}]  }
   0x1   :  { %15 = vst.msk [vmem:[%s127_s1] sm:$0x1] %vm14_vm0, %v68_v0  ;;  %v17_v1 = vld [vmem:[%s126_s0] sm:$0xff]  ;;  %v18_v2 = vld [vmem:[%s126_s0 + $0x8] sm:$0xff]  ;;  %v19_v3 = vld [vmem:[%s126_s0 + $0x10] sm:$0xff] }
   0x2   :  { %16 = vst.msk [vmem:[%s128_s2] sm:$0x1] %vm14_vm0, %v68_v0  ;;  %v20_v4 = vld [vmem:[%s126_s0 + $0x18] sm:$0xff]  ;;  %v23_v5 = vsel %vm22_vm1, %v17_v1, 0.0  ;;  %v24_v6 = vsel %vm22_vm1, %v18_v2, 0.0  ;;  %v26_v7 = vsel %vm22_vm1, %v19_v3, 0.0  ;;  %v40_v8 = vmul.f32 %v17_v1, %v17_v1 }
   0x3   :  { %v25_v9 = vadd.f32 %v24_v6, %v23_v5  ;;  %v41_v10 = vmul.f32 %v18_v2, %v18_v2  ;;  %v42_v11 = vmul.f32 %v19_v3, %v19_v3  ;;  %v28_v12 = vsel %vm22_vm1, %v20_v4, 0.0 }
   0x4   :  { %v43_v13 = vmul.f32 %v20_v4, %v20_v4  ;;  %v44_v14 = vsel %vm22_vm1, %v40_v8, 0.0 }
   0x5   :  { %v27_v15 = vadd.f32 %v26_v7, %v25_v9  ;;  %v45_v16 = vsel %vm22_vm1, %v41_v10, 0.0  ;;  %v47_v17 = vsel %vm22_vm1, %v42_v11, 0.0 }
   0x6   :  { %v46_v18 = vadd.f32 %v45_v16, %v44_v14  ;;  %v49_v20 = vsel %vm22_vm1, %v43_v13, 0.0 }
   0x7   :  { %v29_v19 = vadd.f32 %v28_v12, %v27_v15 }
   0x8   :  { %v48_v21 = vadd.f32 %v47_v17, %v46_v18  ;;  %v21_v31 = vld [vmem:[%s127_s1] sm:$0x1] }
   0x9   :  { %v30_v22 = vrot.slane %v29_v19, 4  ;;  %v39_v36 = vld [vmem:[%s128_s2] sm:$0x1] }
   0xa   :  { %v50_v23 = vadd.f32 %v49_v20, %v48_v21 }
   0xb   :  { %v31_v24 = vadd.f32 %v30_v22, %v29_v19 }
   0xc   :  { %v51_v25 = vrot.slane %v50_v23, 4 }
   0xd   :  { %v32_v26 = vrot.slane %v31_v24, 2 }
   0xe   :  { %v52_v27 = vadd.f32 %v51_v25, %v50_v23 }
   0xf   :  { %v33_v28 = vadd.f32 %v32_v26, %v31_v24 }
  0x10   :  { %v53_v29 = vrot.slane %v52_v27, 2 }
  0x11   :  { %v34_v30 = vrot.slane %v33_v28, 1 }
  0x12   :  { %v54_v32 = vadd.f32 %v53_v29, %v52_v27 }
  0x13   :  { %v35_v33 = vadd.f32 %v34_v30, %v33_v28 }
  0x14   :  { %v55_v34 = vrot.slane %v54_v32, 1 }
  0x15   :  { %v36_v35 = vadd.f32 %v35_v33, %v21_v31 }
  0x16   :  { %v56_v37 = vadd.f32 %v55_v34, %v54_v32 }
  0x17   :  { %38 = vst.msk [vmem:[%s127_s1] sm:$0x1] %vm14_vm0, %v36_v35 }
  0x18   :  { %v57_v38 = vadd.f32 %v56_v37, %v39_v36 }
  0x1a   :  { %58 = vst.msk [vmem:[%s128_s2] sm:$0x1] %vm14_vm0, %v57_v38 }

// kernel: netG_forward.13
= control target key start
LH: loop header
LB: loop body
LE: loop exit
PB: predicated region body
PF: predicated region fallthrough
CT: control target
= control target key end

     0   :  { %vm44_vm0 = vcmask 523264   ;;  %s105_s0 = inlined_call_operand.vmem [shape: f32[32,64], index: 0, kind: input, shape index: {}]   ;;  %s106_s1 = inlined_call_operand.vmem [shape: f32[1,64], index: 1, kind: input, shape index: {}]   ;;  %s107_s2 = inlined_call_operand.vmem [shape: f32[1,64], index: 2, kind: input, shape index: {}]   ;;  %s108_s3 = inlined_call_operand.vmem [shape: f32[32,64], index: 3, kind: output, shape index: {}]  }
   0x1   :  { %v14_v0 = vld [vmem:[%s105_s0] sm:$0xff]  ;;  %v15_v4 = vld [vmem:[%s105_s0 + $0x8] sm:$0xff]  ;;  %v16_v5 = vld [vmem:[%s105_s0 + $0x10] sm:$0xff] }
   0x2   :  { %v53_v1 = vld [vmem:[%s106_s1] ss:$0 sm:$0xff]  ;;  %v17_v6 = vld [vmem:[%s105_s0 + $0x18] sm:$0xff] }
   0x3   :  { %v54_v2 = vld [vmem:[%s107_s2] ss:$0 sm:$0xff]  ;;  %v25_v3 = vmul.f32 %v53_v1, %v14_v0  ;;  %v26_v7 = vmul.f32 %v53_v1, %v15_v4  ;;  %v27_v8 = vmul.f32 %v53_v1, %v16_v5  ;;  %v28_v9 = vmul.f32 %v53_v1, %v17_v6 }
   0x5   :  { %v36_v10 = vadd.f32 %v54_v2, %v25_v3  ;;  %v37_v11 = vadd.f32 %v54_v2, %v26_v7  ;;  %v38_v12 = vadd.f32 %v54_v2, %v27_v8  ;;  %v39_v13 = vadd.f32 %v54_v2, %v28_v9 }
   0x7   :  { %v40_v14 = vmax.f32 %v36_v10, 0.0  ;;  %v41_v15 = vmax.f32 %v37_v11, 0.0  ;;  %v42_v16 = vmax.f32 %v38_v12, 0.0  ;;  %v43_v17 = vmax.f32 %v39_v13, 0.0 }
   0x9   :  { %45 = vst.msk [vmem:[%s108_s3] sm:$0xff] %vm44_vm0, %v40_v14  ;;  %46 = vst.msk [vmem:[%s108_s3 + $0x8] sm:$0xff] %vm44_vm0, %v41_v15 }
   0xa   :  { %47 = vst.msk [vmem:[%s108_s3 + $0x10] sm:$0xff] %vm44_vm0, %v42_v16  ;;  %48 = vst.msk [vmem:[%s108_s3 + $0x18] sm:$0xff] %vm44_vm0, %v43_v17 }

// kernel: netG_forward.14
= control target key start
LH: loop header
LB: loop body
LE: loop exit
PB: predicated region body
PF: predicated region fallthrough
CT: control target
= control target key end

     0   :  { %s513_s1 = inlined_call_operand.vmem [shape: bf16[256,128], index: 1, kind: input, shape index: {}]   ;;  %s514_s0 = inlined_call_operand.vmem [shape: bf16[56,256], index: 0, kind: input, shape index: {}]   ;;  %s515_s2 = inlined_call_operand.vmem [shape: f32[56,128], index: 2, kind: output, shape index: {}]  }
   0x1   :  { %v381_v0 = vld [vmem:[%s513_s1 + $0x40] sm:$0xff]   ;;  %v383_v2 = vld [vmem:[%s513_s1 + $0x48] sm:$0xff]   ;;  %v385_v4 = vld [vmem:[%s513_s1 + $0x50] sm:$0xff]  }
   0x2   :  { %v382_v1 = vld [vmem:[%s513_s1] sm:$0xff]   ;;  %325 = vmatprep.subr.bf16.mxu0 %v381_v0  ;;  %365 = vmatprep.subr.bf16.mxu1 %v381_v0  ;;  %v384_v3 = vld [vmem:[%s513_s1 + $0x8] sm:$0xff]   ;;  %v386_v5 = vld [vmem:[%s513_s1 + $0x10] sm:$0xff]  }
   0x3   :  { %326 = vmatpush3.bf16.msra.mxu0 %v382_v1  ;;  %373 = vmatpush3.bf16.msra.mxu1 %v382_v1  ;;  %v387_v6 = vld [vmem:[%s513_s1 + $0x58] sm:$0xff]   ;;  %v389_v8 = vld [vmem:[%s513_s1 + $0x60] sm:$0xff]   ;;  %v391_v10 = vld [vmem:[%s513_s1 + $0x68] sm:$0xff]  }
   0x4   :  { %327 = vmatprep.subr.bf16.mxu0 %v383_v2  ;;  %366 = vmatprep.subr.bf16.mxu1 %v383_v2  ;;  %v388_v7 = vld [vmem:[%s513_s1 + $0x18] sm:$0xff]   ;;  %v390_v9 = vld [vmem:[%s513_s1 + $0x20] sm:$0xff]   ;;  %v392_v13 = vld [vmem:[%s513_s1 + $0x28] sm:$0xff]  }
   0x5   :  { %v399_v11 = vld [vmem:[%s514_s0 + $0x4] ss:$8 sps:$4 sm:$0xff]   ;;  %v393_v14 = vld [vmem:[%s513_s1 + $0x70] sm:$0xff]   ;;  %v395_v16 = vld [vmem:[%s513_s1 + $0x78] sm:$0xff]  }
   0x6   :  { %v402_v12 = vld [vmem:[%s514_s0 + $0x24] ss:$8 sps:$4 sm:$0xff]   ;;  %234 = vmatprep.mubr.bf16.mxu0 %v399_v11  ;;  %v394_v15 = vld [vmem:[%s513_s1 + $0x30] sm:$0xff]   ;;  %v396_v17 = vld [vmem:[%s513_s1 + $0x38] sm:$0xff]  }
   0x7   :  { %328 = vmatpush3.bf16.msra.mxu0 %v384_v3  ;;  %374 = vmatpush3.bf16.msra.mxu1 %v384_v3  ;;  %v36_v18 = vld [vmem:[%s514_s0 + $0x30] sm:$0xff]  ;;  %v397_v19 = vld [vmem:[%s514_s0] ss:$8 sps:$4 sm:$0xff]  }
   0x8   :  { %329 = vmatprep.subr.bf16.mxu0 %v385_v4  ;;  %367 = vmatprep.subr.bf16.mxu1 %v385_v4  ;;  %v400_v20 = vld [vmem:[%s514_s0 + $0x20] ss:$8 sps:$4 sm:$0xff]   ;;  %v403_v21 = vld [vmem:[%s514_s0 + $0x14] ss:$8 sps:$4 sm:$0xff]   ;;  %v308_v22 = vcombine.high %v36_v18, %v36_v18  ;;  %v406_v23 = vld [vmem:[%s514_s0 + $0x10] ss:$8 sps:$4 sm:$0xff]   ;;  %v307_v24 = vcombine.low %v36_v18, %v36_v18 }
   0x9   :  { %250 = vmatprep.mubr.bf16.mxu1 %v402_v12 }
   0xb   :  { %330 = vmatpush3.bf16.msra.mxu0 %v386_v5  ;;  %375 = vmatpush3.bf16.msra.mxu1 %v386_v5 }
   0xc   :  { %331 = vmatprep.subr.bf16.mxu0 %v387_v6  ;;  %368 = vmatprep.subr.bf16.mxu1 %v387_v6 }
   0xf   :  { %332 = vmatpush3.bf16.msra.mxu0 %v388_v7  ;;  %376 = vmatpush3.bf16.msra.mxu1 %v388_v7 }
  0x10   :  { %333 = vmatprep.subr.bf16.mxu0 %v389_v8  ;;  %369 = vmatprep.subr.bf16.mxu1 %v389_v8 }
  0x13   :  { %334 = vmatpush3.bf16.msra.mxu0 %v390_v9  ;;  %377 = vmatpush3.bf16.msra.mxu1 %v390_v9 }
  0x14   :  { %335 = vmatprep.subr.bf16.mxu0 %v391_v10  ;;  %370 = vmatprep.subr.bf16.mxu1 %v391_v10 }
  0x17   :  { %336 = vmatpush3.bf16.msra.mxu0 %v392_v13  ;;  %378 = vmatpush3.bf16.msra.mxu1 %v392_v13 }
  0x18   :  { %337 = vmatprep.subr.bf16.mxu0 %v393_v14  ;;  %371 = vmatprep.subr.bf16.mxu1 %v393_v14 }
  0x1b   :  { %338 = vmatpush3.bf16.msra.mxu0 %v394_v15  ;;  %379 = vmatpush3.bf16.msra.mxu1 %v394_v15 }
  0x1c   :  { %339 = vmatprep.subr.bf16.mxu0 %v395_v16  ;;  %372 = vmatprep.subr.bf16.mxu1 %v395_v16 }
  0x1f   :  { %340 = vmatpush3.bf16.msra.mxu0 %v396_v17  ;;  %380 = vmatpush3.bf16.msra.mxu1 %v396_v17 }
  0x22   :  { %235 = vmatmul.mubr.bf16.vlgmr.msra.gmra.mrb[0].mxu0 %v397_v19  ;;  %251 = vmatmul.mubr.bf16.vlgmr.msra.gmra.mrb[0].mxu1 %v400_v20 }
  0x23   :  { %242 = vmatprep.mubr.bf16.mxu0 %v403_v21  ;;  %258 = vmatprep.mubr.bf16.mxu1 %v308_v22 }
  0x2a   :  { %243 = vmatmul.mubr.bf16.gmra.mrb[4].mxu0 %v406_v23  ;;  %259 = vmatmul.mubr.bf16.gmra.mrb[4].mxu1 %v307_v24 }
  0xf5   :  { %v341_v25 = vpop.f32.mrb[0].mxu0  ;;  %v353_v26 = vpop.f32.mrb[0].mxu1 }
  0xf6   :  { %v342_v27 = vpop.f32.mrb[1].mxu0  ;;  %v354_v28 = vpop.f32.mrb[1].mxu1 }
  0xf7   :  { %v343_v29 = vadd.f32 %v342_v27, %v341_v25  ;;  %v355_v30 = vadd.f32 %v354_v28, %v353_v26  ;;  %v344_v31 = vpop.f32.mrb[2].mxu0  ;;  %v356_v32 = vpop.f32.mrb[2].mxu1 }
  0xf8   :  { %v345_v33 = vpop.f32.mrb[3].mxu0  ;;  %v357_v34 = vpop.f32.mrb[3].mxu1 }
  0xf9   :  { %290 = vst [vmem:[%s515_s2] sm:$0xff] %v343_v29  ;;  %294 = vst [vmem:[%s515_s2 + $0x20] sm:$0xff] %v355_v30  ;;  %v346_v35 = vadd.f32 %v345_v33, %v344_v31  ;;  %v358_v36 = vadd.f32 %v357_v34, %v356_v32 }
  0xfb   :  { %291 = vst [vmem:[%s515_s2 + $0x8] sm:$0xff] %v346_v35  ;;  %295 = vst [vmem:[%s515_s2 + $0x28] sm:$0xff] %v358_v36 }
  0xfd   :  { %v347_v37 = vpop.f32.mrb[4].mxu0  ;;  %v359_v38 = vpop.f32.mrb[4].mxu1 }
  0xfe   :  { %v348_v39 = vpop.f32.mrb[5].mxu0  ;;  %v360_v40 = vpop.f32.mrb[5].mxu1 }
  0xff   :  { %v349_v41 = vadd.f32 %v348_v39, %v347_v37  ;;  %v361_v42 = vadd.f32 %v360_v40, %v359_v38  ;;  %v350_v43 = vpop.f32.mrb[6].mxu0  ;;  %v362_v44 = vpop.f32.mrb[6].mxu1 }
 0x100   :  { %v351_v45 = vpop.f32.mrb[7].mxu0  ;;  %v363_v46 = vpop.f32.mrb[7].mxu1 }
 0x101   :  { %292 = vst [vmem:[%s515_s2 + $0x10] sm:$0xff] %v349_v41  ;;  %296 = vst [vmem:[%s515_s2 + $0x30] sm:$0xff] %v361_v42  ;;  %v352_v47 = vadd.f32 %v351_v45, %v350_v43 }
 0x103   :  { %293 = vst [vmem:[%s515_s2 + $0x18] sm:$0xff] %v352_v47 }

// kernel: netG_forward.16
= control target key start
LH: loop header
LB: loop body
LE: loop exit
PB: predicated region body
PF: predicated region fallthrough
CT: control target
= control target key end

     0   :  { %vm92_vm0 = vcmask 261120   ;;  %s271_s0 = inlined_call_operand.vmem [shape: f32[128,32], index: 0, kind: input, shape index: {}]   ;;  %s272_s1 = inlined_call_operand.vmem [shape: f32[1,32], index: 1, kind: input, shape index: {}]   ;;  %s273_s2 = inlined_call_operand.vmem [shape: f32[1,32], index: 2, kind: input, shape index: {}]   ;;  %s274_s3 = inlined_call_operand.vmem [shape: f32[128,32], index: 3, kind: output, shape index: {}]  }
   0x1   :  { %v14_v0 = vld [vmem:[%s271_s0] sm:$0xff]  ;;  %v15_v4 = vld [vmem:[%s271_s0 + $0x8] sm:$0xff]  ;;  %v16_v5 = vld [vmem:[%s271_s0 + $0x10] sm:$0xff] }
   0x2   :  { %v113_v1 = vld [vmem:[%s272_s1] ss:$0 sm:$0xff]  ;;  %v17_v6 = vld [vmem:[%s271_s0 + $0x18] sm:$0xff]  ;;  %v19_v11 = vld [vmem:[%s271_s0 + $0x28] sm:$0xff] }
   0x3   :  { %v144_v2 = vld [vmem:[%s273_s2] ss:$0 sm:$0xff]  ;;  %v37_v3 = vmul.f32 %v113_v1, %v14_v0  ;;  %v38_v7 = vmul.f32 %v113_v1, %v15_v4  ;;  %v39_v8 = vmul.f32 %v113_v1, %v16_v5  ;;  %v40_v9 = vmul.f32 %v113_v1, %v17_v6  ;;  %v20_v12 = vld [vmem:[%s271_s0 + $0x30] sm:$0xff]  ;;  %v21_v17 = vld [vmem:[%s271_s0 + $0x38] sm:$0xff] }
   0x4   :  { %v18_v10 = vld [vmem:[%s271_s0 + $0x20] sm:$0xff]  ;;  %v42_v15 = vmul.f32 %v113_v1, %v19_v11  ;;  %v43_v16 = vmul.f32 %v113_v1, %v20_v12  ;;  %v44_v21 = vmul.f32 %v113_v1, %v21_v17  ;;  %v23_v27 = vld [vmem:[%s271_s0 + $0x48] sm:$0xff]  ;;  %v24_v28 = vld [vmem:[%s271_s0 + $0x50] sm:$0xff] }
   0x5   :  { %v60_v13 = vadd.f32 %v144_v2, %v37_v3  ;;  %v41_v14 = vmul.f32 %v113_v1, %v18_v10  ;;  %v61_v18 = vadd.f32 %v144_v2, %v38_v7  ;;  %v62_v19 = vadd.f32 %v144_v2, %v39_v8  ;;  %v22_v22 = vld [vmem:[%s271_s0 + $0x40] sm:$0xff]  ;;  %v25_v29 = vld [vmem:[%s271_s0 + $0x58] sm:$0xff]  ;;  %v27_v35 = vld [vmem:[%s271_s0 + $0x68] sm:$0xff] }
   0x6   :  { %v63_v20 = vadd.f32 %v144_v2, %v40_v9  ;;  %v65_v25 = vadd.f32 %v144_v2, %v42_v15  ;;  %v66_v26 = vadd.f32 %v144_v2, %v43_v16  ;;  %v67_v33 = vadd.f32 %v144_v2, %v44_v21  ;;  %v26_v34 = vld [vmem:[%s271_s0 + $0x60] sm:$0xff]  ;;  %v28_v36 = vld [vmem:[%s271_s0 + $0x70] sm:$0xff]  ;;  %v29_v41 = vld [vmem:[%s271_s0 + $0x78] sm:$0xff] }
   0x7   :  { %v76_v23 = vmax.f32 %v60_v13, 0.0  ;;  %v64_v24 = vadd.f32 %v144_v2, %v41_v14  ;;  %v77_v30 = vmax.f32 %v61_v18, 0.0  ;;  %v78_v31 = vmax.f32 %v62_v19, 0.0 }
   0x8   :  { %v79_v32 = vmax.f32 %v63_v20, 0.0  ;;  %v81_v38 = vmax.f32 %v65_v25, 0.0  ;;  %v82_v39 = vmax.f32 %v66_v26, 0.0  ;;  %v45_v40 = vmul.f32 %v113_v1, %v22_v22 }
   0x9   :  { %93 = vst.msk [vmem:[%s274_s3] sm:$0xff] %vm92_vm0, %v76_v23  ;;  %v80_v37 = vmax.f32 %v64_v24, 0.0  ;;  %94 = vst.msk [vmem:[%s274_s3 + $0x8] sm:$0xff] %vm92_vm0, %v77_v30  ;;  %v83_v42 = vmax.f32 %v67_v33, 0.0  ;;  %v46_v43 = vmul.f32 %v113_v1, %v23_v27  ;;  %v47_v44 = vmul.f32 %v113_v1, %v24_v28 }
   0xa   :  { %95 = vst.msk [vmem:[%s274_s3 + $0x10] sm:$0xff] %vm92_vm0, %v78_v31  ;;  %96 = vst.msk [vmem:[%s274_s3 + $0x18] sm:$0xff] %vm92_vm0, %v79_v32  ;;  %v48_v45 = vmul.f32 %v113_v1, %v25_v29  ;;  %v68_v46 = vadd.f32 %v144_v2, %v45_v40  ;;  %v49_v47 = vmul.f32 %v113_v1, %v26_v34 }
   0xb   :  { %97 = vst.msk [vmem:[%s274_s3 + $0x20] sm:$0xff] %vm92_vm0, %v80_v37  ;;  %98 = vst.msk [vmem:[%s274_s3 + $0x28] sm:$0xff] %vm92_vm0, %v81_v38  ;;  %v50_v48 = vmul.f32 %v113_v1, %v27_v35  ;;  %v51_v49 = vmul.f32 %v113_v1, %v28_v36  ;;  %v69_v50 = vadd.f32 %v144_v2, %v46_v43 }
   0xc   :  { %99 = vst.msk [vmem:[%s274_s3 + $0x30] sm:$0xff] %vm92_vm0, %v82_v39  ;;  %100 = vst.msk [vmem:[%s274_s3 + $0x38] sm:$0xff] %vm92_vm0, %v83_v42  ;;  %v70_v51 = vadd.f32 %v144_v2, %v47_v44  ;;  %v71_v52 = vadd.f32 %v144_v2, %v48_v45  ;;  %v52_v53 = vmul.f32 %v113_v1, %v29_v41  ;;  %v84_v54 = vmax.f32 %v68_v46, 0.0 }
   0xd   :  { %v72_v55 = vadd.f32 %v144_v2, %v49_v47  ;;  %v73_v56 = vadd.f32 %v144_v2, %v50_v48  ;;  %v74_v57 = vadd.f32 %v144_v2, %v51_v49  ;;  %v85_v58 = vmax.f32 %v69_v50, 0.0 }
   0xe   :  { %v86_v59 = vmax.f32 %v70_v51, 0.0  ;;  %v87_v60 = vmax.f32 %v71_v52, 0.0  ;;  %v75_v61 = vadd.f32 %v144_v2, %v52_v53  ;;  %101 = vst.msk [vmem:[%s274_s3 + $0x40] sm:$0xff] %vm92_vm0, %v84_v54 }
   0xf   :  { %v88_v62 = vmax.f32 %v72_v55, 0.0  ;;  %v89_v63 = vmax.f32 %v73_v56, 0.0  ;;  %v90_v0 = vmax.f32 %v74_v57, 0.0  ;;  %102 = vst.msk [vmem:[%s274_s3 + $0x48] sm:$0xff] %vm92_vm0, %v85_v58 }
  0x10   :  { %103 = vst.msk [vmem:[%s274_s3 + $0x50] sm:$0xff] %vm92_vm0, %v86_v59  ;;  %104 = vst.msk [vmem:[%s274_s3 + $0x58] sm:$0xff] %vm92_vm0, %v87_v60  ;;  %v91_v1 = vmax.f32 %v75_v61, 0.0 }
  0x11   :  { %105 = vst.msk [vmem:[%s274_s3 + $0x60] sm:$0xff] %vm92_vm0, %v88_v62  ;;  %106 = vst.msk [vmem:[%s274_s3 + $0x68] sm:$0xff] %vm92_vm0, %v89_v63 }
  0x12   :  { %107 = vst.msk [vmem:[%s274_s3 + $0x70] sm:$0xff] %vm92_vm0, %v90_v0  ;;  %108 = vst.msk [vmem:[%s274_s3 + $0x78] sm:$0xff] %vm92_vm0, %v91_v1 }

// kernel: netG_forward.15
= control target key start
LH: loop header
LB: loop body
LE: loop exit
PB: predicated region body
PF: predicated region fallthrough
CT: control target
= control target key end

     0   :  { %vm14_vm0 = vcmask 253952   ;;  %vm34_vm1 = vcmask 261120   ;;  %v140_v0 = vmov 0.0   ;;  %s258_s0 = inlined_call_operand.vmem [shape: f32[128,32], index: 0, kind: input, shape index: {}]   ;;  %s259_s1 = inlined_call_operand.vmem [shape: f32[1,32], index: 1, kind: output, shape index: {0}]   ;;  %s260_s2 = inlined_call_operand.vmem [shape: f32[1,32], index: 2, kind: output, shape index: {1}]  }
   0x1   :  { %15 = vst.msk [vmem:[%s259_s1] sm:$0x1] %vm14_vm0, %v140_v0  ;;  %v17_v1 = vld [vmem:[%s258_s0] sm:$0xff]  ;;  %v18_v2 = vld [vmem:[%s258_s0 + $0x8] sm:$0xff]  ;;  %v19_v3 = vld [vmem:[%s258_s0 + $0x10] sm:$0xff] }
   0x2   :  { %16 = vst.msk [vmem:[%s260_s2] sm:$0x1] %vm14_vm0, %v140_v0  ;;  %v35_v4 = vsel %vm34_vm1, %v17_v1, 0.0  ;;  %v36_v5 = vsel %vm34_vm1, %v18_v2, 0.0  ;;  %v38_v6 = vsel %vm34_vm1, %v19_v3, 0.0  ;;  %v20_v7 = vld [vmem:[%s258_s0 + $0x18] sm:$0xff]  ;;  %v76_v15 = vmul.f32 %v17_v1, %v17_v1 }
   0x3   :  { %v37_v8 = vadd.f32 %v36_v5, %v35_v4  ;;  %v40_v9 = vsel %vm34_vm1, %v20_v7, 0.0  ;;  %v21_v10 = vld [vmem:[%s258_s0 + $0x20] sm:$0xff]  ;;  %v22_v13 = vld [vmem:[%s258_s0 + $0x28] sm:$0xff]  ;;  %v77_v16 = vmul.f32 %v18_v2, %v18_v2  ;;  %v78_v17 = vmul.f32 %v19_v3, %v19_v3  ;;  %v23_v19 = vld [vmem:[%s258_s0 + $0x30] sm:$0xff] }
   0x4   :  { %v42_v12 = vsel %vm34_vm1, %v21_v10, 0.0  ;;  %v44_v18 = vsel %vm34_vm1, %v22_v13, 0.0  ;;  %v79_v21 = vmul.f32 %v20_v7, %v20_v7  ;;  %v46_v22 = vsel %vm34_vm1, %v23_v19, 0.0  ;;  %v24_v24 = vld [vmem:[%s258_s0 + $0x38] sm:$0xff]  ;;  %v25_v31 = vld [vmem:[%s258_s0 + $0x40] sm:$0xff]  ;;  %v26_v37 = vld [vmem:[%s258_s0 + $0x48] sm:$0xff] }
   0x5   :  { %v39_v11 = vadd.f32 %v38_v6, %v37_v8  ;;  %v80_v23 = vmul.f32 %v21_v10, %v21_v10  ;;  %v92_v26 = vsel %vm34_vm1, %v76_v15, 0.0  ;;  %v93_v27 = vsel %vm34_vm1, %v77_v16, 0.0  ;;  %v27_v43 = vld [vmem:[%s258_s0 + $0x50] sm:$0xff]  ;;  %v28_v49 = vld [vmem:[%s258_s0 + $0x58] sm:$0xff]  ;;  %v29_v55 = vld [vmem:[%s258_s0 + $0x60] sm:$0xff] }
   0x6   :  { %v95_v28 = vsel %vm34_vm1, %v78_v17, 0.0  ;;  %v48_v29 = vsel %vm34_vm1, %v24_v24, 0.0  ;;  %v94_v30 = vadd.f32 %v93_v27, %v92_v26  ;;  %v81_v33 = vmul.f32 %v22_v13, %v22_v13  ;;  %v30_v61 = vld [vmem:[%s258_s0 + $0x68] sm:$0xff]  ;;  %v31_v3 = vld [vmem:[%s258_s0 + $0x70] sm:$0xff] }
   0x7   :  { %v41_v14 = vadd.f32 %v40_v9, %v39_v11  ;;  %v97_v34 = vsel %vm34_vm1, %v79_v21, 0.0  ;;  %v50_v35 = vsel %vm34_vm1, %v25_v31, 0.0  ;;  %v82_v39 = vmul.f32 %v23_v19, %v23_v19  ;;  %v32_v9 = vld [vmem:[%s258_s0 + $0x78] sm:$0xff] }
   0x8   :  { %v96_v36 = vadd.f32 %v95_v28, %v94_v30  ;;  %v99_v40 = vsel %vm34_vm1, %v80_v23, 0.0  ;;  %v52_v41 = vsel %vm34_vm1, %v26_v37, 0.0  ;;  %v83_v45 = vmul.f32 %v24_v24, %v24_v24 }
   0x9   :  { %v43_v20 = vadd.f32 %v42_v12, %v41_v14  ;;  %v101_v46 = vsel %vm34_vm1, %v81_v33, 0.0  ;;  %v54_v47 = vsel %vm34_vm1, %v27_v43, 0.0  ;;  %v84_v51 = vmul.f32 %v25_v31, %v25_v31 }
   0xa   :  { %v98_v42 = vadd.f32 %v97_v34, %v96_v36  ;;  %v103_v52 = vsel %vm34_vm1, %v82_v39, 0.0  ;;  %v56_v53 = vsel %vm34_vm1, %v28_v49, 0.0  ;;  %v85_v57 = vmul.f32 %v26_v37, %v26_v37  ;;  %v33_v36 = vld [vmem:[%s259_s1] sm:$0x1] }
   0xb   :  { %v45_v25 = vadd.f32 %v44_v18, %v43_v20  ;;  %v105_v58 = vsel %vm34_vm1, %v83_v45, 0.0  ;;  %v58_v59 = vsel %vm34_vm1, %v29_v55, 0.0  ;;  %v86_v63 = vmul.f32 %v27_v43, %v27_v43 }
   0xc   :  { %v100_v48 = vadd.f32 %v99_v40, %v98_v42  ;;  %v107_v0 = vsel %vm34_vm1, %v84_v51, 0.0  ;;  %v60_v1 = vsel %vm34_vm1, %v30_v61, 0.0  ;;  %v87_v5 = vmul.f32 %v28_v49, %v28_v49 }
   0xd   :  { %v47_v32 = vadd.f32 %v46_v22, %v45_v25  ;;  %v109_v6 = vsel %vm34_vm1, %v85_v57, 0.0  ;;  %v62_v7 = vsel %vm34_vm1, %v31_v3, 0.0  ;;  %v88_v11 = vmul.f32 %v29_v55, %v29_v55 }
   0xe   :  { %v102_v54 = vadd.f32 %v101_v46, %v100_v48  ;;  %v111_v12 = vsel %vm34_vm1, %v86_v63, 0.0  ;;  %v64_v13 = vsel %vm34_vm1, %v32_v9, 0.0  ;;  %v89_v16 = vmul.f32 %v30_v61, %v30_v61 }
   0xf   :  { %v49_v38 = vadd.f32 %v48_v29, %v47_v32  ;;  %v113_v17 = vsel %vm34_vm1, %v87_v5, 0.0  ;;  %v90_v20 = vmul.f32 %v31_v3, %v31_v3  ;;  %v115_v21 = vsel %vm34_vm1, %v88_v11, 0.0 }
  0x10   :  { %v104_v60 = vadd.f32 %v103_v52, %v102_v54  ;;  %v91_v24 = vmul.f32 %v32_v9, %v32_v9  ;;  %v117_v25 = vsel %vm34_vm1, %v89_v16, 0.0 }
  0x11   :  { %v51_v44 = vadd.f32 %v50_v35, %v49_v38  ;;  %v119_v28 = vsel %vm34_vm1, %v90_v20, 0.0 }
  0x12   :  { %v106_v2 = vadd.f32 %v105_v58, %v104_v60  ;;  %v121_v31 = vsel %vm34_vm1, %v91_v24, 0.0 }
  0x13   :  { %v53_v50 = vadd.f32 %v52_v41, %v51_v44  ;;  %v75_v44 = vld [vmem:[%s260_s2] sm:$0x1] }
  0x14   :  { %v108_v8 = vadd.f32 %v107_v0, %v106_v2 }
  0x15   :  { %v55_v56 = vadd.f32 %v54_v47, %v53_v50 }
  0x16   :  { %v110_v14 = vadd.f32 %v109_v6, %v108_v8 }
  0x17   :  { %v57_v62 = vadd.f32 %v56_v53, %v55_v56 }
  0x18   :  { %v112_v18 = vadd.f32 %v111_v12, %v110_v14 }
  0x19   :  { %v59_v4 = vadd.f32 %v58_v59, %v57_v62 }
  0x1a   :  { %v114_v22 = vadd.f32 %v113_v17, %v112_v18 }
  0x1b   :  { %v61_v10 = vadd.f32 %v60_v1, %v59_v4 }
  0x1c   :  { %v116_v26 = vadd.f32 %v115_v21, %v114_v22 }
  0x1d   :  { %v63_v15 = vadd.f32 %v62_v7, %v61_v10 }
  0x1e   :  { %v118_v29 = vadd.f32 %v117_v25, %v116_v26 }
  0x1f   :  { %v65_v19 = vadd.f32 %v64_v13, %v63_v15 }
  0x20   :  { %v120_v32 = vadd.f32 %v119_v28, %v118_v29 }
  0x21   :  { %v66_v23 = vrot.slane %v65_v19, 4 }
  0x22   :  { %v122_v34 = vadd.f32 %v121_v31, %v120_v32 }
  0x23   :  { %v67_v27 = vadd.f32 %v66_v23, %v65_v19 }
  0x24   :  { %v123_v37 = vrot.slane %v122_v34, 4 }
  0x25   :  { %v68_v30 = vrot.slane %v67_v27, 2 }
  0x26   :  { %v124_v39 = vadd.f32 %v123_v37, %v122_v34 }
  0x27   :  { %v69_v33 = vadd.f32 %v68_v30, %v67_v27 }
  0x28   :  { %v125_v41 = vrot.slane %v124_v39, 2 }
  0x29   :  { %v70_v35 = vrot.slane %v69_v33, 1 }
  0x2a   :  { %v126_v42 = vadd.f32 %v125_v41, %v124_v39 }
  0x2b   :  { %v71_v38 = vadd.f32 %v70_v35, %v69_v33 }
  0x2c   :  { %v127_v43 = vrot.slane %v126_v42, 1 }
  0x2d   :  { %v72_v40 = vadd.f32 %v71_v38, %v33_v36 }
  0x2e   :  { %v128_v45 = vadd.f32 %v127_v43, %v126_v42 }
  0x2f   :  { %74 = vst.msk [vmem:[%s259_s1] sm:$0x1] %vm14_vm0, %v72_v40 }
  0x30   :  { %v129_v46 = vadd.f32 %v128_v45, %v75_v44 }
  0x32   :  { %130 = vst.msk [vmem:[%s260_s2] sm:$0x1] %vm14_vm0, %v129_v46 }

// kernel: netG_forward.17
= control target key start
LH: loop header
LB: loop body
LE: loop exit
PB: predicated region body
PF: predicated region fallthrough
CT: control target
= control target key end

     0   :  { %v553_v0 = vmov 0.0   ;;  %vm554_vm0 = vmmov 0   ;;  %s728_s1 = inlined_call_operand.vmem [shape: bf16[128,128], index: 1, kind: input, shape index: {}]   ;;  %s729_s0 = inlined_call_operand.vmem [shape: bf16[168,128], index: 0, kind: input, shape index: {}]   ;;  %s730_s2 = inlined_call_operand.vmem [shape: f32[168,128], index: 2, kind: output, shape index: {}]  }
   0x1   :  { %456 = vmatprep.subr.bf16.mxu0 %v553_v0  ;;  %v534_v1 = vld [vmem:[%s728_s1] sm:$0xff]   ;;  %516 = vmatprep.subr.bf16.mxu1 %v553_v0  ;;  %v535_v2 = vld [vmem:[%s728_s1 + $0x8] sm:$0xff]   ;;  %v536_v3 = vld [vmem:[%s728_s1 + $0x10] sm:$0xff]  }
   0x2   :  { %472 = vmatprep.mubr.msk.bf16.mxu0 %vm554_vm0, %v553_v0  ;;  %496 = vmatprep.mubr.msk.bf16.mxu1 %vm554_vm0, %v553_v0  ;;  %v537_v4 = vld [vmem:[%s728_s1 + $0x18] sm:$0xff]   ;;  %v538_v5 = vld [vmem:[%s728_s1 + $0x20] sm:$0xff]   ;;  %v539_v6 = vld [vmem:[%s728_s1 + $0x28] sm:$0xff]  }
   0x3   :  { %457 = vmatpush3.bf16.msra.mxu0 %v534_v1  ;;  %524 = vmatpush3.bf16.msra.mxu1 %v534_v1  ;;  %v540_v7 = vld [vmem:[%s728_s1 + $0x30] sm:$0xff]   ;;  %v541_v8 = vld [vmem:[%s728_s1 + $0x38] sm:$0xff]   ;;  %v542_v9 = vld [vmem:[%s729_s0] sm:$0xff]  }
   0x4   :  { %458 = vmatprep.subr.bf16.mxu0 %v553_v0  ;;  %517 = vmatprep.subr.bf16.mxu1 %v553_v0  ;;  %v543_v10 = vld [vmem:[%s729_s0 + $0x30] sm:$0xff]   ;;  %v544_v11 = vld [vmem:[%s729_s0 + $0x8] sm:$0xff]   ;;  %v545_v12 = vld [vmem:[%s729_s0 + $0x38] sm:$0xff]  }
   0x5   :  { %v546_v13 = vld [vmem:[%s729_s0 + $0x10] sm:$0xff]   ;;  %v547_v14 = vld [vmem:[%s729_s0 + $0x40] sm:$0xff]   ;;  %v548_v15 = vld [vmem:[%s729_s0 + $0x18] sm:$0xff]  }
   0x6   :  { %v549_v16 = vld [vmem:[%s729_s0 + $0x48] sm:$0xff]   ;;  %v550_v17 = vld [vmem:[%s729_s0 + $0x20] sm:$0xff]   ;;  %v551_v18 = vld [vmem:[%s729_s0 + $0x50] ss:$0 sps:$4 sm:$0xff]  }
   0x7   :  { %459 = vmatpush3.bf16.msra.mxu0 %v535_v2  ;;  %525 = vmatpush3.bf16.msra.mxu1 %v535_v2  ;;  %v552_v19 = vld [vmem:[%s729_s0 + $0x28] sm:$0xff]  }
   0x8   :  { %460 = vmatprep.subr.bf16.mxu0 %v553_v0  ;;  %518 = vmatprep.subr.bf16.mxu1 %v553_v0 }
   0xb   :  { %461 = vmatpush3.bf16.msra.mxu0 %v536_v3  ;;  %526 = vmatpush3.bf16.msra.mxu1 %v536_v3 }
   0xc   :  { %462 = vmatprep.subr.bf16.mxu0 %v553_v0  ;;  %519 = vmatprep.subr.bf16.mxu1 %v553_v0 }
   0xf   :  { %463 = vmatpush3.bf16.msra.mxu0 %v537_v4  ;;  %527 = vmatpush3.bf16.msra.mxu1 %v537_v4 }
  0x10   :  { %464 = vmatprep.subr.bf16.mxu0 %v553_v0  ;;  %520 = vmatprep.subr.bf16.mxu1 %v553_v0 }
  0x13   :  { %465 = vmatpush3.bf16.msra.mxu0 %v538_v5  ;;  %528 = vmatpush3.bf16.msra.mxu1 %v538_v5 }
  0x14   :  { %466 = vmatprep.subr.bf16.mxu0 %v553_v0  ;;  %521 = vmatprep.subr.bf16.mxu1 %v553_v0 }
  0x17   :  { %467 = vmatpush3.bf16.msra.mxu0 %v539_v6  ;;  %529 = vmatpush3.bf16.msra.mxu1 %v539_v6 }
  0x18   :  { %468 = vmatprep.subr.bf16.mxu0 %v553_v0  ;;  %522 = vmatprep.subr.bf16.mxu1 %v553_v0 }
  0x1b   :  { %469 = vmatpush3.bf16.msra.mxu0 %v540_v7  ;;  %530 = vmatpush3.bf16.msra.mxu1 %v540_v7 }
  0x1c   :  { %470 = vmatprep.subr.bf16.mxu0 %v553_v0  ;;  %523 = vmatprep.subr.bf16.mxu1 %v553_v0 }
  0x1f   :  { %471 = vmatpush3.bf16.msra.mxu0 %v541_v8  ;;  %531 = vmatpush3.bf16.msra.mxu1 %v541_v8 }
  0x22   :  { %473 = vmatmul.mubr.bf16.vlgmr.msra.gmra.mrb[0].mxu0 %v542_v9  ;;  %497 = vmatmul.mubr.bf16.vlgmr.msra.gmra.mrb[0].mxu1 %v543_v10 }
  0x23   :  { %476 = vmatprep.mubr.msk.bf16.mxu0 %vm554_vm0, %v553_v0  ;;  %500 = vmatprep.mubr.msk.bf16.mxu1 %vm554_vm0, %v553_v0 }
  0x2a   :  { %477 = vmatmul.mubr.bf16.gmra.mrb[4].mxu0 %v544_v11  ;;  %501 = vmatmul.mubr.bf16.gmra.mrb[4].mxu1 %v545_v12 }
  0x2b   :  { %480 = vmatprep.mubr.msk.bf16.mxu0 %vm554_vm0, %v553_v0  ;;  %504 = vmatprep.mubr.msk.bf16.mxu1 %vm554_vm0, %v553_v0 }
  0x32   :  { %481 = vmatmul.mubr.bf16.gmra.mrb[8].mxu0 %v546_v13  ;;  %505 = vmatmul.mubr.bf16.gmra.mrb[8].mxu1 %v547_v14 }
  0x33   :  { %484 = vmatprep.mubr.msk.bf16.mxu0 %vm554_vm0, %v553_v0  ;;  %508 = vmatprep.mubr.msk.bf16.mxu1 %vm554_vm0, %v553_v0 }
  0x3a   :  { %485 = vmatmul.mubr.bf16.gmra.mrb[12].mxu0 %v548_v15  ;;  %509 = vmatmul.mubr.bf16.gmra.mrb[12].mxu1 %v549_v16 }
  0x3b   :  { %488 = vmatprep.mubr.msk.bf16.mxu0 %vm554_vm0, %v553_v0  ;;  %512 = vmatprep.mubr.msk.bf16.mxu1 %vm554_vm0, %v553_v0 }
  0x42   :  { %489 = vmatmul.mubr.bf16.gmra.mrb[16].mxu0 %v550_v17  ;;  %513 = vmatmul.mubr.bf16.gmra.mrb[16].mxu1 %v551_v18 }
  0x43   :  { %492 = vmatprep.mubr.msk.bf16.mxu0 %vm554_vm0, %v553_v0 }
  0x4a   :  { %493 = vmatmul.mubr.bf16.gmra.mrb[20].mxu0 %v552_v19 }
  0xf5   :  { %v241_v20 = vpop.f32.mrb[0].mxu0  ;;  %v289_v21 = vpop.f32.mrb[0].mxu1 }
  0xf6   :  { %393 = vst [vmem:[%s730_s2] sm:$0xff] %v241_v20  ;;  %v474_v22 = vpop.f32.mrb[1].mxu0  ;;  %405 = vst [vmem:[%s730_s2 + $0x60] sm:$0xff] %v289_v21  ;;  %v498_v23 = vpop.f32.mrb[1].mxu1 }
  0xf7   :  { %v244_v24 = vpop.f32.mrb[2].mxu0  ;;  %v292_v25 = vpop.f32.mrb[2].mxu1 }
  0xf8   :  { %394 = vst [vmem:[%s730_s2 + $0x8] sm:$0xff] %v244_v24  ;;  %v475_v26 = vpop.f32.mrb[3].mxu0  ;;  %406 = vst [vmem:[%s730_s2 + $0x68] sm:$0xff] %v292_v25  ;;  %v499_v27 = vpop.f32.mrb[3].mxu1 }
  0xfd   :  { %v249_v28 = vpop.f32.mrb[4].mxu0  ;;  %v297_v29 = vpop.f32.mrb[4].mxu1 }
  0xfe   :  { %395 = vst [vmem:[%s730_s2 + $0x10] sm:$0xff] %v249_v28  ;;  %v478_v30 = vpop.f32.mrb[5].mxu0  ;;  %407 = vst [vmem:[%s730_s2 + $0x70] sm:$0xff] %v297_v29  ;;  %v502_v31 = vpop.f32.mrb[5].mxu1 }
  0xff   :  { %v252_v32 = vpop.f32.mrb[6].mxu0  ;;  %v300_v33 = vpop.f32.mrb[6].mxu1 }
 0x100   :  { %396 = vst [vmem:[%s730_s2 + $0x18] sm:$0xff] %v252_v32  ;;  %v479_v34 = vpop.f32.mrb[7].mxu0  ;;  %408 = vst [vmem:[%s730_s2 + $0x78] sm:$0xff] %v300_v33  ;;  %v503_v35 = vpop.f32.mrb[7].mxu1 }
 0x105   :  { %v257_v36 = vpop.f32.mrb[8].mxu0  ;;  %v305_v37 = vpop.f32.mrb[8].mxu1 }
 0x106   :  { %397 = vst [vmem:[%s730_s2 + $0x20] sm:$0xff] %v257_v36  ;;  %v482_v38 = vpop.f32.mrb[9].mxu0  ;;  %409 = vst [vmem:[%s730_s2 + $0x80] sm:$0xff] %v305_v37  ;;  %v506_v39 = vpop.f32.mrb[9].mxu1 }
 0x107   :  { %v260_v40 = vpop.f32.mrb[10].mxu0  ;;  %v308_v41 = vpop.f32.mrb[10].mxu1 }
 0x108   :  { %398 = vst [vmem:[%s730_s2 + $0x28] sm:$0xff] %v260_v40  ;;  %v483_v42 = vpop.f32.mrb[11].mxu0  ;;  %410 = vst [vmem:[%s730_s2 + $0x88] sm:$0xff] %v308_v41  ;;  %v507_v43 = vpop.f32.mrb[11].mxu1 }
 0x10d   :  { %v265_v44 = vpop.f32.mrb[12].mxu0  ;;  %v313_v45 = vpop.f32.mrb[12].mxu1 }
 0x10e   :  { %399 = vst [vmem:[%s730_s2 + $0x30] sm:$0xff] %v265_v44  ;;  %v486_v46 = vpop.f32.mrb[13].mxu0  ;;  %411 = vst [vmem:[%s730_s2 + $0x90] sm:$0xff] %v313_v45  ;;  %v510_v47 = vpop.f32.mrb[13].mxu1 }
 0x10f   :  { %v268_v48 = vpop.f32.mrb[14].mxu0  ;;  %v316_v49 = vpop.f32.mrb[14].mxu1 }
 0x110   :  { %400 = vst [vmem:[%s730_s2 + $0x38] sm:$0xff] %v268_v48  ;;  %v487_v50 = vpop.f32.mrb[15].mxu0  ;;  %412 = vst [vmem:[%s730_s2 + $0x98] sm:$0xff] %v316_v49  ;;  %v511_v51 = vpop.f32.mrb[15].mxu1 }
 0x115   :  { %v273_v52 = vpop.f32.mrb[16].mxu0  ;;  %v321_v53 = vpop.f32.mrb[16].mxu1 }
 0x116   :  { %401 = vst [vmem:[%s730_s2 + $0x40] sm:$0xff] %v273_v52  ;;  %v490_v54 = vpop.f32.mrb[17].mxu0  ;;  %413 = vst [vmem:[%s730_s2 + $0xa0] sm:$0xff] %v321_v53  ;;  %v514_v55 = vpop.f32.mrb[17].mxu1 }
 0x117   :  { %v276_v56 = vpop.f32.mrb[18].mxu0  ;;  %v324_v57 = vpop.f32.mrb[18].mxu1 }
 0x118   :  { %402 = vst [vmem:[%s730_s2 + $0x48] sm:$0xff] %v276_v56  ;;  %v491_v58 = vpop.f32.mrb[19].mxu0  ;;  %v515_v59 = vpop.f32.mrb[19].mxu1 }
 0x11d   :  { %v281_v60 = vpop.f32.mrb[20].mxu0 }
 0x11e   :  { %403 = vst [vmem:[%s730_s2 + $0x50] sm:$0xff] %v281_v60  ;;  %v494_v61 = vpop.f32.mrb[21].mxu0 }
 0x11f   :  { %v284_v62 = vpop.f32.mrb[22].mxu0 }
 0x120   :  { %404 = vst [vmem:[%s730_s2 + $0x58] sm:$0xff] %v284_v62  ;;  %v495_v63 = vpop.f32.mrb[23].mxu0 }

// kernel: netG_forward.18
= control target key start
LH: loop header
LB: loop body
LE: loop exit
PB: predicated region body
PF: predicated region fallthrough
CT: control target
= control target key end

     0   :  { %vm14_vm0 = vcmask 122880   ;;  %vm82_vm1 = vcmask 130048   ;;  %v428_v0 = vmov 0.0   ;;  %s1318_s0 = inlined_call_operand.vmem [shape: f32[512,16], index: 0, kind: input, shape index: {}]   ;;  %s1319_s1 = inlined_call_operand.vmem [shape: f32[1,16], index: 1, kind: output, shape index: {0}]   ;;  %s1320_s2 = inlined_call_operand.vmem [shape: f32[1,16], index: 2, kind: output, shape index: {1}]  }
   0x1   :  { %15 = vst.msk [vmem:[%s1319_s1] sm:$0x1] %vm14_vm0, %v428_v0  ;;  %16 = vst.msk [vmem:[%s1320_s2] sm:$0x1] %vm14_vm0, %v428_v0  ;;  %v455_v1 = vld [vmem:[%s1318_s0] sm:$0xff]  ;;  %v460_v2 = vld [vmem:[%s1318_s0 + $0x8] sm:$0xff] }
   0x2   :  { %v465_v3 = vld [vmem:[%s1318_s0 + $0x10] sm:$0xff]  ;;  %v83_v4 = vsel %vm82_vm1, %v455_v1, 0.0  ;;  %v84_v5 = vsel %vm82_vm1, %v460_v2, 0.0  ;;  %v476_v7 = vld [vmem:[%s1318_s0 + $0x18] sm:$0xff]  ;;  %v483_v10 = vld [vmem:[%s1318_s0 + $0x20] sm:$0xff] }
   0x3   :  { %v86_v6 = vsel %vm82_vm1, %v465_v3, 0.0  ;;  %v85_v8 = vadd.f32 %v84_v5, %v83_v4  ;;  %v88_v9 = vsel %vm82_vm1, %v476_v7, 0.0  ;;  %v90_v12 = vsel %vm82_vm1, %v483_v10, 0.0  ;;  %v490_v13 = vld [vmem:[%s1318_s0 + $0x28] sm:$0xff]  ;;  %v497_v16 = vld [vmem:[%s1318_s0 + $0x30] sm:$0xff]  ;;  %v502_v18 = vld [vmem:[%s1318_s0 + $0x38] sm:$0xff] }
   0x4   :  { %v92_v15 = vsel %vm82_vm1, %v490_v13, 0.0  ;;  %v507_v19 = vld [vmem:[%s1318_s0 + $0x40] sm:$0xff]  ;;  %v94_v20 = vsel %vm82_vm1, %v497_v16, 0.0  ;;  %v514_v21 = vld [vmem:[%s1318_s0 + $0x48] sm:$0xff]  ;;  %v519_v22 = vld [vmem:[%s1318_s0 + $0x50] sm:$0xff]  ;;  %v96_v25 = vsel %vm82_vm1, %v502_v18, 0.0 }
   0x5   :  { %v87_v11 = vadd.f32 %v86_v6, %v85_v8  ;;  %v524_v23 = vld [vmem:[%s1318_s0 + $0x58] sm:$0xff]  ;;  %v98_v26 = vsel %vm82_vm1, %v507_v19, 0.0  ;;  %v533_v27 = vld [vmem:[%s1318_s0 + $0x108] sm:$0xff]  ;;  %v538_v28 = vld [vmem:[%s1318_s0 + $0x110] sm:$0xff]  ;;  %v100_v30 = vsel %vm82_vm1, %v514_v21, 0.0  ;;  %v102_v31 = vsel %vm82_vm1, %v519_v22, 0.0 }
   0x6   :  { %v543_v29 = vld [vmem:[%s1318_s0 + $0x118] sm:$0xff]  ;;  %v551_v32 = vsel %vm82_vm1, %v524_v23, 0.0  ;;  %v556_v33 = vld [vmem:[%s1318_s0 + $0x120] sm:$0xff]  ;;  %v561_v34 = vld [vmem:[%s1318_s0 + $0x128] sm:$0xff]  ;;  %v570_v37 = vsel %vm82_vm1, %v533_v27, 0.0  ;;  %v574_v38 = vsel %vm82_vm1, %v538_v28, 0.0 }
   0x7   :  { %v89_v14 = vadd.f32 %v88_v9, %v87_v11  ;;  %v566_v35 = vld [vmem:[%s1318_s0 + $0x130] sm:$0xff]  ;;  %1339 = vst [vmem:[#allocation2_spill] sm:$0xff] %v570_v37  ;;  %1340 = vst [vmem:[#allocation3_spill] sm:$0xff] %v574_v38  ;;  %v578_v39 = vsel %vm82_vm1, %v543_v29, 0.0  ;;  %v583_v40 = vld [vmem:[%s1318_s0 + $0x138] sm:$0xff]  ;;  %v597_v43 = vsel %vm82_vm1, %v556_v33, 0.0  ;;  %v222_v37 = vmul.f32 %v465_v3, %v465_v3 }
   0x8   :  { %1341 = vst [vmem:[#allocation4_spill] sm:$0xff] %v578_v39  ;;  %v588_v41 = vld [vmem:[%s1318_s0 + $0x140] sm:$0xff]  ;;  %v593_v42 = vld [vmem:[%s1318_s0 + $0x148] sm:$0xff]  ;;  %1342 = vst [vmem:[#allocation5_spill] sm:$0xff] %v597_v43  ;;  %v601_v44 = vsel %vm82_vm1, %v561_v34, 0.0  ;;  %v605_v45 = vsel %vm82_vm1, %v566_v35, 0.0 }
   0x9   :  { %v91_v17 = vadd.f32 %v90_v12, %v89_v14  ;;  %1343 = vst [vmem:[#allocation6_spill] sm:$0xff] %v601_v44  ;;  %1344 = vst [vmem:[#allocation7_spill] sm:$0xff] %v605_v45  ;;  %v610_v46 = vld [vmem:[%s1318_s0 + $0x150] sm:$0xff]  ;;  %v615_v47 = vld [vmem:[%s1318_s0 + $0x158] sm:$0xff]  ;;  %v624_v50 = vsel %vm82_vm1, %v583_v40, 0.0  ;;  %v628_v51 = vsel %vm82_vm1, %v588_v41, 0.0 }
   0xa   :  { %v620_v48 = vld [vmem:[%s1318_s0 + $0x160] sm:$0xff]  ;;  %1345 = vst [vmem:[#allocation8_spill] sm:$0xff] %v624_v50  ;;  %1346 = vst [vmem:[#allocation9_spill] sm:$0xff] %v628_v51  ;;  %v632_v52 = vsel %vm82_vm1, %v593_v42, 0.0  ;;  %v637_v53 = vld [vmem:[%s1318_s0 + $0x168] sm:$0xff]  ;;  %v651_v56 = vsel %vm82_vm1, %v610_v46, 0.0 }
   0xb   :  { %v93_v24 = vadd.f32 %v92_v15, %v91_v17  ;;  %1347 = vst [vmem:[#allocation10_spill] sm:$0xff] %v632_v52  ;;  %v642_v54 = vld [vmem:[%s1318_s0 + $0x170] sm:$0xff]  ;;  %v647_v55 = vld [vmem:[%s1318_s0 + $0x178] sm:$0xff]  ;;  %1348 = vst [vmem:[#allocation11_spill] sm:$0xff] %v651_v56  ;;  %v655_v57 = vsel %vm82_vm1, %v615_v47, 0.0  ;;  %v659_v58 = vsel %vm82_vm1, %v620_v48, 0.0 }
   0xc   :  { %1349 = vst [vmem:[#allocation12_spill] sm:$0xff] %v655_v57  ;;  %1350 = vst [vmem:[#allocation13_spill] sm:$0xff] %v659_v58  ;;  %v664_v59 = vld [vmem:[%s1318_s0 + $0x180] sm:$0xff]  ;;  %v669_v60 = vld [vmem:[%s1318_s0 + $0x188] sm:$0xff]  ;;  %v678_v63 = vsel %vm82_vm1, %v637_v53, 0.0  ;;  %v682_v0 = vsel %vm82_vm1, %v642_v54, 0.0 }
   0xd   :  { %v95_v36 = vadd.f32 %v94_v20, %v93_v24  ;;  %v674_v61 = vld [vmem:[%s1318_s0 + $0x190] sm:$0xff]  ;;  %1351 = vst [vmem:[#allocation14_spill] sm:$0xff] %v678_v63  ;;  %1352 = vst [vmem:[#allocation15_spill] sm:$0xff] %v682_v0  ;;  %v686_v4 = vsel %vm82_vm1, %v647_v55, 0.0  ;;  %v691_v5 = vld [vmem:[%s1318_s0 + $0x198] sm:$0xff]  ;;  %v705_v9 = vsel %vm82_vm1, %v664_v59, 0.0 }
   0xe   :  { %1353 = vst [vmem:[#allocation16_spill] sm:$0xff] %v686_v4  ;;  %v696_v6 = vld [vmem:[%s1318_s0 + $0x1a0] sm:$0xff]  ;;  %v701_v8 = vld [vmem:[%s1318_s0 + $0x1a8] sm:$0xff]  ;;  %1354 = vst [vmem:[#allocation17_spill] sm:$0xff] %v705_v9  ;;  %v709_v11 = vsel %vm82_vm1, %v669_v60, 0.0  ;;  %v713_v12 = vsel %vm82_vm1, %v674_v61, 0.0 }
   0xf   :  { %v97_v49 = vadd.f32 %v96_v25, %v95_v36  ;;  %1355 = vst [vmem:[#allocation18_spill] sm:$0xff] %v709_v11  ;;  %1356 = vst [vmem:[#allocation19_spill] sm:$0xff] %v713_v12  ;;  %v718_v14 = vld [vmem:[%s1318_s0 + $0x60] sm:$0xff]  ;;  %v723_v15 = vld [vmem:[%s1318_s0 + $0x1b0] sm:$0xff]  ;;  %v737_v25 = vsel %vm82_vm1, %v691_v5, 0.0  ;;  %v745_v36 = vsel %vm82_vm1, %v701_v8, 0.0 }
  0x10   :  { %v728_v17 = vld [vmem:[%s1318_s0 + $0x1b8] sm:$0xff]  ;;  %v733_v20 = vld [vmem:[%s1318_s0 + $0x1c0] sm:$0xff]  ;;  %1357 = vst [vmem:[#allocation20_spill] sm:$0xff] %v737_v25  ;;  %1359 = vst [vmem:[#allocation22_spill] sm:$0xff] %v745_v36 }
  0x11   :  { %v99_v62 = vadd.f32 %v98_v26, %v97_v49  ;;  %v741_v26 = vsel %vm82_vm1, %v696_v6, 0.0  ;;  %v750_v49 = vld [vmem:[%s1318_s0 + $0x1c8] sm:$0xff]  ;;  %v768_v36 = vsel %vm82_vm1, %v728_v17, 0.0  ;;  %v772_v25 = vsel %vm82_vm1, %v733_v20, 0.0  ;;  %v777_v12 = vld [vmem:[%s1318_s0 + $0x1e0] sm:$0xff]  ;;  %v804_v0 = vld [vmem:[%s1318_s0 + $0x1f8] sm:$0xff] }
  0x12   :  { %1358 = vst [vmem:[#allocation21_spill] sm:$0xff] %v741_v26  ;;  %v764_v26 = vsel %vm82_vm1, %v723_v15, 0.0  ;;  %1361 = vst [vmem:[#allocation24_spill] sm:$0xff] %v768_v36  ;;  %v782_v11 = vld [vmem:[%s1318_s0 + $0x1e8] sm:$0xff]  ;;  %v791_v9 = vsel %vm82_vm1, %v750_v49, 0.0  ;;  %v826_v58 = vsel %vm82_vm1, %v804_v0, 0.0 }
  0x13   :  { %v101_v24 = vadd.f32 %v100_v30, %v99_v62  ;;  %v755_v30 = vld [vmem:[%s1318_s0 + $0x1d0] sm:$0xff]  ;;  %v760_v62 = vld [vmem:[%s1318_s0 + $0x1d8] sm:$0xff]  ;;  %1360 = vst [vmem:[#allocation23_spill] sm:$0xff] %v764_v26  ;;  %1362 = vst [vmem:[#allocation25_spill] sm:$0xff] %v772_v25 }
  0x14   :  { %v787_v26 = vld [vmem:[%s1318_s0 + $0x1f0] sm:$0xff]  ;;  %1364 = vst [vmem:[#allocation27_spill] sm:$0xff] %v791_v9  ;;  %v795_v25 = vsel %vm82_vm1, %v755_v30, 0.0  ;;  %v799_v4 = vsel %vm82_vm1, %v760_v62, 0.0  ;;  %1367 = vst [vmem:[#allocation30_spill] sm:$0xff] %v804_v0  ;;  %v814_v9 = vsel %vm82_vm1, %v782_v11, 0.0 }
  0x15   :  { %1363 = vst [vmem:[#allocation26_spill] sm:$0xff] %v787_v26  ;;  %v103_v36 = vadd.f32 %v102_v31, %v101_v24  ;;  %1365 = vst [vmem:[#allocation28_spill] sm:$0xff] %v795_v25  ;;  %v106_v31 = vsel %vm82_vm1, %v718_v14, 0.0  ;;  %v810_v24 = vsel %vm82_vm1, %v777_v12, 0.0  ;;  %v818_v25 = vsel %vm82_vm1, %v787_v26, 0.0  ;;  %v855_v56 = vld [vmem:[%s1318_s0 + $0x90] sm:$0xff] }
  0x16   :  { %1366 = vst [vmem:[#allocation29_spill] sm:$0xff] %v799_v4  ;;  %1368 = vst [vmem:[#allocation31_spill] sm:$0xff] %v810_v24  ;;  %v30_v4 = vld [vmem:[%s1318_s0 + $0x68] sm:$0xff]  ;;  %v860_v52 = vld [vmem:[%s1318_s0 + $0x98] sm:$0xff] }
  0x17   :  { %1369 = vst [vmem:[#allocation32_spill] sm:$0xff] %v814_v9  ;;  %1370 = vst [vmem:[#allocation33_spill] sm:$0xff] %v818_v25  ;;  %v105_v63 = vadd.f32 %v551_v32, %v103_v36  ;;  %v108_v24 = vsel %vm82_vm1, %v30_v4, 0.0  ;;  %v31_v9 = vld [vmem:[%s1318_s0 + $0x70] sm:$0xff]  ;;  %v835_v25 = vld [vmem:[%s1318_s0 + $0x78] sm:$0xff]  ;;  %v120_v39 = vsel %vm82_vm1, %v860_v52, 0.0 }
  0x18   :  { %1371 = vst [vmem:[#allocation34_spill] sm:$0xff] %v826_v58  ;;  %1372 = vst [vmem:[#allocation35_spill] sm:$0xff] %v835_v25  ;;  %v840_v32 = vld [vmem:[%s1318_s0 + $0x80] sm:$0xff]  ;;  %v845_v36 = vld [vmem:[%s1318_s0 + $0x88] sm:$0xff]  ;;  %v110_v58 = vsel %vm82_vm1, %v31_v9, 0.0 }
  0x19   :  { %v107_v57 = vadd.f32 %v106_v31, %v105_v63  ;;  %1373 = vst [vmem:[#allocation36_spill] sm:$0xff] %v840_v32  ;;  %1374 = vst [vmem:[#allocation37_spill] sm:$0xff] %v845_v36  ;;  %v220_v63 = vmul.f32 %v455_v1, %v455_v1  ;;  %v221_v31 = vmul.f32 %v460_v2, %v460_v2  ;;  %v865_v51 = vld [vmem:[%s1318_s0 + $0xa0] sm:$0xff]  ;;  %v112_v1 = vsel %vm82_vm1, %v835_v25, 0.0  ;;  %v876_v44 = vld [vmem:[%s1318_s0 + $0xa8] sm:$0xff] }
  0x1a   :  { %1375 = vst [vmem:[#allocation38_spill] sm:$0xff] %v855_v56  ;;  %1376 = vst [vmem:[#allocation39_spill] sm:$0xff] %v860_v52  ;;  %v114_v2 = vsel %vm82_vm1, %v840_v32, 0.0  ;;  %v116_v45 = vsel %vm82_vm1, %v845_v36, 0.0  ;;  %v881_v43 = vld [vmem:[%s1318_s0 + $0xb0] sm:$0xff]  ;;  %v122_v38 = vsel %vm82_vm1, %v865_v51, 0.0  ;;  %v223_v25 = vmul.f32 %v476_v7, %v476_v7 }
  0x1b   :  { %1377 = vst [vmem:[#allocation40_spill] sm:$0xff] %v865_v51  ;;  %v109_v50 = vadd.f32 %v108_v24, %v107_v57  ;;  %1378 = vst [vmem:[#allocation41_spill] sm:$0xff] %v876_v44  ;;  %v886_v57 = vld [vmem:[%s1318_s0 + $0xb8] sm:$0xff]  ;;  %v118_v24 = vsel %vm82_vm1, %v855_v56, 0.0  ;;  %v899_v36 = vld [vmem:[%s1318_s0 + $0xc0] sm:$0xff]  ;;  %v124_v51 = vsel %vm82_vm1, %v876_v44, 0.0 }
  0x1c   :  { %1379 = vst [vmem:[#allocation42_spill] sm:$0xff] %v881_v43  ;;  %1380 = vst [vmem:[#allocation43_spill] sm:$0xff] %v886_v57  ;;  %v904_v32 = vld [vmem:[%s1318_s0 + $0xc8] sm:$0xff]  ;;  %v909_v52 = vld [vmem:[%s1318_s0 + $0xd0] sm:$0xff]  ;;  %v915_v3 = vsel %vm82_vm1, %v881_v43, 0.0 }
  0x1d   :  { %1381 = vst [vmem:[#allocation44_spill] sm:$0xff] %v899_v36  ;;  %1382 = vst [vmem:[#allocation45_spill] sm:$0xff] %v904_v32  ;;  %v111_v56 = vadd.f32 %v110_v58, %v109_v50  ;;  %v922_v0 = vld [vmem:[%s1318_s0 + $0xd8] sm:$0xff]  ;;  %v927_v26 = vld [vmem:[%s1318_s0 + $0xe0] sm:$0xff]  ;;  %v931_v50 = vsel %vm82_vm1, %v886_v57, 0.0  ;;  %v935_v58 = vsel %vm82_vm1, %v899_v36, 0.0 }
  0x1e   :  { %1383 = vst [vmem:[#allocation46_spill] sm:$0xff] %v909_v52  ;;  %1384 = vst [vmem:[#allocation47_spill] sm:$0xff] %v922_v0  ;;  %v939_v7 = vsel %vm82_vm1, %v904_v32, 0.0  ;;  %v943_v43 = vsel %vm82_vm1, %v909_v52, 0.0  ;;  %v948_v44 = vld [vmem:[%s1318_s0 + $0xe8] sm:$0xff]  ;;  %v953_v57 = vld [vmem:[%s1318_s0 + $0xf0] sm:$0xff]  ;;  %v224_v52 = vmul.f32 %v483_v10, %v483_v10  ;;  %v228_v10 = vmul.f32 %v507_v19, %v507_v19 }
  0x1f   :  { %1385 = vst [vmem:[#allocation48_spill] sm:$0xff] %v927_v26  ;;  %1386 = vst [vmem:[#allocation49_spill] sm:$0xff] %v935_v58  ;;  %v113_v36 = vadd.f32 %v112_v1, %v111_v56  ;;  %v957_v58 = vsel %vm82_vm1, %v922_v0, 0.0  ;;  %v961_v32 = vsel %vm82_vm1, %v927_v26, 0.0  ;;  %v225_v56 = vmul.f32 %v490_v13, %v490_v13 }
  0x20   :  { %1387 = vst [vmem:[#allocation50_spill] sm:$0xff] %v939_v7  ;;  %1388 = vst [vmem:[#allocation51_spill] sm:$0xff] %v943_v43  ;;  %v967_v43 = vsel %vm82_vm1, %v948_v44, 0.0  ;;  %v971_v7 = vsel %vm82_vm1, %v953_v57, 0.0  ;;  %v226_v1 = vmul.f32 %v497_v16, %v497_v16  ;;  %v227_v26 = vmul.f32 %v502_v18, %v502_v18 }
  0x21   :  { %1389 = vst [vmem:[#allocation52_spill] sm:$0xff] %v948_v44  ;;  %1390 = vst [vmem:[#allocation53_spill] sm:$0xff] %v953_v57  ;;  %v115_v0 = vadd.f32 %v114_v2, %v113_v36  ;;  %v229_v44 = vmul.f32 %v514_v21, %v514_v21  ;;  %v230_v57 = vmul.f32 %v519_v22, %v519_v22 }
  0x22   :  { %1391 = vst [vmem:[#allocation54_spill] sm:$0xff] %v971_v7  ;;  %v231_v7 = vmul.f32 %v524_v23, %v524_v23  ;;  %v232_v13 = vmul.f32 %v718_v14, %v718_v14  ;;  %v989_v16 = vmul.f32 %v30_v4, %v30_v4  ;;  %v991_v2 = vmul.f32 %v31_v9, %v31_v9 }
  0x23   :  { %v117_v36 = vadd.f32 %v116_v45, %v115_v0  ;;  %v253_v18 = vmul.f32 %v533_v27, %v533_v27  ;;  %v254_v19 = vmul.f32 %v538_v28, %v538_v28  ;;  %v255_v21 = vmul.f32 %v543_v29, %v543_v29 }
  0x24   :  { %v256_v22 = vmul.f32 %v556_v33, %v556_v33  ;;  %v257_v23 = vmul.f32 %v561_v34, %v561_v34  ;;  %v258_v45 = vmul.f32 %v566_v35, %v566_v35  ;;  %v259_v4 = vmul.f32 %v583_v40, %v583_v40 }
  0x25   :  { %v119_v0 = vadd.f32 %v118_v24, %v117_v36  ;;  %v260_v27 = vmul.f32 %v588_v41, %v588_v41  ;;  %v261_v28 = vmul.f32 %v593_v42, %v593_v42  ;;  %v262_v29 = vmul.f32 %v610_v46, %v610_v46 }
  0x26   :  { %v263_v33 = vmul.f32 %v615_v47, %v615_v47  ;;  %v284_v34 = vsel %vm82_vm1, %v220_v63, 0.0  ;;  %v285_v35 = vsel %vm82_vm1, %v221_v31, 0.0  ;;  %v264_v40 = vmul.f32 %v620_v48, %v620_v48 }
  0x27   :  { %v121_v9 = vadd.f32 %v120_v39, %v119_v0  ;;  %v286_v14 = vadd.f32 %v285_v35, %v284_v34  ;;  %v287_v41 = vsel %vm82_vm1, %v222_v37, 0.0  ;;  %v265_v42 = vmul.f32 %v637_v53, %v637_v53  ;;  %v1392_v0 = vld [vmem:[#allocation26_spill] sm:$0xff] }
  0x28   :  { %v266_v46 = vmul.f32 %v642_v54, %v642_v54  ;;  %v267_v47 = vmul.f32 %v647_v55, %v647_v55  ;;  %v289_v63 = vsel %vm82_vm1, %v223_v25, 0.0  ;;  %v268_v39 = vmul.f32 %v664_v59, %v664_v59  ;;  %v1393_v34 = vld [vmem:[#allocation30_spill] sm:$0xff] }
  0x29   :  { %v123_v24 = vadd.f32 %v122_v38, %v121_v9  ;;  %v269_v48 = vmul.f32 %v669_v60, %v669_v60  ;;  %v288_v31 = vadd.f32 %v287_v41, %v286_v14  ;;  %v270_v37 = vmul.f32 %v674_v61, %v674_v61  ;;  %v1394_v41 = vld [vmem:[#allocation49_spill] sm:$0xff] }
  0x2a   :  { %v271_v53 = vmul.f32 %v691_v5, %v691_v5  ;;  %v272_v54 = vmul.f32 %v696_v6, %v696_v6  ;;  %v291_v55 = vsel %vm82_vm1, %v224_v52, 0.0  ;;  %v273_v38 = vmul.f32 %v701_v8, %v701_v8 }
  0x2b   :  { %v125_v25 = vadd.f32 %v124_v51, %v123_v24  ;;  %v274_v59 = vmul.f32 %v723_v15, %v723_v15  ;;  %v290_v60 = vadd.f32 %v289_v63, %v288_v31  ;;  %v275_v36 = vmul.f32 %v728_v17, %v728_v17 }
  0x2c   :  { %v276_v61 = vmul.f32 %v733_v20, %v733_v20  ;;  %v277_v5 = vmul.f32 %v750_v49, %v750_v49  ;;  %v293_v6 = vsel %vm82_vm1, %v225_v56, 0.0  ;;  %v278_v52 = vmul.f32 %v755_v30, %v755_v30 }
  0x2d   :  { %v127_v51 = vadd.f32 %v915_v3, %v125_v25  ;;  %v279_v8 = vmul.f32 %v760_v62, %v760_v62  ;;  %v292_v15 = vadd.f32 %v291_v55, %v290_v60  ;;  %v280_v17 = vmul.f32 %v777_v12, %v777_v12  ;;  %v1396_v25 = vld [vmem:[#allocation51_spill] sm:$0xff] }
  0x2e   :  { %v281_v20 = vmul.f32 %v782_v11, %v782_v11  ;;  %v282_v49 = vmul.f32 %v1392_v0, %v1392_v0  ;;  %v295_v56 = vsel %vm82_vm1, %v226_v1, 0.0  ;;  %v283_v30 = vmul.f32 %v1393_v34, %v1393_v34  ;;  %v1398_v34 = vld [vmem:[#allocation54_spill] sm:$0xff] }
  0x2f   :  { %v129_v3 = vadd.f32 %v931_v50, %v127_v51  ;;  %v294_v35 = vadd.f32 %v293_v6, %v292_v15  ;;  %v297_v62 = vsel %vm82_vm1, %v227_v26, 0.0  ;;  %v299_v9 = vsel %vm82_vm1, %v228_v10, 0.0 }
  0x30   :  { %v301_v12 = vsel %vm82_vm1, %v229_v44, 0.0  ;;  %v303_v14 = vsel %vm82_vm1, %v230_v57, 0.0  ;;  %v305_v11 = vsel %vm82_vm1, %v231_v7, 0.0  ;;  %v307_v1 = vsel %vm82_vm1, %v232_v13, 0.0  ;;  %v1395_v7 = vld [vmem:[#allocation50_spill] sm:$0xff] }
  0x31   :  { %v131_v63 = vadd.f32 %v1394_v41, %v129_v3  ;;  %v296_v24 = vadd.f32 %v295_v56, %v294_v35  ;;  %v1072_v50 = vsel %vm82_vm1, %v253_v18, 0.0  ;;  %v1075_v31 = vsel %vm82_vm1, %v254_v19, 0.0  ;;  %v1397_v56 = vld [vmem:[#allocation35_spill] sm:$0xff] }
  0x32   :  { %v1078_v26 = vsel %vm82_vm1, %v255_v21, 0.0  ;;  %v1081_v44 = vsel %vm82_vm1, %v256_v22, 0.0  ;;  %v1084_v57 = vsel %vm82_vm1, %v257_v23, 0.0  ;;  %v1088_v13 = vsel %vm82_vm1, %v258_v45, 0.0 }
  0x33   :  { %v133_v10 = vadd.f32 %v1395_v7, %v131_v63  ;;  %v298_v55 = vadd.f32 %v297_v62, %v296_v24  ;;  %v1091_v18 = vsel %vm82_vm1, %v259_v4, 0.0  ;;  %v1094_v19 = vsel %vm82_vm1, %v260_v27, 0.0  ;;  %v1399_v62 = vld [vmem:[#allocation36_spill] sm:$0xff] }
  0x34   :  { %v1097_v21 = vsel %vm82_vm1, %v261_v28, 0.0  ;;  %v1100_v22 = vsel %vm82_vm1, %v262_v29, 0.0  ;;  %v1103_v23 = vsel %vm82_vm1, %v263_v33, 0.0  ;;  %v1107_v45 = vsel %vm82_vm1, %v264_v40, 0.0 }
  0x35   :  { %v135_v60 = vadd.f32 %v1396_v25, %v133_v10  ;;  %v300_v6 = vadd.f32 %v299_v9, %v298_v55  ;;  %v1110_v4 = vsel %vm82_vm1, %v265_v42, 0.0  ;;  %v1113_v27 = vsel %vm82_vm1, %v266_v46, 0.0  ;;  %v1401_v10 = vld [vmem:[#allocation38_spill] sm:$0xff] }
  0x36   :  { %v1116_v28 = vsel %vm82_vm1, %v267_v47, 0.0  ;;  %v1119_v29 = vsel %vm82_vm1, %v268_v39, 0.0  ;;  %v1122_v33 = vsel %vm82_vm1, %v269_v48, 0.0  ;;  %v1126_v40 = vsel %vm82_vm1, %v270_v37, 0.0  ;;  %v1402_v25 = vld [vmem:[#allocation2_spill] sm:$0xff] }
  0x37   :  { %v137_v51 = vadd.f32 %v957_v58, %v135_v60  ;;  %v302_v15 = vadd.f32 %v301_v12, %v300_v6  ;;  %v1129_v42 = vsel %vm82_vm1, %v271_v53, 0.0  ;;  %v1132_v46 = vsel %vm82_vm1, %v272_v54, 0.0 }
  0x38   :  { %v1135_v47 = vsel %vm82_vm1, %v273_v38, 0.0  ;;  %v1138_v39 = vsel %vm82_vm1, %v274_v59, 0.0  ;;  %v1141_v48 = vsel %vm82_vm1, %v275_v36, 0.0  ;;  %v1145_v37 = vsel %vm82_vm1, %v276_v61, 0.0 }
  0x39   :  { %v139_v58 = vadd.f32 %v961_v32, %v137_v51  ;;  %v304_v0 = vadd.f32 %v303_v14, %v302_v15  ;;  %v1148_v53 = vsel %vm82_vm1, %v277_v5, 0.0  ;;  %v1151_v54 = vsel %vm82_vm1, %v278_v52, 0.0  ;;  %v1165_v32 = vld [vmem:[%s1318_s0 + $0xf8] sm:$0xff]  ;;  %v1403_v51 = vld [vmem:[#allocation39_spill] sm:$0xff] }
  0x3a   :  { %v1154_v38 = vsel %vm82_vm1, %v279_v8, 0.0  ;;  %v1157_v59 = vsel %vm82_vm1, %v280_v17, 0.0  ;;  %v1160_v36 = vsel %vm82_vm1, %v281_v20, 0.0  ;;  %v1169_v52 = vsel %vm82_vm1, %v282_v49, 0.0 }
  0x3b   :  { %v141_v61 = vadd.f32 %v967_v43, %v139_v58  ;;  %v306_v5 = vadd.f32 %v305_v11, %v304_v0  ;;  %v1172_v8 = vsel %vm82_vm1, %v283_v30, 0.0  ;;  %v144_v17 = vsel %vm82_vm1, %v1165_v32, 0.0  ;;  %v1183_v43 = vld [vmem:[%s1318_s0 + $0x100] sm:$0xff]  ;;  %v1404_v58 = vld [vmem:[#allocation3_spill] sm:$0xff] }
  0x3c   :  { %v235_v20 = vmul.f32 %v1397_v56, %v1397_v56  ;;  %v309_v3 = vsel %vm82_vm1, %v989_v16, 0.0  ;;  %v146_v30 = vsel %vm82_vm1, %v1183_v43, 0.0  ;;  %v236_v9 = vmul.f32 %v1399_v62, %v1399_v62  ;;  %v1400_v16 = vld [vmem:[#allocation37_spill] sm:$0xff] }
  0x3d   :  { %v143_v49 = vadd.f32 %v1398_v34, %v141_v61  ;;  %v308_v35 = vadd.f32 %v307_v1, %v306_v5  ;;  %v311_v12 = vsel %vm82_vm1, %v991_v2, 0.0  ;;  %v237_v41 = vmul.f32 %v1400_v16, %v1400_v16  ;;  %v1405_v5 = vld [vmem:[#allocation40_spill] sm:$0xff]  ;;  %v1408_v62 = vld [vmem:[#allocation5_spill] sm:$0xff] }
  0x3e   :  { %v313_v63 = vsel %vm82_vm1, %v235_v20, 0.0  ;;  %v238_v1 = vmul.f32 %v1401_v10, %v1401_v10  ;;  %v315_v55 = vsel %vm82_vm1, %v236_v9, 0.0  ;;  %v239_v2 = vmul.f32 %v1403_v51, %v1403_v51  ;;  %v1406_v20 = vld [vmem:[#allocation4_spill] sm:$0xff] }
  0x3f   :  { %v145_v14 = vadd.f32 %v144_v17, %v143_v49  ;;  %v310_v11 = vadd.f32 %v309_v3, %v308_v35  ;;  %v317_v15 = vsel %vm82_vm1, %v237_v41, 0.0  ;;  %v240_v17 = vmul.f32 %v1405_v5, %v1405_v5  ;;  %v1407_v49 = vld [vmem:[#allocation41_spill] sm:$0xff]  ;;  %v1410_v41 = vld [vmem:[#allocation6_spill] sm:$0xff] }
  0x40   :  { %v319_v56 = vsel %vm82_vm1, %v238_v1, 0.0  ;;  %v241_v35 = vmul.f32 %v1407_v49, %v1407_v49 }
  0x41   :  { %v147_v24 = vadd.f32 %v146_v30, %v145_v14  ;;  %v312_v7 = vadd.f32 %v311_v12, %v310_v11  ;;  %v321_v30 = vsel %vm82_vm1, %v239_v2, 0.0  ;;  %v1409_v14 = vld [vmem:[#allocation42_spill] sm:$0xff]  ;;  %v323_v16 = vsel %vm82_vm1, %v240_v17, 0.0 }
  0x42   :  { %v242_v11 = vmul.f32 %v1409_v14, %v1409_v14  ;;  %v325_v1 = vsel %vm82_vm1, %v241_v35, 0.0 }
  0x43   :  { %v149_v60 = vadd.f32 %v1402_v25, %v147_v24  ;;  %v314_v6 = vadd.f32 %v313_v63, %v312_v7  ;;  %v1411_v7 = vld [vmem:[#allocation43_spill] sm:$0xff] }
  0x44   :  { %v243_v10 = vmul.f32 %v1411_v7, %v1411_v7  ;;  %v327_v2 = vsel %vm82_vm1, %v242_v11, 0.0 }
  0x45   :  { %v151_v0 = vadd.f32 %v1404_v58, %v149_v60  ;;  %v316_v61 = vadd.f32 %v315_v55, %v314_v6  ;;  %v1412_v55 = vld [vmem:[#allocation7_spill] sm:$0xff]  ;;  %v1413_v6 = vld [vmem:[#allocation44_spill] sm:$0xff] }
  0x46   :  { %v244_v51 = vmul.f32 %v1413_v6, %v1413_v6  ;;  %v329_v17 = vsel %vm82_vm1, %v243_v10, 0.0 }
  0x47   :  { %v153_v3 = vadd.f32 %v1406_v20, %v151_v0  ;;  %v318_v34 = vadd.f32 %v317_v15, %v316_v61  ;;  %v1414_v15 = vld [vmem:[#allocation8_spill] sm:$0xff]  ;;  %v1415_v61 = vld [vmem:[#allocation45_spill] sm:$0xff] }
  0x48   :  { %v245_v5 = vmul.f32 %v1415_v61, %v1415_v61  ;;  %v331_v35 = vsel %vm82_vm1, %v244_v51, 0.0 }
  0x49   :  { %v155_v9 = vadd.f32 %v1408_v62, %v153_v3  ;;  %v320_v12 = vadd.f32 %v319_v56, %v318_v34  ;;  %v1416_v56 = vld [vmem:[#allocation9_spill] sm:$0xff]  ;;  %v1417_v34 = vld [vmem:[#allocation46_spill] sm:$0xff] }
  0x4a   :  { %v246_v49 = vmul.f32 %v1417_v34, %v1417_v34  ;;  %v333_v11 = vsel %vm82_vm1, %v245_v5, 0.0 }
  0x4b   :  { %v157_v63 = vadd.f32 %v1410_v41, %v155_v9  ;;  %v322_v24 = vadd.f32 %v321_v30, %v320_v12  ;;  %v1418_v30 = vld [vmem:[#allocation10_spill] sm:$0xff]  ;;  %v1419_v12 = vld [vmem:[#allocation47_spill] sm:$0xff] }
  0x4c   :  { %v247_v14 = vmul.f32 %v1419_v12, %v1419_v12  ;;  %v335_v10 = vsel %vm82_vm1, %v246_v49, 0.0  ;;  %v1427_v49 = vld [vmem:[#allocation15_spill] sm:$0xff]  ;;  %v1428_v12 = vld [vmem:[#allocation16_spill] sm:$0xff] }
  0x4d   :  { %v159_v25 = vadd.f32 %v1412_v55, %v157_v63  ;;  %v324_v60 = vadd.f32 %v323_v16, %v322_v24  ;;  %v1420_v16 = vld [vmem:[#allocation11_spill] sm:$0xff]  ;;  %v1421_v24 = vld [vmem:[#allocation48_spill] sm:$0xff] }
  0x4e   :  { %v248_v7 = vmul.f32 %v1421_v24, %v1421_v24  ;;  %v337_v51 = vsel %vm82_vm1, %v247_v14, 0.0 }
  0x4f   :  { %v161_v58 = vadd.f32 %v1414_v15, %v159_v25  ;;  %v326_v0 = vadd.f32 %v325_v1, %v324_v60  ;;  %v1422_v1 = vld [vmem:[#allocation12_spill] sm:$0xff] }
  0x50   :  { %v1423_v60 = vld [vmem:[#allocation52_spill] sm:$0xff]  ;;  %v339_v5 = vsel %vm82_vm1, %v248_v7, 0.0  ;;  %v1430_v7 = vld [vmem:[#allocation18_spill] sm:$0xff] }
  0x51   :  { %v163_v20 = vadd.f32 %v1416_v56, %v161_v58  ;;  %v328_v3 = vadd.f32 %v327_v2, %v326_v0  ;;  %v249_v6 = vmul.f32 %v1423_v60, %v1423_v60  ;;  %v1424_v2 = vld [vmem:[#allocation13_spill] sm:$0xff] }
  0x52   :  { %v1425_v0 = vld [vmem:[#allocation53_spill] sm:$0xff] }
  0x53   :  { %v165_v62 = vadd.f32 %v1418_v30, %v163_v20  ;;  %v330_v9 = vadd.f32 %v329_v17, %v328_v3  ;;  %v250_v61 = vmul.f32 %v1425_v0, %v1425_v0  ;;  %v1426_v17 = vld [vmem:[#allocation14_spill] sm:$0xff]  ;;  %v251_v3 = vmul.f32 %v1165_v32, %v1165_v32 }
  0x54   :  { %v341_v34 = vsel %vm82_vm1, %v249_v6, 0.0  ;;  %v1432_v6 = vld [vmem:[#allocation20_spill] sm:$0xff]  ;;  %v1434_v0 = vld [vmem:[#allocation22_spill] sm:$0xff] }
  0x55   :  { %v167_v41 = vadd.f32 %v1420_v16, %v165_v62  ;;  %v332_v63 = vadd.f32 %v331_v35, %v330_v9  ;;  %v252_v62 = vmul.f32 %v1183_v43, %v1183_v43  ;;  %v343_v9 = vsel %vm82_vm1, %v250_v61, 0.0 }
  0x56   :  { %v345_v16 = vsel %vm82_vm1, %v251_v3, 0.0  ;;  %v1436_v3 = vld [vmem:[#allocation24_spill] sm:$0xff] }
  0x57   :  { %v169_v55 = vadd.f32 %v1422_v1, %v167_v41  ;;  %v334_v25 = vadd.f32 %v333_v11, %v332_v63  ;;  %v1429_v41 = vld [vmem:[#allocation17_spill] sm:$0xff]  ;;  %v347_v32 = vsel %vm82_vm1, %v252_v62, 0.0  ;;  %v1438_v62 = vld [vmem:[#allocation27_spill] sm:$0xff] }
  0x59   :  { %v171_v15 = vadd.f32 %v1424_v2, %v169_v55  ;;  %v336_v58 = vadd.f32 %v335_v10, %v334_v25  ;;  %v1431_v55 = vld [vmem:[#allocation19_spill] sm:$0xff]  ;;  %v1433_v2 = vld [vmem:[#allocation21_spill] sm:$0xff] }
  0x5b   :  { %v173_v56 = vadd.f32 %v1426_v17, %v171_v15  ;;  %v338_v20 = vadd.f32 %v337_v51, %v336_v58  ;;  %v1435_v17 = vld [vmem:[#allocation23_spill] sm:$0xff] }
  0x5d   :  { %v175_v35 = vadd.f32 %v1427_v49, %v173_v56  ;;  %v340_v30 = vadd.f32 %v339_v5, %v338_v20 }
  0x5f   :  { %v177_v14 = vadd.f32 %v1428_v12, %v175_v35  ;;  %v342_v11 = vadd.f32 %v341_v34, %v340_v30  ;;  %v1437_v35 = vld [vmem:[#allocation25_spill] sm:$0xff]  ;;  %v1439_v12 = vld [vmem:[#allocation28_spill] sm:$0xff] }
  0x61   :  { %v179_v63 = vadd.f32 %v1429_v41, %v177_v14  ;;  %v344_v24 = vadd.f32 %v343_v9, %v342_v11  ;;  %v1440_v11 = vld [vmem:[#allocation29_spill] sm:$0xff]  ;;  %v1441_v41 = vld [vmem:[#allocation31_spill] sm:$0xff] }
  0x63   :  { %v181_v10 = vadd.f32 %v1430_v7, %v179_v63  ;;  %v346_v1 = vadd.f32 %v345_v16, %v344_v24  ;;  %v1442_v24 = vld [vmem:[#allocation32_spill] sm:$0xff]  ;;  %v1443_v7 = vld [vmem:[#allocation33_spill] sm:$0xff] }
  0x65   :  { %v183_v25 = vadd.f32 %v1431_v55, %v181_v10  ;;  %v348_v60 = vadd.f32 %v347_v32, %v346_v1  ;;  %v1444_v1 = vld [vmem:[#allocation34_spill] sm:$0xff] }
  0x67   :  { %v185_v43 = vadd.f32 %v1432_v6, %v183_v25  ;;  %v350_v51 = vadd.f32 %v1072_v50, %v348_v60 }
  0x69   :  { %v187_v15 = vadd.f32 %v1433_v2, %v185_v43  ;;  %v352_v58 = vadd.f32 %v1075_v31, %v350_v51 }
  0x6b   :  { %v189_v61 = vadd.f32 %v1434_v0, %v187_v15  ;;  %v354_v5 = vadd.f32 %v1078_v26, %v352_v58 }
  0x6d   :  { %v191_v56 = vadd.f32 %v1435_v17, %v189_v61  ;;  %v356_v20 = vadd.f32 %v1081_v44, %v354_v5 }
  0x6f   :  { %v193_v34 = vadd.f32 %v1436_v3, %v191_v56  ;;  %v358_v49 = vadd.f32 %v1084_v57, %v356_v20 }
  0x71   :  { %v195_v30 = vadd.f32 %v1437_v35, %v193_v34  ;;  %v360_v50 = vadd.f32 %v1088_v13, %v358_v49 }
  0x73   :  { %v197_v9 = vadd.f32 %v1438_v62, %v195_v30  ;;  %v362_v31 = vadd.f32 %v1091_v18, %v360_v50 }
  0x75   :  { %v199_v14 = vadd.f32 %v1439_v12, %v197_v9  ;;  %v364_v26 = vadd.f32 %v1094_v19, %v362_v31 }
  0x77   :  { %v201_v16 = vadd.f32 %v1440_v11, %v199_v14  ;;  %v366_v44 = vadd.f32 %v1097_v21, %v364_v26 }
  0x79   :  { %v203_v63 = vadd.f32 %v1441_v41, %v201_v16  ;;  %v368_v57 = vadd.f32 %v1100_v22, %v366_v44 }
  0x7b   :  { %v205_v32 = vadd.f32 %v1442_v24, %v203_v63  ;;  %v370_v13 = vadd.f32 %v1103_v23, %v368_v57 }
  0x7d   :  { %v207_v10 = vadd.f32 %v1443_v7, %v205_v32  ;;  %v372_v18 = vadd.f32 %v1107_v45, %v370_v13  ;;  %v81_v45 = vld [vmem:[%s1319_s1] sm:$0x1] }
  0x7f   :  { %v209_v55 = vadd.f32 %v1444_v1, %v207_v10  ;;  %v374_v19 = vadd.f32 %v1110_v4, %v372_v18 }
  0x81   :  { %v210_v25 = vrot.slane %v209_v55, 4  ;;  %v376_v60 = vadd.f32 %v1113_v27, %v374_v19 }
  0x83   :  { %v211_v21 = vadd.f32 %v210_v25, %v209_v55  ;;  %v378_v6 = vadd.f32 %v1116_v28, %v376_v60 }
  0x85   :  { %v212_v43 = vrot.slane %v211_v21, 2  ;;  %v380_v22 = vadd.f32 %v1119_v29, %v378_v6 }
  0x87   :  { %v213_v51 = vadd.f32 %v212_v43, %v211_v21  ;;  %v382_v23 = vadd.f32 %v1122_v33, %v380_v22 }
  0x89   :  { %v214_v2 = vrot.slane %v213_v51, 1  ;;  %v384_v15 = vadd.f32 %v1126_v40, %v382_v23 }
  0x8b   :  { %v215_v4 = vadd.f32 %v214_v2, %v213_v51  ;;  %v386_v58 = vadd.f32 %v1129_v42, %v384_v15 }
  0x8d   :  { %v216_v27 = vadd.f32 %v215_v4, %v81_v45  ;;  %v388_v0 = vadd.f32 %v1132_v46, %v386_v58 }
  0x8f   :  { %218 = vst.msk [vmem:[%s1319_s1] sm:$0x1] %vm14_vm0, %v216_v27  ;;  %v390_v28 = vadd.f32 %v1135_v47, %v388_v0 }
  0x91   :  { %v392_v29 = vadd.f32 %v1138_v39, %v390_v28 }
  0x93   :  { %v394_v33 = vadd.f32 %v1141_v48, %v392_v29 }
  0x95   :  { %v396_v40 = vadd.f32 %v1145_v37, %v394_v33  ;;  %v219_v37 = vld [vmem:[%s1320_s2] sm:$0x1] }
  0x97   :  { %v398_v61 = vadd.f32 %v1148_v53, %v396_v40 }
  0x99   :  { %v400_v42 = vadd.f32 %v1151_v54, %v398_v61 }
  0x9b   :  { %v402_v5 = vadd.f32 %v1154_v38, %v400_v42 }
  0x9d   :  { %v404_v46 = vadd.f32 %v1157_v59, %v402_v5 }
  0x9f   :  { %v406_v17 = vadd.f32 %v1160_v36, %v404_v46 }
  0xa1   :  { %v408_v56 = vadd.f32 %v1169_v52, %v406_v17 }
  0xa3   :  { %v410_v47 = vadd.f32 %v1172_v8, %v408_v56 }
  0xa5   :  { %v411_v20 = vrot.slane %v410_v47, 4 }
  0xa7   :  { %v412_v39 = vadd.f32 %v411_v20, %v410_v47 }
  0xa9   :  { %v413_v3 = vrot.slane %v412_v39, 2 }
  0xab   :  { %v414_v48 = vadd.f32 %v413_v3, %v412_v39 }
  0xad   :  { %v415_v34 = vrot.slane %v414_v48, 1 }
  0xaf   :  { %v416_v53 = vadd.f32 %v415_v34, %v414_v48 }
  0xb1   :  { %v417_v54 = vadd.f32 %v416_v53, %v219_v37 }
  0xb3   :  { %418 = vst.msk [vmem:[%s1320_s2] sm:$0x1] %vm14_vm0, %v417_v54 }

// kernel: netG_forward.19
= control target key start
LH: loop header
LB: loop body
LE: loop exit
PB: predicated region body
PF: predicated region fallthrough
CT: control target
= control target key end

     0   :  { %vm284_vm0 = vcmask 130048   ;;  %s961_s0 = inlined_call_operand.vmem [shape: f32[512,16], index: 0, kind: input, shape index: {}]   ;;  %s962_s1 = inlined_call_operand.vmem [shape: f32[1,16], index: 1, kind: input, shape index: {}]   ;;  %s963_s2 = inlined_call_operand.vmem [shape: f32[1,16], index: 2, kind: input, shape index: {}]   ;;  %s964_s3 = inlined_call_operand.vmem [shape: f32[512,16], index: 3, kind: output, shape index: {}]  }
   0x1   :  { %v14_v0 = vld [vmem:[%s961_s0] sm:$0xff]  ;;  %v15_v4 = vld [vmem:[%s961_s0 + $0x8] sm:$0xff]  ;;  %v16_v5 = vld [vmem:[%s961_s0 + $0x10] sm:$0xff] }
   0x2   :  { %v381_v1 = vld [vmem:[%s962_s1] ss:$0 sm:$0xff]  ;;  %v17_v6 = vld [vmem:[%s961_s0 + $0x18] sm:$0xff]  ;;  %v19_v11 = vld [vmem:[%s961_s0 + $0x28] sm:$0xff] }
   0x3   :  { %v386_v2 = vld [vmem:[%s963_s2] ss:$0 sm:$0xff]  ;;  %v85_v3 = vmul.f32 %v381_v1, %v14_v0  ;;  %v86_v7 = vmul.f32 %v381_v1, %v15_v4  ;;  %v87_v8 = vmul.f32 %v381_v1, %v16_v5  ;;  %v88_v9 = vmul.f32 %v381_v1, %v17_v6  ;;  %v20_v12 = vld [vmem:[%s961_s0 + $0x30] sm:$0xff]  ;;  %v21_v17 = vld [vmem:[%s961_s0 + $0x38] sm:$0xff] }
   0x4   :  { %v18_v10 = vld [vmem:[%s961_s0 + $0x20] sm:$0xff]  ;;  %v90_v15 = vmul.f32 %v381_v1, %v19_v11  ;;  %v91_v16 = vmul.f32 %v381_v1, %v20_v12  ;;  %v92_v21 = vmul.f32 %v381_v1, %v21_v17  ;;  %v23_v27 = vld [vmem:[%s961_s0 + $0x48] sm:$0xff]  ;;  %v24_v28 = vld [vmem:[%s961_s0 + $0x50] sm:$0xff] }
   0x5   :  { %v156_v13 = vadd.f32 %v386_v2, %v85_v3  ;;  %v89_v14 = vmul.f32 %v381_v1, %v18_v10  ;;  %v157_v18 = vadd.f32 %v386_v2, %v86_v7  ;;  %v158_v19 = vadd.f32 %v386_v2, %v87_v8  ;;  %v22_v22 = vld [vmem:[%s961_s0 + $0x40] sm:$0xff]  ;;  %v25_v29 = vld [vmem:[%s961_s0 + $0x58] sm:$0xff]  ;;  %v27_v35 = vld [vmem:[%s961_s0 + $0x68] sm:$0xff] }
   0x6   :  { %v159_v20 = vadd.f32 %v386_v2, %v88_v9  ;;  %v161_v25 = vadd.f32 %v386_v2, %v90_v15  ;;  %v162_v26 = vadd.f32 %v386_v2, %v91_v16  ;;  %v163_v33 = vadd.f32 %v386_v2, %v92_v21  ;;  %v26_v34 = vld [vmem:[%s961_s0 + $0x60] sm:$0xff]  ;;  %v28_v36 = vld [vmem:[%s961_s0 + $0x70] sm:$0xff]  ;;  %v29_v41 = vld [vmem:[%s961_s0 + $0x78] sm:$0xff] }
   0x7   :  { %v220_v23 = vmax.f32 %v156_v13, 0.0  ;;  %v160_v24 = vadd.f32 %v386_v2, %v89_v14  ;;  %v221_v30 = vmax.f32 %v157_v18, 0.0  ;;  %v222_v31 = vmax.f32 %v158_v19, 0.0  ;;  %v30_v54 = vld [vmem:[%s961_s0 + $0x80] sm:$0xff]  ;;  %v31_v59 = vld [vmem:[%s961_s0 + $0x88] sm:$0xff]  ;;  %v32_v60 = vld [vmem:[%s961_s0 + $0x90] sm:$0xff] }
   0x8   :  { %v223_v32 = vmax.f32 %v159_v20, 0.0  ;;  %v225_v38 = vmax.f32 %v161_v25, 0.0  ;;  %v226_v39 = vmax.f32 %v162_v26, 0.0  ;;  %v93_v40 = vmul.f32 %v381_v1, %v22_v22  ;;  %v33_v61 = vld [vmem:[%s961_s0 + $0x98] sm:$0xff]  ;;  %v34_v4 = vld [vmem:[%s961_s0 + $0xa0] sm:$0xff]  ;;  %v35_v5 = vld [vmem:[%s961_s0 + $0xa8] sm:$0xff] }
   0x9   :  { %285 = vst.msk [vmem:[%s964_s3] sm:$0xff] %vm284_vm0, %v220_v23  ;;  %v224_v37 = vmax.f32 %v160_v24, 0.0  ;;  %286 = vst.msk [vmem:[%s964_s3 + $0x8] sm:$0xff] %vm284_vm0, %v221_v30  ;;  %v227_v42 = vmax.f32 %v163_v33, 0.0  ;;  %v94_v43 = vmul.f32 %v381_v1, %v23_v27  ;;  %v95_v44 = vmul.f32 %v381_v1, %v24_v28  ;;  %v36_v6 = vld [vmem:[%s961_s0 + $0xb0] sm:$0xff]  ;;  %v37_v11 = vld [vmem:[%s961_s0 + $0xb8] sm:$0xff] }
   0xa   :  { %287 = vst.msk [vmem:[%s964_s3 + $0x10] sm:$0xff] %vm284_vm0, %v222_v31  ;;  %288 = vst.msk [vmem:[%s964_s3 + $0x18] sm:$0xff] %vm284_vm0, %v223_v32  ;;  %v96_v45 = vmul.f32 %v381_v1, %v25_v29  ;;  %v164_v46 = vadd.f32 %v386_v2, %v93_v40  ;;  %v97_v47 = vmul.f32 %v381_v1, %v26_v34  ;;  %v38_v24 = vld [vmem:[%s961_s0 + $0xc0] sm:$0xff]  ;;  %v39_v29 = vld [vmem:[%s961_s0 + $0xc8] sm:$0xff] }
   0xb   :  { %289 = vst.msk [vmem:[%s964_s3 + $0x20] sm:$0xff] %vm284_vm0, %v224_v37  ;;  %290 = vst.msk [vmem:[%s964_s3 + $0x28] sm:$0xff] %vm284_vm0, %v225_v38  ;;  %v98_v48 = vmul.f32 %v381_v1, %v27_v35  ;;  %v99_v49 = vmul.f32 %v381_v1, %v28_v36  ;;  %v165_v50 = vadd.f32 %v386_v2, %v94_v43  ;;  %v40_v30 = vld [vmem:[%s961_s0 + $0xd0] sm:$0xff]  ;;  %v41_v31 = vld [vmem:[%s961_s0 + $0xd8] sm:$0xff] }
   0xc   :  { %291 = vst.msk [vmem:[%s964_s3 + $0x30] sm:$0xff] %vm284_vm0, %v226_v39  ;;  %292 = vst.msk [vmem:[%s964_s3 + $0x38] sm:$0xff] %vm284_vm0, %v227_v42  ;;  %v166_v51 = vadd.f32 %v386_v2, %v95_v44  ;;  %v167_v52 = vadd.f32 %v386_v2, %v96_v45  ;;  %v100_v53 = vmul.f32 %v381_v1, %v29_v41  ;;  %v228_v55 = vmax.f32 %v164_v46, 0.0  ;;  %v42_v36 = vld [vmem:[%s961_s0 + $0xe0] sm:$0xff]  ;;  %v43_v37 = vld [vmem:[%s961_s0 + $0xe8] sm:$0xff] }
   0xd   :  { %v168_v56 = vadd.f32 %v386_v2, %v97_v47  ;;  %v169_v57 = vadd.f32 %v386_v2, %v98_v48  ;;  %v170_v58 = vadd.f32 %v386_v2, %v99_v49  ;;  %v229_v62 = vmax.f32 %v165_v50, 0.0  ;;  %v44_v38 = vld [vmem:[%s961_s0 + $0xf0] sm:$0xff]  ;;  %v45_v43 = vld [vmem:[%s961_s0 + $0xf8] sm:$0xff] }
   0xe   :  { %v230_v63 = vmax.f32 %v166_v51, 0.0  ;;  %v231_v0 = vmax.f32 %v167_v52, 0.0  ;;  %v171_v3 = vadd.f32 %v386_v2, %v100_v53  ;;  %293 = vst.msk [vmem:[%s964_s3 + $0x40] sm:$0xff] %vm284_vm0, %v228_v55  ;;  %v101_v10 = vmul.f32 %v381_v1, %v30_v54 }
   0xf   :  { %v232_v7 = vmax.f32 %v168_v56, 0.0  ;;  %v233_v8 = vmax.f32 %v169_v57, 0.0  ;;  %v234_v9 = vmax.f32 %v170_v58, 0.0  ;;  %294 = vst.msk [vmem:[%s964_s3 + $0x48] sm:$0xff] %vm284_vm0, %v229_v62  ;;  %v102_v13 = vmul.f32 %v381_v1, %v31_v59  ;;  %v46_v56 = vld [vmem:[%s961_s0 + $0x100] sm:$0xff]  ;;  %v48_v62 = vld [vmem:[%s961_s0 + $0x110] sm:$0xff] }
  0x10   :  { %295 = vst.msk [vmem:[%s964_s3 + $0x50] sm:$0xff] %vm284_vm0, %v230_v63  ;;  %296 = vst.msk [vmem:[%s964_s3 + $0x58] sm:$0xff] %vm284_vm0, %v231_v0  ;;  %v235_v12 = vmax.f32 %v171_v3, 0.0  ;;  %v103_v14 = vmul.f32 %v381_v1, %v32_v60  ;;  %v104_v15 = vmul.f32 %v381_v1, %v33_v61  ;;  %v172_v16 = vadd.f32 %v386_v2, %v101_v10  ;;  %v47_v61 = vld [vmem:[%s961_s0 + $0x108] sm:$0xff]  ;;  %v49_v63 = vld [vmem:[%s961_s0 + $0x118] sm:$0xff] }
  0x11   :  { %297 = vst.msk [vmem:[%s964_s3 + $0x60] sm:$0xff] %vm284_vm0, %v232_v7  ;;  %298 = vst.msk [vmem:[%s964_s3 + $0x68] sm:$0xff] %vm284_vm0, %v233_v8  ;;  %v105_v17 = vmul.f32 %v381_v1, %v34_v4  ;;  %v106_v18 = vmul.f32 %v381_v1, %v35_v5  ;;  %v107_v19 = vmul.f32 %v381_v1, %v36_v6  ;;  %v50_v6 = vld [vmem:[%s961_s0 + $0x120] sm:$0xff]  ;;  %v51_v7 = vld [vmem:[%s961_s0 + $0x128] sm:$0xff] }
  0x12   :  { %299 = vst.msk [vmem:[%s964_s3 + $0x70] sm:$0xff] %vm284_vm0, %v234_v9  ;;  %300 = vst.msk [vmem:[%s964_s3 + $0x78] sm:$0xff] %vm284_vm0, %v235_v12  ;;  %v173_v20 = vadd.f32 %v386_v2, %v102_v13  ;;  %v174_v21 = vadd.f32 %v386_v2, %v103_v14  ;;  %v175_v22 = vadd.f32 %v386_v2, %v104_v15  ;;  %v236_v25 = vmax.f32 %v172_v16, 0.0  ;;  %v52_v8 = vld [vmem:[%s961_s0 + $0x130] sm:$0xff]  ;;  %v53_v13 = vld [vmem:[%s961_s0 + $0x138] sm:$0xff] }
  0x13   :  { %v108_v23 = vmul.f32 %v381_v1, %v37_v11  ;;  %v176_v26 = vadd.f32 %v386_v2, %v105_v17  ;;  %v177_v27 = vadd.f32 %v386_v2, %v106_v18  ;;  %v178_v28 = vadd.f32 %v386_v2, %v107_v19 }
  0x14   :  { %v237_v32 = vmax.f32 %v173_v20, 0.0  ;;  %v238_v33 = vmax.f32 %v174_v21, 0.0  ;;  %v239_v34 = vmax.f32 %v175_v22, 0.0  ;;  %301 = vst.msk [vmem:[%s964_s3 + $0x80] sm:$0xff] %vm284_vm0, %v236_v25  ;;  %v109_v42 = vmul.f32 %v381_v1, %v38_v24 }
  0x15   :  { %v179_v35 = vadd.f32 %v386_v2, %v108_v23  ;;  %v240_v39 = vmax.f32 %v176_v26, 0.0  ;;  %v241_v40 = vmax.f32 %v177_v27, 0.0  ;;  %v242_v41 = vmax.f32 %v178_v28, 0.0  ;;  %v54_v26 = vld [vmem:[%s961_s0 + $0x140] sm:$0xff] }
  0x16   :  { %302 = vst.msk [vmem:[%s964_s3 + $0x88] sm:$0xff] %vm284_vm0, %v237_v32  ;;  %303 = vst.msk [vmem:[%s964_s3 + $0x90] sm:$0xff] %vm284_vm0, %v238_v33  ;;  %v110_v45 = vmul.f32 %v381_v1, %v39_v29  ;;  %v111_v46 = vmul.f32 %v381_v1, %v40_v30  ;;  %v112_v47 = vmul.f32 %v381_v1, %v41_v31  ;;  %v55_v31 = vld [vmem:[%s961_s0 + $0x148] sm:$0xff]  ;;  %v56_v32 = vld [vmem:[%s961_s0 + $0x150] sm:$0xff] }
  0x17   :  { %304 = vst.msk [vmem:[%s964_s3 + $0x98] sm:$0xff] %vm284_vm0, %v239_v34  ;;  %v243_v44 = vmax.f32 %v179_v35, 0.0  ;;  %305 = vst.msk [vmem:[%s964_s3 + $0xa0] sm:$0xff] %vm284_vm0, %v240_v39  ;;  %v180_v48 = vadd.f32 %v386_v2, %v109_v42  ;;  %v113_v49 = vmul.f32 %v381_v1, %v42_v36  ;;  %v114_v50 = vmul.f32 %v381_v1, %v43_v37  ;;  %v57_v33 = vld [vmem:[%s961_s0 + $0x158] sm:$0xff]  ;;  %v59_v39 = vld [vmem:[%s961_s0 + $0x168] sm:$0xff] }
  0x18   :  { %306 = vst.msk [vmem:[%s964_s3 + $0xa8] sm:$0xff] %vm284_vm0, %v241_v40  ;;  %307 = vst.msk [vmem:[%s964_s3 + $0xb0] sm:$0xff] %vm284_vm0, %v242_v41  ;;  %v115_v51 = vmul.f32 %v381_v1, %v44_v38  ;;  %v181_v52 = vadd.f32 %v386_v2, %v110_v45  ;;  %v182_v53 = vadd.f32 %v386_v2, %v111_v46  ;;  %v58_v38 = vld [vmem:[%s961_s0 + $0x160] sm:$0xff]  ;;  %v60_v40 = vld [vmem:[%s961_s0 + $0x170] sm:$0xff] }
  0x19   :  { %308 = vst.msk [vmem:[%s964_s3 + $0xb8] sm:$0xff] %vm284_vm0, %v243_v44  ;;  %v183_v54 = vadd.f32 %v386_v2, %v112_v47  ;;  %v116_v55 = vmul.f32 %v381_v1, %v45_v43  ;;  %v244_v57 = vmax.f32 %v180_v48, 0.0  ;;  %v184_v58 = vadd.f32 %v386_v2, %v113_v49  ;;  %v61_v45 = vld [vmem:[%s961_s0 + $0x178] sm:$0xff] }
  0x1a   :  { %v185_v59 = vadd.f32 %v386_v2, %v114_v50  ;;  %v186_v60 = vadd.f32 %v386_v2, %v115_v51  ;;  %v245_v0 = vmax.f32 %v181_v52, 0.0  ;;  %v246_v3 = vmax.f32 %v182_v53, 0.0 }
  0x1b   :  { %v247_v4 = vmax.f32 %v183_v54, 0.0  ;;  %v187_v5 = vadd.f32 %v386_v2, %v116_v55  ;;  %309 = vst.msk [vmem:[%s964_s3 + $0xc0] sm:$0xff] %vm284_vm0, %v244_v57  ;;  %v248_v9 = vmax.f32 %v184_v58, 0.0  ;;  %v117_v12 = vmul.f32 %v381_v1, %v46_v56  ;;  %v62_v58 = vld [vmem:[%s961_s0 + $0x180] sm:$0xff] }
  0x1c   :  { %v249_v10 = vmax.f32 %v185_v59, 0.0  ;;  %v250_v11 = vmax.f32 %v186_v60, 0.0  ;;  %310 = vst.msk [vmem:[%s964_s3 + $0xc8] sm:$0xff] %vm284_vm0, %v245_v0  ;;  %311 = vst.msk [vmem:[%s964_s3 + $0xd0] sm:$0xff] %vm284_vm0, %v246_v3  ;;  %v118_v15 = vmul.f32 %v381_v1, %v47_v61  ;;  %v119_v16 = vmul.f32 %v381_v1, %v48_v62  ;;  %v64_v0 = vld [vmem:[%s961_s0 + $0x190] sm:$0xff]  ;;  %v65_v3 = vld [vmem:[%s961_s0 + $0x198] sm:$0xff] }
  0x1d   :  { %312 = vst.msk [vmem:[%s964_s3 + $0xd8] sm:$0xff] %vm284_vm0, %v247_v4  ;;  %v251_v14 = vmax.f32 %v187_v5, 0.0  ;;  %v120_v17 = vmul.f32 %v381_v1, %v49_v63  ;;  %313 = vst.msk [vmem:[%s964_s3 + $0xe0] sm:$0xff] %vm284_vm0, %v248_v9  ;;  %v188_v18 = vadd.f32 %v386_v2, %v117_v12  ;;  %v121_v19 = vmul.f32 %v381_v1, %v50_v6  ;;  %v63_v63 = vld [vmem:[%s961_s0 + $0x188] sm:$0xff] }
  0x1e   :  { %314 = vst.msk [vmem:[%s964_s3 + $0xe8] sm:$0xff] %vm284_vm0, %v249_v10  ;;  %315 = vst.msk [vmem:[%s964_s3 + $0xf0] sm:$0xff] %vm284_vm0, %v250_v11  ;;  %v122_v20 = vmul.f32 %v381_v1, %v51_v7  ;;  %v123_v21 = vmul.f32 %v381_v1, %v52_v8  ;;  %v189_v22 = vadd.f32 %v386_v2, %v118_v15  ;;  %v66_v8 = vld [vmem:[%s961_s0 + $0x1a0] sm:$0xff]  ;;  %v67_v9 = vld [vmem:[%s961_s0 + $0x1a8] sm:$0xff] }
  0x1f   :  { %316 = vst.msk [vmem:[%s964_s3 + $0xf8] sm:$0xff] %vm284_vm0, %v251_v14  ;;  %v190_v23 = vadd.f32 %v386_v2, %v119_v16  ;;  %v191_v24 = vadd.f32 %v386_v2, %v120_v17  ;;  %v124_v25 = vmul.f32 %v381_v1, %v53_v13  ;;  %v252_v27 = vmax.f32 %v188_v18, 0.0  ;;  %v68_v10 = vld [vmem:[%s961_s0 + $0x1b0] sm:$0xff]  ;;  %v69_v15 = vld [vmem:[%s961_s0 + $0x1b8] sm:$0xff] }
  0x20   :  { %v192_v28 = vadd.f32 %v386_v2, %v121_v19  ;;  %v193_v29 = vadd.f32 %v386_v2, %v122_v20  ;;  %v194_v30 = vadd.f32 %v386_v2, %v123_v21  ;;  %v253_v34 = vmax.f32 %v189_v22, 0.0 }
  0x21   :  { %v254_v35 = vmax.f32 %v190_v23, 0.0  ;;  %v255_v36 = vmax.f32 %v191_v24, 0.0  ;;  %v195_v37 = vadd.f32 %v386_v2, %v124_v25  ;;  %317 = vst.msk [vmem:[%s964_s3 + $0x100] sm:$0xff] %vm284_vm0, %v252_v27  ;;  %v125_v44 = vmul.f32 %v381_v1, %v54_v26 }
  0x22   :  { %v256_v41 = vmax.f32 %v192_v28, 0.0  ;;  %v257_v42 = vmax.f32 %v193_v29, 0.0  ;;  %v258_v43 = vmax.f32 %v194_v30, 0.0  ;;  %318 = vst.msk [vmem:[%s964_s3 + $0x108] sm:$0xff] %vm284_vm0, %v253_v34  ;;  %v126_v47 = vmul.f32 %v381_v1, %v55_v31  ;;  %v70_v28 = vld [vmem:[%s961_s0 + $0x1c0] sm:$0xff]  ;;  %v72_v34 = vld [vmem:[%s961_s0 + $0x1d0] sm:$0xff] }
  0x23   :  { %319 = vst.msk [vmem:[%s964_s3 + $0x110] sm:$0xff] %vm284_vm0, %v254_v35  ;;  %320 = vst.msk [vmem:[%s964_s3 + $0x118] sm:$0xff] %vm284_vm0, %v255_v36  ;;  %v259_v46 = vmax.f32 %v195_v37, 0.0  ;;  %v127_v48 = vmul.f32 %v381_v1, %v56_v32  ;;  %v128_v49 = vmul.f32 %v381_v1, %v57_v33  ;;  %v196_v50 = vadd.f32 %v386_v2, %v125_v44  ;;  %v71_v33 = vld [vmem:[%s961_s0 + $0x1c8] sm:$0xff]  ;;  %v73_v35 = vld [vmem:[%s961_s0 + $0x1d8] sm:$0xff] }
  0x24   :  { %321 = vst.msk [vmem:[%s964_s3 + $0x120] sm:$0xff] %vm284_vm0, %v256_v41  ;;  %322 = vst.msk [vmem:[%s964_s3 + $0x128] sm:$0xff] %vm284_vm0, %v257_v42  ;;  %v129_v51 = vmul.f32 %v381_v1, %v58_v38  ;;  %v130_v52 = vmul.f32 %v381_v1, %v59_v39  ;;  %v131_v53 = vmul.f32 %v381_v1, %v60_v40  ;;  %v74_v40 = vld [vmem:[%s961_s0 + $0x1e0] sm:$0xff]  ;;  %v75_v41 = vld [vmem:[%s961_s0 + $0x1e8] sm:$0xff] }
  0x25   :  { %323 = vst.msk [vmem:[%s964_s3 + $0x130] sm:$0xff] %vm284_vm0, %v258_v43  ;;  %324 = vst.msk [vmem:[%s964_s3 + $0x138] sm:$0xff] %vm284_vm0, %v259_v46  ;;  %v197_v54 = vadd.f32 %v386_v2, %v126_v47  ;;  %v198_v55 = vadd.f32 %v386_v2, %v127_v48  ;;  %v199_v56 = vadd.f32 %v386_v2, %v128_v49  ;;  %v260_v59 = vmax.f32 %v196_v50, 0.0  ;;  %v76_v42 = vld [vmem:[%s961_s0 + $0x1f0] sm:$0xff]  ;;  %v77_v47 = vld [vmem:[%s961_s0 + $0x1f8] sm:$0xff] }
  0x26   :  { %v132_v57 = vmul.f32 %v381_v1, %v61_v45  ;;  %v200_v60 = vadd.f32 %v386_v2, %v129_v51  ;;  %v201_v61 = vadd.f32 %v386_v2, %v130_v52  ;;  %v202_v62 = vadd.f32 %v386_v2, %v131_v53 }
  0x27   :  { %v261_v4 = vmax.f32 %v197_v54, 0.0  ;;  %v262_v5 = vmax.f32 %v198_v55, 0.0  ;;  %v263_v6 = vmax.f32 %v199_v56, 0.0  ;;  %325 = vst.msk [vmem:[%s964_s3 + $0x140] sm:$0xff] %vm284_vm0, %v260_v59  ;;  %v133_v14 = vmul.f32 %v381_v1, %v62_v58 }
  0x28   :  { %v203_v7 = vadd.f32 %v386_v2, %v132_v57  ;;  %v264_v11 = vmax.f32 %v200_v60, 0.0  ;;  %v265_v12 = vmax.f32 %v201_v61, 0.0  ;;  %v266_v13 = vmax.f32 %v202_v62, 0.0 }
  0x29   :  { %326 = vst.msk [vmem:[%s964_s3 + $0x148] sm:$0xff] %vm284_vm0, %v261_v4  ;;  %327 = vst.msk [vmem:[%s964_s3 + $0x150] sm:$0xff] %vm284_vm0, %v262_v5  ;;  %v134_v17 = vmul.f32 %v381_v1, %v63_v63  ;;  %v135_v18 = vmul.f32 %v381_v1, %v64_v0  ;;  %v136_v19 = vmul.f32 %v381_v1, %v65_v3 }
  0x2a   :  { %328 = vst.msk [vmem:[%s964_s3 + $0x158] sm:$0xff] %vm284_vm0, %v263_v6  ;;  %v267_v16 = vmax.f32 %v203_v7, 0.0  ;;  %329 = vst.msk [vmem:[%s964_s3 + $0x160] sm:$0xff] %vm284_vm0, %v264_v11  ;;  %v204_v20 = vadd.f32 %v386_v2, %v133_v14  ;;  %v137_v21 = vmul.f32 %v381_v1, %v66_v8  ;;  %v138_v22 = vmul.f32 %v381_v1, %v67_v9 }
  0x2b   :  { %330 = vst.msk [vmem:[%s964_s3 + $0x168] sm:$0xff] %vm284_vm0, %v265_v12  ;;  %331 = vst.msk [vmem:[%s964_s3 + $0x170] sm:$0xff] %vm284_vm0, %v266_v13  ;;  %v139_v23 = vmul.f32 %v381_v1, %v68_v10  ;;  %v205_v24 = vadd.f32 %v386_v2, %v134_v17  ;;  %v206_v25 = vadd.f32 %v386_v2, %v135_v18 }
  0x2c   :  { %332 = vst.msk [vmem:[%s964_s3 + $0x178] sm:$0xff] %vm284_vm0, %v267_v16  ;;  %v207_v26 = vadd.f32 %v386_v2, %v136_v19  ;;  %v140_v27 = vmul.f32 %v381_v1, %v69_v15  ;;  %v268_v29 = vmax.f32 %v204_v20, 0.0  ;;  %v208_v30 = vadd.f32 %v386_v2, %v137_v21 }
  0x2d   :  { %v209_v31 = vadd.f32 %v386_v2, %v138_v22  ;;  %v210_v32 = vadd.f32 %v386_v2, %v139_v23  ;;  %v269_v36 = vmax.f32 %v205_v24, 0.0  ;;  %v270_v37 = vmax.f32 %v206_v25, 0.0 }
  0x2e   :  { %v271_v38 = vmax.f32 %v207_v26, 0.0  ;;  %v211_v39 = vadd.f32 %v386_v2, %v140_v27  ;;  %333 = vst.msk [vmem:[%s964_s3 + $0x180] sm:$0xff] %vm284_vm0, %v268_v29  ;;  %v272_v43 = vmax.f32 %v208_v30, 0.0  ;;  %v141_v46 = vmul.f32 %v381_v1, %v70_v28 }
  0x2f   :  { %v273_v44 = vmax.f32 %v209_v31, 0.0  ;;  %v274_v45 = vmax.f32 %v210_v32, 0.0  ;;  %334 = vst.msk [vmem:[%s964_s3 + $0x188] sm:$0xff] %vm284_vm0, %v269_v36  ;;  %335 = vst.msk [vmem:[%s964_s3 + $0x190] sm:$0xff] %vm284_vm0, %v270_v37  ;;  %v142_v49 = vmul.f32 %v381_v1, %v71_v33  ;;  %v143_v50 = vmul.f32 %v381_v1, %v72_v34 }
  0x30   :  { %336 = vst.msk [vmem:[%s964_s3 + $0x198] sm:$0xff] %vm284_vm0, %v271_v38  ;;  %v275_v48 = vmax.f32 %v211_v39, 0.0  ;;  %v144_v51 = vmul.f32 %v381_v1, %v73_v35  ;;  %337 = vst.msk [vmem:[%s964_s3 + $0x1a0] sm:$0xff] %vm284_vm0, %v272_v43  ;;  %v212_v52 = vadd.f32 %v386_v2, %v141_v46  ;;  %v145_v53 = vmul.f32 %v381_v1, %v74_v40 }
  0x31   :  { %338 = vst.msk [vmem:[%s964_s3 + $0x1a8] sm:$0xff] %vm284_vm0, %v273_v44  ;;  %339 = vst.msk [vmem:[%s964_s3 + $0x1b0] sm:$0xff] %vm284_vm0, %v274_v45  ;;  %v146_v54 = vmul.f32 %v381_v1, %v75_v41  ;;  %v147_v55 = vmul.f32 %v381_v1, %v76_v42  ;;  %v213_v56 = vadd.f32 %v386_v2, %v142_v49 }
  0x32   :  { %340 = vst.msk [vmem:[%s964_s3 + $0x1b8] sm:$0xff] %vm284_vm0, %v275_v48  ;;  %v214_v57 = vadd.f32 %v386_v2, %v143_v50  ;;  %v215_v58 = vadd.f32 %v386_v2, %v144_v51  ;;  %v148_v59 = vmul.f32 %v381_v1, %v77_v47  ;;  %v276_v60 = vmax.f32 %v212_v52, 0.0 }
  0x33   :  { %v216_v61 = vadd.f32 %v386_v2, %v145_v53  ;;  %v217_v62 = vadd.f32 %v386_v2, %v146_v54  ;;  %v218_v63 = vadd.f32 %v386_v2, %v147_v55  ;;  %v277_v0 = vmax.f32 %v213_v56, 0.0 }
  0x34   :  { %v278_v3 = vmax.f32 %v214_v57, 0.0  ;;  %v279_v4 = vmax.f32 %v215_v58, 0.0  ;;  %v219_v5 = vadd.f32 %v386_v2, %v148_v59  ;;  %341 = vst.msk [vmem:[%s964_s3 + $0x1c0] sm:$0xff] %vm284_vm0, %v276_v60 }
  0x35   :  { %v280_v6 = vmax.f32 %v216_v61, 0.0  ;;  %v281_v7 = vmax.f32 %v217_v62, 0.0  ;;  %v282_v1 = vmax.f32 %v218_v63, 0.0  ;;  %342 = vst.msk [vmem:[%s964_s3 + $0x1c8] sm:$0xff] %vm284_vm0, %v277_v0 }
  0x36   :  { %343 = vst.msk [vmem:[%s964_s3 + $0x1d0] sm:$0xff] %vm284_vm0, %v278_v3  ;;  %344 = vst.msk [vmem:[%s964_s3 + $0x1d8] sm:$0xff] %vm284_vm0, %v279_v4  ;;  %v283_v2 = vmax.f32 %v219_v5, 0.0 }
  0x37   :  { %345 = vst.msk [vmem:[%s964_s3 + $0x1e0] sm:$0xff] %vm284_vm0, %v280_v6  ;;  %346 = vst.msk [vmem:[%s964_s3 + $0x1e8] sm:$0xff] %vm284_vm0, %v281_v7 }
  0x38   :  { %347 = vst.msk [vmem:[%s964_s3 + $0x1f0] sm:$0xff] %vm284_vm0, %v282_v1  ;;  %348 = vst.msk [vmem:[%s964_s3 + $0x1f8] sm:$0xff] %vm284_vm0, %v283_v2 }

// kernel: netG_forward.20
= control target key start
LH: loop header
LB: loop body
LE: loop exit
PB: predicated region body
PF: predicated region fallthrough
CT: control target
= control target key end

     0   :  { %s1070_s9 = smov 0   ;;  %s1072_s10 = smov 0   ;;  %s1187_s0 = inlined_call_operand.vmem [shape: bf16[768,64], index: 0, kind: input, shape index: {}]   ;;  %s1188_s1 = inlined_call_operand.vmem [shape: bf16[64,128], index: 1, kind: input, shape index: {}]   ;;  %s1189_s2 = inlined_call_operand.vmem [shape: f32[768,128], index: 2, kind: output, shape index: {}]  }
   0x1   :  { %s1074_s11 = smov 0  }
   0x2 LB: > { %s31_s12 = sadd.s32 1, %s1049_s10  ;;  %p876_p0 = scmp.ge.s32.totalorder %s1053_s11, 1  ;;  %s1053_s11 = sphi %s1074_s11, %s12_s11   ;;  %s1049_s10 = sphi %s1072_s10, %s1191_s10   ;;  %s1045_s9 = sphi %s1070_s9, %s1190_s9  }
   0x3   : > { %p33_p1 = scmp.ge.s32.totalorder %s31_s12, 3  ;;  %p155_p2 = scmp.lt.s32.totalorder %s1053_s11, 4 }
   0x5   : > { %s1193_s12 = smov (%p33_p1, %s31_s12), 0  ;;  %p156_p3 = pnand %p876_p0, %p155_p2 }
   0x6   : > { %v1011_v0 = vld [vmem:[%s1188_s1] sm:$0xff] (!%p156_p3)   ;;  %s877_s15 = sshll.u32 (!%p156_p3), %s1045_s9, 5  ;;  %v1012_v1 = vld [vmem:[%s1188_s1 + $0x8] sm:$0xff] (!%p156_p3)   ;;  %v1013_v2 = vld [vmem:[%s1188_s1 + $0x10] sm:$0xff] (!%p156_p3)   ;;  %vm431_vm0 = vcmask (!%p156_p3), 523264  }
   0x7   : > { %159 = sbr.rel (%p156_p3) target bundleno = 263 (0x107), region = 28  ;;  %p192_p4 = scmp.lt.s32.totalorder (!%p156_p3), %s877_s15, 95  ;;  %939 = vmatprep.subr.bf16.mxu0 (!%p156_p3), %v1011_v0  ;;  %979 = vmatprep.subr.bf16.mxu1 (!%p156_p3), %v1011_v0  ;;  %v1014_v3 = vld [vmem:[%s1188_s1 + $0x18] sm:$0xff] (!%p156_p3)  }
   0x8   : > { %940 = vmatpush3.bf16.msra.mxu0 (!%p156_p3), %v1011_v0  ;;  %983 = vmatpush3.bf16.msra.mxu1 (!%p156_p3), %v1011_v0 }
   0x9   : > { %941 = vmatprep.subr.bf16.mxu0 (!%p156_p3), %v1012_v1  ;;  %980 = vmatprep.subr.bf16.mxu1 (!%p156_p3), %v1012_v1 }
   0xc   : > { %942 = vmatpush3.bf16.msra.mxu0 (!%p156_p3), %v1012_v1  ;;  %984 = vmatpush3.bf16.msra.mxu1 (!%p156_p3), %v1012_v1 }
   0xd   : > { %943 = vmatprep.subr.bf16.mxu0 (!%p156_p3), %v1013_v2  ;;  %981 = vmatprep.subr.bf16.mxu1 (!%p156_p3), %v1013_v2 }
   0xe   : > { %s1195_s15 = smov (!%p192_p4, %s877_s15), 95 }
   0xf   : > { %s878_s20 = sshll.u32 %s1195_s15, 2  ;;  %s880_s26 = sshll.u32 %s1195_s15, 3 }
  0x10   : > { %s1106_s25 = scalar_lea.vmem %s1187_s0, %s878_s20  ;;  %944 = vmatpush3.bf16.msra.mxu0 %v1013_v2  ;;  %985 = vmatpush3.bf16.msra.mxu1 %v1013_v2  ;;  %s1144_s29 = scalar_lea.vmem %s1189_s2, %s880_s26 }
  0x11   : > { %v1015_v4 = vld [vmem:[%s1106_s25] sm:$0xff]   ;;  %945 = vmatprep.subr.bf16.mxu0 %v1014_v3  ;;  %982 = vmatprep.subr.bf16.mxu1 %v1014_v3  ;;  %v1017_v6 = vld [vmem:[%s1106_s25 + $0x8] sm:$0xff]   ;;  %v1019_v8 = vld [vmem:[%s1106_s25 + $0x10] sm:$0xff]  }
  0x12   : > { %v1016_v5 = vld [vmem:[%s1106_s25 + $0x40] sm:$0xff]   ;;  %947 = vmatprep.mubr.msk.bf16.mxu0 %vm431_vm0, %v1015_v4  ;;  %v1018_v7 = vld [vmem:[%s1106_s25 + $0x48] sm:$0xff]   ;;  %v1020_v9 = vld [vmem:[%s1106_s25 + $0x50] sm:$0xff]  }
  0x13   : > { %963 = vmatprep.mubr.msk.bf16.mxu1 %vm431_vm0, %v1016_v5  ;;  %v1021_v10 = vld [vmem:[%s1106_s25 + $0x18] sm:$0xff]   ;;  %v1023_v12 = vld [vmem:[%s1106_s25 + $0x20] sm:$0xff]   ;;  %v1025_v14 = vld [vmem:[%s1106_s25 + $0x28] sm:$0xff]  }
  0x14   : > { %946 = vmatpush3.bf16.msra.mxu0 %v1014_v3  ;;  %986 = vmatpush3.bf16.msra.mxu1 %v1014_v3  ;;  %v1022_v11 = vld [vmem:[%s1106_s25 + $0x58] sm:$0xff]   ;;  %v1024_v13 = vld [vmem:[%s1106_s25 + $0x60] sm:$0xff]   ;;  %v1026_v15 = vld [vmem:[%s1106_s25 + $0x68] sm:$0xff]  }
  0x15   : > { %v1027_v16 = vld [vmem:[%s1106_s25 + $0x30] sm:$0xff]   ;;  %v1029_v18 = vld [vmem:[%s1106_s25 + $0x38] sm:$0xff]  }
  0x16   : > { %v1028_v17 = vld [vmem:[%s1106_s25 + $0x70] sm:$0xff]   ;;  %v1030_v19 = vld [vmem:[%s1106_s25 + $0x78] sm:$0xff]  }
  0x17   : > { %948 = vmatmul.mubr.msk.bf16.vlgmr.msra.gmra.mrb[0].mxu0 %vm431_vm0, %v1017_v6  ;;  %964 = vmatmul.mubr.msk.bf16.vlgmr.msra.gmra.mrb[0].mxu1 %vm431_vm0, %v1018_v7 }
  0x18   : > { %951 = vmatprep.mubr.msk.bf16.mxu0 %vm431_vm0, %v1019_v8  ;;  %967 = vmatprep.mubr.msk.bf16.mxu1 %vm431_vm0, %v1020_v9 }
  0x1f   : > { %952 = vmatmul.mubr.msk.bf16.gmra.mrb[4].mxu0 %vm431_vm0, %v1021_v10  ;;  %968 = vmatmul.mubr.msk.bf16.gmra.mrb[4].mxu1 %vm431_vm0, %v1022_v11 }
  0x20   : > { %955 = vmatprep.mubr.msk.bf16.mxu0 %vm431_vm0, %v1023_v12  ;;  %971 = vmatprep.mubr.msk.bf16.mxu1 %vm431_vm0, %v1024_v13 }
  0x27   : > { %956 = vmatmul.mubr.msk.bf16.gmra.mrb[8].mxu0 %vm431_vm0, %v1025_v14  ;;  %972 = vmatmul.mubr.msk.bf16.gmra.mrb[8].mxu1 %vm431_vm0, %v1026_v15 }
  0x28   : > { %959 = vmatprep.mubr.msk.bf16.mxu0 %vm431_vm0, %v1027_v16  ;;  %975 = vmatprep.mubr.msk.bf16.mxu1 %vm431_vm0, %v1028_v17 }
  0x2f   : > { %960 = vmatmul.mubr.msk.bf16.gmra.mrb[12].mxu0 %vm431_vm0, %v1029_v18  ;;  %976 = vmatmul.mubr.msk.bf16.gmra.mrb[12].mxu1 %vm431_vm0, %v1030_v19 }
  0xea   : > { %v949_v20 = vpop.f32.mrb[0].mxu0  ;;  %v965_v21 = vpop.f32.mrb[0].mxu1 }
  0xeb   : > { %742 = vst [vmem:[%s1144_s29 + $0x10] sm:$0xff] %v949_v20  ;;  %758 = vst [vmem:[%s1144_s29 + $0x90] sm:$0xff] %v965_v21  ;;  %v514_v22 = vpop.f32.mrb[1].mxu0  ;;  %v578_v23 = vpop.f32.mrb[1].mxu1 }
  0xec   : > { %740 = vst [vmem:[%s1144_s29] sm:$0xff] %v514_v22  ;;  %756 = vst [vmem:[%s1144_s29 + $0x80] sm:$0xff] %v578_v23  ;;  %v950_v24 = vpop.f32.mrb[2].mxu0  ;;  %v966_v25 = vpop.f32.mrb[2].mxu1 }
  0xed   : > { %743 = vst [vmem:[%s1144_s29 + $0x18] sm:$0xff] %v950_v24  ;;  %759 = vst [vmem:[%s1144_s29 + $0x98] sm:$0xff] %v966_v25  ;;  %v517_v26 = vpop.f32.mrb[3].mxu0  ;;  %v581_v27 = vpop.f32.mrb[3].mxu1 }
  0xee   : > { %741 = vst [vmem:[%s1144_s29 + $0x8] sm:$0xff] %v517_v26  ;;  %757 = vst [vmem:[%s1144_s29 + $0x88] sm:$0xff] %v581_v27 }
  0xf2   : > { %v953_v28 = vpop.f32.mrb[4].mxu0  ;;  %v969_v29 = vpop.f32.mrb[4].mxu1 }
  0xf3   : > { %746 = vst [vmem:[%s1144_s29 + $0x30] sm:$0xff] %v953_v28  ;;  %762 = vst [vmem:[%s1144_s29 + $0xb0] sm:$0xff] %v969_v29  ;;  %v530_v30 = vpop.f32.mrb[5].mxu0  ;;  %v594_v31 = vpop.f32.mrb[5].mxu1 }
  0xf4   : > { %744 = vst [vmem:[%s1144_s29 + $0x20] sm:$0xff] %v530_v30  ;;  %760 = vst [vmem:[%s1144_s29 + $0xa0] sm:$0xff] %v594_v31  ;;  %v954_v32 = vpop.f32.mrb[6].mxu0  ;;  %v970_v33 = vpop.f32.mrb[6].mxu1 }
  0xf5   : > { %747 = vst [vmem:[%s1144_s29 + $0x38] sm:$0xff] %v954_v32  ;;  %763 = vst [vmem:[%s1144_s29 + $0xb8] sm:$0xff] %v970_v33  ;;  %v533_v34 = vpop.f32.mrb[7].mxu0  ;;  %v597_v35 = vpop.f32.mrb[7].mxu1 }
  0xf6   : > { %745 = vst [vmem:[%s1144_s29 + $0x28] sm:$0xff] %v533_v34  ;;  %761 = vst [vmem:[%s1144_s29 + $0xa8] sm:$0xff] %v597_v35 }
  0xfa   : > { %v957_v36 = vpop.f32.mrb[8].mxu0  ;;  %v973_v37 = vpop.f32.mrb[8].mxu1 }
  0xfb   : > { %750 = vst [vmem:[%s1144_s29 + $0x50] sm:$0xff] %v957_v36  ;;  %766 = vst [vmem:[%s1144_s29 + $0xd0] sm:$0xff] %v973_v37  ;;  %v546_v38 = vpop.f32.mrb[9].mxu0  ;;  %v610_v39 = vpop.f32.mrb[9].mxu1 }
  0xfc   : > { %748 = vst [vmem:[%s1144_s29 + $0x40] sm:$0xff] %v546_v38  ;;  %764 = vst [vmem:[%s1144_s29 + $0xc0] sm:$0xff] %v610_v39  ;;  %v958_v40 = vpop.f32.mrb[10].mxu0  ;;  %v974_v41 = vpop.f32.mrb[10].mxu1 }
  0xfd   : > { %751 = vst [vmem:[%s1144_s29 + $0x58] sm:$0xff] %v958_v40  ;;  %767 = vst [vmem:[%s1144_s29 + $0xd8] sm:$0xff] %v974_v41  ;;  %v549_v42 = vpop.f32.mrb[11].mxu0  ;;  %v613_v43 = vpop.f32.mrb[11].mxu1 }
  0xfe   : > { %749 = vst [vmem:[%s1144_s29 + $0x48] sm:$0xff] %v549_v42  ;;  %765 = vst [vmem:[%s1144_s29 + $0xc8] sm:$0xff] %v613_v43 }
 0x102   : > { %v961_v44 = vpop.f32.mrb[12].mxu0  ;;  %v977_v45 = vpop.f32.mrb[12].mxu1 }
 0x103   : > { %754 = vst [vmem:[%s1144_s29 + $0x70] sm:$0xff] %v961_v44  ;;  %770 = vst [vmem:[%s1144_s29 + $0xf0] sm:$0xff] %v977_v45  ;;  %v562_v46 = vpop.f32.mrb[13].mxu0  ;;  %v626_v47 = vpop.f32.mrb[13].mxu1 }
 0x104   : > { %752 = vst [vmem:[%s1144_s29 + $0x60] sm:$0xff] %v562_v46  ;;  %768 = vst [vmem:[%s1144_s29 + $0xe0] sm:$0xff] %v626_v47  ;;  %v962_v48 = vpop.f32.mrb[14].mxu0  ;;  %v978_v49 = vpop.f32.mrb[14].mxu1 }
 0x105   : > { %755 = vst [vmem:[%s1144_s29 + $0x78] sm:$0xff] %v962_v48  ;;  %771 = vst [vmem:[%s1144_s29 + $0xf8] sm:$0xff] %v978_v49  ;;  %v565_v50 = vpop.f32.mrb[15].mxu0  ;;  %v629_v51 = vpop.f32.mrb[15].mxu1 }
 0x106   : > { %753 = vst [vmem:[%s1144_s29 + $0x68] sm:$0xff] %v565_v50  ;;  %769 = vst [vmem:[%s1144_s29 + $0xe8] sm:$0xff] %v629_v51 }
 0x107 PF: > { %s12_s11 = sadd.s32 1, %s1053_s11   ;;  %s1190_s9 = smov %s1049_s10 }
 0x108   : > { %p9_p5 = scmp.ge.s32.totalorder %s12_s11, 5   ;;  %s1191_s10 = smov %s1193_s12 }
 0x10a   :  { %11 = sbr.rel (!%p9_p5) target bundleno = 2 (0x2), region = 69 }

// kernel: netG_forward.21
= control target key start
LH: loop header
LB: loop body
LE: loop exit
PB: predicated region body
PF: predicated region fallthrough
CT: control target
= control target key end

     0   :  { %s614_s9 = smov 0   ;;  %s1132_s0 = inlined_call_operand.vmem [shape: f32[2048,8], index: 0, kind: input, shape index: {}]   ;;  %s1133_s1 = inlined_call_operand.vmem [shape: f32[1,8], index: 1, kind: output, shape index: {0}]   ;;  %s1134_s2 = inlined_call_operand.vmem [shape: f32[1,8], index: 2, kind: output, shape index: {1}]  }
   0x1 LB: > { %s572_s10 = sadd.s32 4294967295, %s596_s9   ;;  %p575_p0 = scmp.ge.s32.totalorder %s596_s9, 1  ;;  %s596_s9 = sphi %s614_s9, %s13_s9  }
   0x2   : > { %p106_p1 = scmp.lt.s32.totalorder %s596_s9, 5 }
   0x4   : > { %p107_p2 = pnand %p575_p0, %p106_p1 }
   0x5   : > { %s576_s11 = sshll.u32 (!%p107_p2), %s572_s10, 6  ;;  %p578_p4 = scmp.ne.s32.totalorder (!%p107_p2), %s572_s10, 0 }
   0x6   : > { %110 = sbr.rel (%p107_p2) target bundleno = 184 (0xb8), region = 24  ;;  %p124_p3 = scmp.lt.s32.totalorder (!%p107_p2), %s576_s11, 255 }
   0xd   : > { %s1136_s11 = smov (!%p124_p3, %s576_s11), 255  ;;  %132 = sbr.rel (%p578_p4) target bundleno = 20 (0x14), region = 28 }
   0xe   : > { %s577_s12 = sshll.u32 %s1136_s11, 3  ;;  %vm133_vm0 = vcmask (!%p578_p4), 57344   ;;  %v598_v0 = vmov (!%p578_p4), 0.0  }
   0xf   : > { %s625_s15 = scalar_lea.vmem %s1132_s0, %s577_s12  ;;  %134 = vst.msk [vmem:[%s1133_s1] sm:$0x1] (!%p578_p4), %vm133_vm0, %v598_v0  ;;  %135 = vst.msk [vmem:[%s1134_s2] sm:$0x1] (!%p578_p4), %vm133_vm0, %v598_v0 }
  0x14 PF: > { %v136_v1 = vld [vmem:[%s625_s15] sm:$0xff]  ;;  %v137_v2 = vld [vmem:[%s625_s15 + $0x8] sm:$0xff]  ;;  %v138_v3 = vld [vmem:[%s625_s15 + $0x10] sm:$0xff]  ;;  %vm201_vm1 = vcmask 64512   ;;  %vm336_vm2 = vcmask 57344  }
  0x15   : > { %v202_v4 = vsel %vm201_vm1, %v136_v1, 0.0  ;;  %v203_v5 = vsel %vm201_vm1, %v137_v2, 0.0  ;;  %v205_v6 = vsel %vm201_vm1, %v138_v3, 0.0  ;;  %v139_v7 = vld [vmem:[%s625_s15 + $0x18] sm:$0xff]  ;;  %v140_v10 = vld [vmem:[%s625_s15 + $0x20] sm:$0xff]  ;;  %v141_v13 = vld [vmem:[%s625_s15 + $0x28] sm:$0xff]  ;;  %v339_v55 = vmul.f32 %v136_v1, %v136_v1 }
  0x16   : > { %v204_v8 = vadd.f32 %v203_v5, %v202_v4  ;;  %v207_v9 = vsel %vm201_vm1, %v139_v7, 0.0  ;;  %v209_v12 = vsel %vm201_vm1, %v140_v10, 0.0  ;;  %v211_v15 = vsel %vm201_vm1, %v141_v13, 0.0  ;;  %v646_v16 = vld [vmem:[%s625_s15 + $0x30] sm:$0xff]  ;;  %v651_v19 = vld [vmem:[%s625_s15 + $0x38] sm:$0xff]  ;;  %v656_v22 = vld [vmem:[%s625_s15 + $0x40] sm:$0xff] }
  0x17   : > { %v213_v18 = vsel %vm201_vm1, %v646_v16, 0.0  ;;  %v215_v21 = vsel %vm201_vm1, %v651_v19, 0.0  ;;  %v217_v24 = vsel %vm201_vm1, %v656_v22, 0.0  ;;  %v661_v25 = vld [vmem:[%s625_s15 + $0x48] sm:$0xff]  ;;  %v666_v28 = vld [vmem:[%s625_s15 + $0x50] sm:$0xff]  ;;  %v671_v31 = vld [vmem:[%s625_s15 + $0x58] sm:$0xff]  ;;  %v340_v58 = vmul.f32 %v137_v2, %v137_v2 }
  0x18   : > { %v206_v11 = vadd.f32 %v205_v6, %v204_v8  ;;  %v219_v27 = vsel %vm201_vm1, %v661_v25, 0.0  ;;  %v221_v30 = vsel %vm201_vm1, %v666_v28, 0.0  ;;  %v223_v33 = vsel %vm201_vm1, %v671_v31, 0.0  ;;  %v676_v34 = vld [vmem:[%s625_s15 + $0x60] sm:$0xff]  ;;  %v681_v37 = vld [vmem:[%s625_s15 + $0x68] sm:$0xff]  ;;  %v686_v40 = vld [vmem:[%s625_s15 + $0x70] sm:$0xff] }
  0x19   : > { %v225_v36 = vsel %vm201_vm1, %v676_v34, 0.0  ;;  %v227_v39 = vsel %vm201_vm1, %v681_v37, 0.0  ;;  %v229_v42 = vsel %vm201_vm1, %v686_v40, 0.0  ;;  %v691_v43 = vld [vmem:[%s625_s15 + $0x78] sm:$0xff]  ;;  %v696_v46 = vld [vmem:[%s625_s15 + $0x80] sm:$0xff]  ;;  %v701_v49 = vld [vmem:[%s625_s15 + $0x88] sm:$0xff]  ;;  %v341_v59 = vmul.f32 %v138_v3, %v138_v3 }
  0x1a   : > { %v208_v14 = vadd.f32 %v207_v9, %v206_v11  ;;  %v231_v45 = vsel %vm201_vm1, %v691_v43, 0.0  ;;  %v233_v48 = vsel %vm201_vm1, %v696_v46, 0.0  ;;  %v235_v51 = vsel %vm201_vm1, %v701_v49, 0.0  ;;  %v706_v52 = vld [vmem:[%s625_s15 + $0x90] sm:$0xff]  ;;  %v711_v56 = vld [vmem:[%s625_s15 + $0x98] sm:$0xff]  ;;  %v716_v61 = vld [vmem:[%s625_s15 + $0xa0] sm:$0xff] }
  0x1b   : > { %v237_v54 = vsel %vm201_vm1, %v706_v52, 0.0  ;;  %v239_v60 = vsel %vm201_vm1, %v711_v56, 0.0  ;;  %v342_v63 = vmul.f32 %v139_v7, %v139_v7  ;;  %v241_v0 = vsel %vm201_vm1, %v716_v61, 0.0  ;;  %v722_v1 = vld [vmem:[%s625_s15 + $0xa8] sm:$0xff]  ;;  %v729_v7 = vld [vmem:[%s625_s15 + $0xb0] sm:$0xff] }
  0x1c   : > { %v210_v17 = vadd.f32 %v209_v12, %v208_v14  ;;  %v403_v4 = vsel %vm201_vm1, %v339_v55, 0.0  ;;  %v343_v6 = vmul.f32 %v140_v10, %v140_v10  ;;  %v404_v2 = vsel %vm201_vm1, %v340_v58, 0.0 }
  0x1d   : > { %v406_v3 = vsel %vm201_vm1, %v341_v59, 0.0  ;;  %v243_v8 = vsel %vm201_vm1, %v722_v1, 0.0  ;;  %v405_v9 = vadd.f32 %v404_v2, %v403_v4  ;;  %v344_v12 = vmul.f32 %v141_v13, %v141_v13 }
  0x1e   : > { %v212_v20 = vadd.f32 %v211_v15, %v210_v17  ;;  %v408_v14 = vsel %vm201_vm1, %v342_v63, 0.0  ;;  %v245_v15 = vsel %vm201_vm1, %v729_v7, 0.0  ;;  %v735_v17 = vld [vmem:[%s625_s15 + $0xb8] sm:$0xff]  ;;  %v351_v63 = vmul.f32 %v676_v34, %v676_v34 }
  0x1f   : > { %v407_v10 = vadd.f32 %v406_v3, %v405_v9  ;;  %v352_v2 = vmul.f32 %v681_v37, %v681_v37  ;;  %v799_v9 = vld [vmem:[%s625_s15 + $0xf8] sm:$0xff] }
  0x20   : > { %v214_v23 = vadd.f32 %v213_v18, %v212_v20  ;;  %v345_v20 = vmul.f32 %v646_v16, %v646_v16 }
  0x21   : > { %v409_v13 = vadd.f32 %v408_v14, %v407_v10  ;;  %v426_v14 = vsel %vm201_vm1, %v351_v63, 0.0  ;;  %v807_v10 = vld [vmem:[%s625_s15 + $0x100] sm:$0xff]  ;;  %v360_v63 = vmul.f32 %v722_v1, %v722_v1 }
  0x22   : > { %v216_v26 = vadd.f32 %v215_v21, %v214_v23  ;;  %v410_v21 = vsel %vm201_vm1, %v343_v6, 0.0  ;;  %v247_v23 = vsel %vm201_vm1, %v735_v17, 0.0 }
  0x23   : > { %v411_v16 = vadd.f32 %v410_v21, %v409_v13  ;;  %v428_v21 = vsel %vm201_vm1, %v352_v2, 0.0  ;;  %v815_v13 = vld [vmem:[%s625_s15 + $0x108] sm:$0xff]  ;;  %v361_v2 = vmul.f32 %v729_v7, %v729_v7 }
  0x24   : > { %v218_v29 = vadd.f32 %v217_v24, %v216_v26  ;;  %v743_v24 = vld [vmem:[%s625_s15 + $0xc0] sm:$0xff] }
  0x26   : > { %v220_v32 = vadd.f32 %v219_v27, %v218_v29  ;;  %v346_v27 = vmul.f32 %v651_v19, %v651_v19  ;;  %v412_v29 = vsel %vm201_vm1, %v344_v12, 0.0  ;;  %v353_v12 = vmul.f32 %v686_v40, %v686_v40 }
  0x27   : > { %v413_v19 = vadd.f32 %v412_v29, %v411_v16  ;;  %v823_v16 = vld [vmem:[%s625_s15 + $0x110] sm:$0xff] }
  0x28   : > { %v222_v35 = vadd.f32 %v221_v30, %v220_v32  ;;  %v249_v30 = vsel %vm201_vm1, %v743_v24, 0.0  ;;  %v751_v32 = vld [vmem:[%s625_s15 + $0xc8] sm:$0xff]  ;;  %v430_v29 = vsel %vm201_vm1, %v353_v12, 0.0  ;;  %v362_v12 = vmul.f32 %v735_v17, %v735_v17 }
  0x2a   : > { %v224_v38 = vadd.f32 %v223_v33, %v222_v35  ;;  %v347_v35 = vmul.f32 %v656_v22, %v656_v22 }
  0x2c   : > { %v226_v41 = vadd.f32 %v225_v36, %v224_v38  ;;  %v414_v36 = vsel %vm201_vm1, %v345_v20, 0.0  ;;  %v251_v38 = vsel %vm201_vm1, %v751_v32, 0.0  ;;  %v354_v20 = vmul.f32 %v691_v43, %v691_v43 }
  0x2d   : > { %v415_v22 = vadd.f32 %v414_v36, %v413_v19  ;;  %v831_v19 = vld [vmem:[%s625_s15 + $0x118] sm:$0xff] }
  0x2e   : > { %v228_v44 = vadd.f32 %v227_v39, %v226_v41  ;;  %v759_v39 = vld [vmem:[%s625_s15 + $0xd0] sm:$0xff]  ;;  %v432_v36 = vsel %vm201_vm1, %v354_v20, 0.0  ;;  %v363_v20 = vmul.f32 %v743_v24, %v743_v24 }
  0x30   : > { %v230_v47 = vadd.f32 %v229_v42, %v228_v44  ;;  %v348_v42 = vmul.f32 %v661_v25, %v661_v25  ;;  %v416_v44 = vsel %vm201_vm1, %v346_v27, 0.0  ;;  %v355_v27 = vmul.f32 %v696_v46, %v696_v46 }
  0x31   : > { %v417_v25 = vadd.f32 %v416_v44, %v415_v22  ;;  %v839_v22 = vld [vmem:[%s625_s15 + $0x120] sm:$0xff] }
  0x32   : > { %v232_v50 = vadd.f32 %v231_v45, %v230_v47  ;;  %v253_v45 = vsel %vm201_vm1, %v759_v39, 0.0  ;;  %v767_v47 = vld [vmem:[%s625_s15 + $0xd8] sm:$0xff]  ;;  %v420_v58 = vsel %vm201_vm1, %v348_v42, 0.0  ;;  %v357_v42 = vmul.f32 %v706_v52, %v706_v52 }
  0x33   : > { %v434_v44 = vsel %vm201_vm1, %v355_v27, 0.0  ;;  %v364_v27 = vmul.f32 %v751_v32, %v751_v32 }
  0x34   : > { %v234_v53 = vadd.f32 %v233_v48, %v232_v50  ;;  %v349_v50 = vmul.f32 %v666_v28, %v666_v28 }
  0x36   : > { %v236_v57 = vadd.f32 %v235_v51, %v234_v53  ;;  %v418_v51 = vsel %vm201_vm1, %v347_v35, 0.0  ;;  %v255_v53 = vsel %vm201_vm1, %v767_v47, 0.0  ;;  %v356_v35 = vmul.f32 %v701_v49, %v701_v49 }
  0x37   : > { %v419_v28 = vadd.f32 %v418_v51, %v417_v25  ;;  %v847_v25 = vld [vmem:[%s625_s15 + $0x128] sm:$0xff] }
  0x38   : > { %v238_v62 = vadd.f32 %v237_v54, %v236_v57  ;;  %v775_v54 = vld [vmem:[%s625_s15 + $0xe0] sm:$0xff]  ;;  %v350_v57 = vmul.f32 %v671_v31, %v671_v31  ;;  %v436_v51 = vsel %vm201_vm1, %v356_v35, 0.0  ;;  %v365_v35 = vmul.f32 %v759_v39, %v759_v39 }
  0x39   : > { %v257_v59 = vsel %vm201_vm1, %v775_v54, 0.0  ;;  %v421_v31 = vadd.f32 %v420_v58, %v419_v28  ;;  %v438_v58 = vsel %vm201_vm1, %v357_v42, 0.0  ;;  %v855_v28 = vld [vmem:[%s625_s15 + $0x130] sm:$0xff]  ;;  %v366_v42 = vmul.f32 %v767_v47, %v767_v47 }
  0x3a   : > { %v240_v5 = vadd.f32 %v239_v60, %v238_v62  ;;  %v783_v60 = vld [vmem:[%s625_s15 + $0xe8] sm:$0xff]  ;;  %v424_v3 = vsel %vm201_vm1, %v350_v57, 0.0  ;;  %v359_v57 = vmul.f32 %v716_v61, %v716_v61 }
  0x3b   : > { %v259_v4 = vsel %vm201_vm1, %v783_v60, 0.0 }
  0x3c   : > { %v242_v11 = vadd.f32 %v241_v0, %v240_v5  ;;  %v422_v0 = vsel %vm201_vm1, %v349_v50, 0.0  ;;  %v791_v5 = vld [vmem:[%s625_s15 + $0xf0] sm:$0xff]  ;;  %v358_v50 = vmul.f32 %v711_v56, %v711_v56 }
  0x3d   : > { %v423_v34 = vadd.f32 %v422_v0, %v421_v31  ;;  %v863_v31 = vld [vmem:[%s625_s15 + $0x138] sm:$0xff] }
  0x3e   : > { %v244_v18 = vadd.f32 %v243_v8, %v242_v11  ;;  %v261_v8 = vsel %vm201_vm1, %v791_v5, 0.0  ;;  %v440_v0 = vsel %vm201_vm1, %v358_v50, 0.0  ;;  %v367_v50 = vmul.f32 %v775_v54, %v775_v54 }
  0x3f   : > { %v425_v37 = vadd.f32 %v424_v3, %v423_v34  ;;  %v442_v3 = vsel %vm201_vm1, %v359_v57, 0.0  ;;  %v871_v34 = vld [vmem:[%s625_s15 + $0x140] sm:$0xff]  ;;  %v368_v57 = vmul.f32 %v783_v60, %v783_v60 }
  0x40   : > { %v246_v26 = vadd.f32 %v245_v15, %v244_v18  ;;  %v263_v15 = vsel %vm201_vm1, %v799_v9, 0.0 }
  0x41   : > { %v427_v40 = vadd.f32 %v426_v14, %v425_v37  ;;  %v444_v14 = vsel %vm201_vm1, %v360_v63, 0.0  ;;  %v879_v37 = vld [vmem:[%s625_s15 + $0x148] sm:$0xff]  ;;  %v369_v63 = vmul.f32 %v791_v5, %v791_v5 }
  0x42   : > { %v248_v33 = vadd.f32 %v247_v23, %v246_v26  ;;  %v265_v23 = vsel %vm201_vm1, %v807_v10, 0.0 }
  0x43   : > { %v429_v43 = vadd.f32 %v428_v21, %v427_v40  ;;  %v446_v21 = vsel %vm201_vm1, %v361_v2, 0.0  ;;  %v887_v40 = vld [vmem:[%s625_s15 + $0x150] sm:$0xff]  ;;  %v370_v2 = vmul.f32 %v799_v9, %v799_v9 }
  0x44   : > { %v250_v41 = vadd.f32 %v249_v30, %v248_v33  ;;  %v267_v30 = vsel %vm201_vm1, %v815_v13, 0.0 }
  0x45   : > { %v431_v46 = vadd.f32 %v430_v29, %v429_v43  ;;  %v448_v29 = vsel %vm201_vm1, %v362_v12, 0.0  ;;  %v895_v43 = vld [vmem:[%s625_s15 + $0x158] sm:$0xff]  ;;  %v371_v12 = vmul.f32 %v807_v10, %v807_v10 }
  0x46   : > { %v252_v48 = vadd.f32 %v251_v38, %v250_v41  ;;  %v269_v38 = vsel %vm201_vm1, %v823_v16, 0.0 }
  0x47   : > { %v433_v49 = vadd.f32 %v432_v36, %v431_v46  ;;  %v450_v36 = vsel %vm201_vm1, %v363_v20, 0.0  ;;  %v903_v46 = vld [vmem:[%s625_s15 + $0x160] sm:$0xff]  ;;  %v372_v20 = vmul.f32 %v815_v13, %v815_v13 }
  0x48   : > { %v254_v55 = vadd.f32 %v253_v45, %v252_v48  ;;  %v271_v45 = vsel %vm201_vm1, %v831_v19, 0.0 }
  0x49   : > { %v435_v52 = vadd.f32 %v434_v44, %v433_v49  ;;  %v452_v44 = vsel %vm201_vm1, %v364_v27, 0.0  ;;  %v911_v49 = vld [vmem:[%s625_s15 + $0x168] sm:$0xff]  ;;  %v373_v27 = vmul.f32 %v823_v16, %v823_v16 }
  0x4a   : > { %v256_v62 = vadd.f32 %v255_v53, %v254_v55  ;;  %v273_v53 = vsel %vm201_vm1, %v839_v22, 0.0 }
  0x4b   : > { %v437_v56 = vadd.f32 %v436_v51, %v435_v52  ;;  %v454_v51 = vsel %vm201_vm1, %v365_v35, 0.0  ;;  %v919_v52 = vld [vmem:[%s625_s15 + $0x170] sm:$0xff]  ;;  %v374_v35 = vmul.f32 %v831_v19, %v831_v19 }
  0x4c   : > { %v258_v6 = vadd.f32 %v257_v59, %v256_v62  ;;  %v275_v59 = vsel %vm201_vm1, %v847_v25, 0.0 }
  0x4d   : > { %v439_v61 = vadd.f32 %v438_v58, %v437_v56  ;;  %v456_v58 = vsel %vm201_vm1, %v366_v42, 0.0  ;;  %v927_v56 = vld [vmem:[%s625_s15 + $0x178] sm:$0xff]  ;;  %v375_v42 = vmul.f32 %v839_v22, %v839_v22 }
  0x4e   : > { %v260_v11 = vadd.f32 %v259_v4, %v258_v6  ;;  %v277_v4 = vsel %vm201_vm1, %v855_v28, 0.0 }
  0x4f   : > { %v441_v1 = vadd.f32 %v440_v0, %v439_v61  ;;  %v458_v0 = vsel %vm201_vm1, %v367_v50, 0.0  ;;  %v935_v61 = vld [vmem:[%s625_s15 + $0x180] sm:$0xff]  ;;  %v376_v50 = vmul.f32 %v847_v25, %v847_v25 }
  0x50   : > { %v262_v18 = vadd.f32 %v261_v8, %v260_v11  ;;  %v279_v8 = vsel %vm201_vm1, %v863_v31, 0.0 }
  0x51   : > { %v443_v7 = vadd.f32 %v442_v3, %v441_v1  ;;  %v460_v3 = vsel %vm201_vm1, %v368_v57, 0.0  ;;  %v943_v1 = vld [vmem:[%s625_s15 + $0x188] sm:$0xff]  ;;  %v377_v57 = vmul.f32 %v855_v28, %v855_v28 }
  0x52   : > { %v264_v26 = vadd.f32 %v263_v15, %v262_v18  ;;  %v281_v15 = vsel %vm201_vm1, %v871_v34, 0.0 }
  0x53   : > { %v445_v17 = vadd.f32 %v444_v14, %v443_v7  ;;  %v462_v14 = vsel %vm201_vm1, %v369_v63, 0.0  ;;  %v951_v7 = vld [vmem:[%s625_s15 + $0x190] sm:$0xff]  ;;  %v378_v63 = vmul.f32 %v863_v31, %v863_v31 }
  0x54   : > { %v266_v33 = vadd.f32 %v265_v23, %v264_v26  ;;  %v283_v23 = vsel %vm201_vm1, %v879_v37, 0.0 }
  0x55   : > { %v447_v24 = vadd.f32 %v446_v21, %v445_v17  ;;  %v464_v21 = vsel %vm201_vm1, %v370_v2, 0.0  ;;  %v959_v17 = vld [vmem:[%s625_s15 + $0x198] sm:$0xff]  ;;  %v379_v2 = vmul.f32 %v871_v34, %v871_v34 }
  0x56   : > { %v268_v41 = vadd.f32 %v267_v30, %v266_v33  ;;  %v285_v30 = vsel %vm201_vm1, %v887_v40, 0.0 }
  0x57   : > { %v449_v32 = vadd.f32 %v448_v29, %v447_v24  ;;  %v466_v29 = vsel %vm201_vm1, %v371_v12, 0.0  ;;  %v967_v24 = vld [vmem:[%s625_s15 + $0x1a0] sm:$0xff]  ;;  %v380_v12 = vmul.f32 %v879_v37, %v879_v37 }
  0x58   : > { %v270_v48 = vadd.f32 %v269_v38, %v268_v41  ;;  %v287_v38 = vsel %vm201_vm1, %v895_v43, 0.0 }
  0x59   : > { %v451_v39 = vadd.f32 %v450_v36, %v449_v32  ;;  %v468_v36 = vsel %vm201_vm1, %v372_v20, 0.0  ;;  %v975_v32 = vld [vmem:[%s625_s15 + $0x1a8] sm:$0xff]  ;;  %v381_v20 = vmul.f32 %v887_v40, %v887_v40 }
  0x5a   : > { %v272_v55 = vadd.f32 %v271_v45, %v270_v48  ;;  %v289_v45 = vsel %vm201_vm1, %v903_v46, 0.0 }
  0x5b   : > { %v453_v47 = vadd.f32 %v452_v44, %v451_v39  ;;  %v470_v44 = vsel %vm201_vm1, %v373_v27, 0.0  ;;  %v983_v39 = vld [vmem:[%s625_s15 + $0x1b0] sm:$0xff]  ;;  %v382_v27 = vmul.f32 %v895_v43, %v895_v43 }
  0x5c   : > { %v274_v62 = vadd.f32 %v273_v53, %v272_v55  ;;  %v291_v53 = vsel %vm201_vm1, %v911_v49, 0.0  ;;  %v1047_v43 = vld [vmem:[%s625_s15 + $0x1f0] sm:$0xff] }
  0x5d   : > { %v455_v54 = vadd.f32 %v454_v51, %v453_v47  ;;  %v472_v51 = vsel %vm201_vm1, %v374_v35, 0.0  ;;  %v991_v47 = vld [vmem:[%s625_s15 + $0x1b8] sm:$0xff]  ;;  %v383_v35 = vmul.f32 %v903_v46, %v903_v46 }
  0x5e   : > { %v276_v6 = vadd.f32 %v275_v59, %v274_v62  ;;  %v293_v59 = vsel %vm201_vm1, %v919_v52, 0.0 }
  0x5f   : > { %v457_v60 = vadd.f32 %v456_v58, %v455_v54  ;;  %v474_v58 = vsel %vm201_vm1, %v375_v42, 0.0  ;;  %v999_v54 = vld [vmem:[%s625_s15 + $0x1c0] sm:$0xff]  ;;  %v384_v42 = vmul.f32 %v911_v49, %v911_v49  ;;  %v386_v49 = vmul.f32 %v927_v56, %v927_v56 }
  0x60   : > { %v278_v11 = vadd.f32 %v277_v4, %v276_v6  ;;  %v295_v4 = vsel %vm201_vm1, %v927_v56, 0.0  ;;  %v389_v56 = vmul.f32 %v951_v7, %v951_v7 }
  0x61   : > { %v459_v5 = vadd.f32 %v458_v0, %v457_v60  ;;  %v476_v0 = vsel %vm201_vm1, %v376_v50, 0.0  ;;  %v1007_v60 = vld [vmem:[%s625_s15 + $0x1c8] sm:$0xff]  ;;  %v385_v50 = vmul.f32 %v919_v52, %v919_v52 }
  0x62   : > { %v280_v18 = vadd.f32 %v279_v8, %v278_v11  ;;  %v297_v8 = vsel %vm201_vm1, %v935_v61, 0.0 }
  0x63   : > { %v461_v9 = vadd.f32 %v460_v3, %v459_v5  ;;  %v478_v3 = vsel %vm201_vm1, %v377_v57, 0.0  ;;  %v1015_v5 = vld [vmem:[%s625_s15 + $0x1d0] sm:$0xff]  ;;  %v492_v57 = vsel %vm201_vm1, %v384_v42, 0.0 }
  0x64   : > { %v282_v26 = vadd.f32 %v281_v15, %v280_v18  ;;  %v299_v15 = vsel %vm201_vm1, %v943_v1, 0.0 }
  0x65   : > { %v463_v10 = vadd.f32 %v462_v14, %v461_v9  ;;  %v480_v14 = vsel %vm201_vm1, %v378_v63, 0.0  ;;  %v1023_v9 = vld [vmem:[%s625_s15 + $0x1d8] sm:$0xff] }
  0x66   : > { %v284_v33 = vadd.f32 %v283_v23, %v282_v26  ;;  %v301_v23 = vsel %vm201_vm1, %v951_v7, 0.0  ;;  %v392_v7 = vmul.f32 %v975_v32, %v975_v32 }
  0x67   : > { %v465_v13 = vadd.f32 %v464_v21, %v463_v10  ;;  %v482_v21 = vsel %vm201_vm1, %v379_v2, 0.0  ;;  %v1031_v10 = vld [vmem:[%s625_s15 + $0x1e0] sm:$0xff] }
  0x68   : > { %v286_v41 = vadd.f32 %v285_v30, %v284_v33  ;;  %v303_v30 = vsel %vm201_vm1, %v959_v17, 0.0 }
  0x69   : > { %v467_v16 = vadd.f32 %v466_v29, %v465_v13  ;;  %v484_v29 = vsel %vm201_vm1, %v380_v12, 0.0  ;;  %v1039_v13 = vld [vmem:[%s625_s15 + $0x1e8] sm:$0xff] }
  0x6a   : > { %v288_v48 = vadd.f32 %v287_v38, %v286_v41  ;;  %v305_v38 = vsel %vm201_vm1, %v967_v24, 0.0 }
  0x6b   : > { %v469_v19 = vadd.f32 %v468_v36, %v467_v16  ;;  %v486_v36 = vsel %vm201_vm1, %v381_v20, 0.0 }
  0x6c   : > { %v290_v55 = vadd.f32 %v289_v45, %v288_v48  ;;  %v307_v45 = vsel %vm201_vm1, %v975_v32, 0.0  ;;  %v508_v32 = vsel %vm201_vm1, %v392_v7, 0.0 }
  0x6d   : > { %v471_v22 = vadd.f32 %v470_v44, %v469_v19  ;;  %v488_v44 = vsel %vm201_vm1, %v382_v27, 0.0  ;;  %v394_v27 = vmul.f32 %v991_v47, %v991_v47 }
  0x6e   : > { %v292_v62 = vadd.f32 %v291_v53, %v290_v55  ;;  %v309_v53 = vsel %vm201_vm1, %v983_v39, 0.0 }
  0x6f   : > { %v473_v25 = vadd.f32 %v472_v51, %v471_v22  ;;  %v490_v51 = vsel %vm201_vm1, %v383_v35, 0.0  ;;  %v512_v35 = vsel %vm201_vm1, %v394_v27, 0.0 }
  0x70   : > { %v294_v6 = vadd.f32 %v293_v59, %v292_v62  ;;  %v311_v59 = vsel %vm201_vm1, %v991_v47, 0.0 }
  0x71   : > { %v475_v28 = vadd.f32 %v474_v58, %v473_v25  ;;  %v387_v25 = vmul.f32 %v935_v61, %v935_v61  ;;  %v390_v61 = vmul.f32 %v959_v17, %v959_v17  ;;  %v200_v17 = vld [vmem:[%s1133_s1] sm:$0x1] }
  0x72   : > { %v296_v11 = vadd.f32 %v295_v4, %v294_v6  ;;  %v313_v4 = vsel %vm201_vm1, %v999_v54, 0.0 }
  0x73   : > { %v477_v31 = vadd.f32 %v476_v0, %v475_v28  ;;  %v388_v0 = vmul.f32 %v943_v1, %v943_v1  ;;  %v498_v2 = vsel %vm201_vm1, %v387_v25, 0.0  ;;  %v391_v1 = vmul.f32 %v967_v24, %v967_v24 }
  0x74   : > { %v298_v18 = vadd.f32 %v297_v8, %v296_v11  ;;  %v315_v8 = vsel %vm201_vm1, %v1007_v60, 0.0 }
  0x75   : > { %v479_v34 = vadd.f32 %v478_v3, %v477_v31  ;;  %v500_v31 = vsel %vm201_vm1, %v388_v0, 0.0  ;;  %v506_v24 = vsel %vm201_vm1, %v391_v1, 0.0 }
  0x76   : > { %v300_v26 = vadd.f32 %v299_v15, %v298_v18  ;;  %v317_v15 = vsel %vm201_vm1, %v1015_v5, 0.0 }
  0x77   : > { %v481_v37 = vadd.f32 %v480_v14, %v479_v34  ;;  %v502_v14 = vsel %vm201_vm1, %v389_v56, 0.0 }
  0x78   : > { %v302_v33 = vadd.f32 %v301_v23, %v300_v26  ;;  %v319_v23 = vsel %vm201_vm1, %v1023_v9, 0.0 }
  0x79   : > { %v483_v40 = vadd.f32 %v482_v21, %v481_v37 }
  0x7a   : > { %v304_v41 = vadd.f32 %v303_v30, %v302_v33  ;;  %v321_v30 = vsel %vm201_vm1, %v1031_v10, 0.0 }
  0x7b   : > { %v485_v16 = vadd.f32 %v484_v29, %v483_v40 }
  0x7c   : > { %v306_v48 = vadd.f32 %v305_v38, %v304_v41  ;;  %v323_v38 = vsel %vm201_vm1, %v1039_v13, 0.0 }
  0x7d   : > { %v487_v19 = vadd.f32 %v486_v36, %v485_v16  ;;  %v397_v36 = vmul.f32 %v1015_v5, %v1015_v5 }
  0x7e   : > { %v308_v55 = vadd.f32 %v307_v45, %v306_v48  ;;  %v325_v45 = vsel %vm201_vm1, %v1047_v43, 0.0  ;;  %v1055_v48 = vld [vmem:[%s625_s15 + $0x1f8] sm:$0xff] }
  0x7f   : > { %v489_v22 = vadd.f32 %v488_v44, %v487_v19  ;;  %v399_v44 = vmul.f32 %v1031_v10, %v1031_v10  ;;  %v400_v19 = vmul.f32 %v1039_v13, %v1039_v13 }
  0x80   : > { %v310_v62 = vadd.f32 %v309_v53, %v308_v55  ;;  %v327_v53 = vsel %vm201_vm1, %v1055_v48, 0.0 }
  0x81   : > { %v491_v58 = vadd.f32 %v490_v51, %v489_v22  ;;  %v524_v10 = vsel %vm201_vm1, %v400_v19, 0.0 }
  0x82   : > { %v312_v6 = vadd.f32 %v311_v59, %v310_v62  ;;  %v494_v62 = vsel %vm201_vm1, %v385_v50, 0.0  ;;  %v401_v50 = vmul.f32 %v1047_v43, %v1047_v43 }
  0x83   : > { %v493_v52 = vadd.f32 %v492_v57, %v491_v58 }
  0x84   : > { %v314_v11 = vadd.f32 %v313_v4, %v312_v6  ;;  %v496_v4 = vsel %vm201_vm1, %v386_v49, 0.0 }
  0x85   : > { %v495_v28 = vadd.f32 %v494_v62, %v493_v52 }
  0x86   : > { %v316_v18 = vadd.f32 %v315_v8, %v314_v11 }
  0x87   : > { %v497_v3 = vadd.f32 %v496_v4, %v495_v28 }
  0x88   : > { %v318_v26 = vadd.f32 %v317_v15, %v316_v18  ;;  %v504_v18 = vsel %vm201_vm1, %v390_v61, 0.0 }
  0x89   : > { %v499_v11 = vadd.f32 %v498_v2, %v497_v3 }
  0x8a   : > { %v320_v33 = vadd.f32 %v319_v23, %v318_v26  ;;  %v393_v23 = vmul.f32 %v983_v39, %v983_v39 }
  0x8b   : > { %v501_v15 = vadd.f32 %v500_v31, %v499_v11 }
  0x8c   : > { %v322_v41 = vadd.f32 %v321_v30, %v320_v33  ;;  %v395_v30 = vmul.f32 %v999_v54, %v999_v54  ;;  %v510_v39 = vsel %vm201_vm1, %v393_v23, 0.0  ;;  %v396_v33 = vmul.f32 %v1007_v60, %v1007_v60 }
  0x8d   : > { %v503_v20 = vadd.f32 %v502_v14, %v501_v15  ;;  %v518_v60 = vsel %vm201_vm1, %v397_v36, 0.0 }
  0x8e   : > { %v324_v46 = vadd.f32 %v323_v38, %v322_v41  ;;  %v514_v38 = vsel %vm201_vm1, %v395_v30, 0.0  ;;  %v398_v41 = vmul.f32 %v1023_v9, %v1023_v9  ;;  %v516_v54 = vsel %vm201_vm1, %v396_v33, 0.0 }
  0x8f   : > { %v505_v37 = vadd.f32 %v504_v18, %v503_v20  ;;  %v522_v9 = vsel %vm201_vm1, %v399_v44, 0.0 }
  0x90   : > { %v326_v55 = vadd.f32 %v325_v45, %v324_v46  ;;  %v520_v5 = vsel %vm201_vm1, %v398_v41, 0.0 }
  0x91   : > { %v507_v29 = vadd.f32 %v506_v24, %v505_v37 }
  0x92   : > { %v328_v59 = vadd.f32 %v327_v53, %v326_v55  ;;  %v402_v53 = vmul.f32 %v1055_v48, %v1055_v48  ;;  %v526_v55 = vsel %vm201_vm1, %v401_v50, 0.0 }
  0x93   : > { %v509_v40 = vadd.f32 %v508_v32, %v507_v29 }
  0x94   : > { %v329_v63 = vrot.slane %v328_v59, 4  ;;  %v528_v13 = vsel %vm201_vm1, %v402_v53, 0.0 }
  0x95   : > { %v511_v47 = vadd.f32 %v510_v39, %v509_v40 }
  0x96   : > { %v330_v6 = vadd.f32 %v329_v63, %v328_v59  ;;  %v338_v63 = vld [vmem:[%s1134_s2] sm:$0x1] }
  0x97   : > { %v513_v16 = vadd.f32 %v512_v35, %v511_v47 }
  0x98   : > { %v331_v8 = vrot.slane %v330_v6, 2 }
  0x99   : > { %v515_v42 = vadd.f32 %v514_v38, %v513_v16 }
  0x9a   : > { %v332_v12 = vadd.f32 %v331_v8, %v330_v6 }
  0x9b   : > { %v517_v45 = vadd.f32 %v516_v54, %v515_v42 }
  0x9c   : > { %v333_v34 = vrot.slane %v332_v12, 1 }
  0x9d   : > { %v519_v46 = vadd.f32 %v518_v60, %v517_v45 }
  0x9e   : > { %v334_v21 = vadd.f32 %v333_v34, %v332_v12 }
  0x9f   : > { %v521_v51 = vadd.f32 %v520_v5, %v519_v46 }
  0xa0   : > { %v335_v26 = vadd.f32 %v334_v21, %v200_v17 }
  0xa1   : > { %v523_v22 = vadd.f32 %v522_v9, %v521_v51 }
  0xa2   : > { %337 = vst.msk [vmem:[%s1133_s1] sm:$0x1] %vm336_vm2, %v335_v26 }
  0xa3   : > { %v525_v49 = vadd.f32 %v524_v10, %v523_v22 }
  0xa5   : > { %v527_v57 = vadd.f32 %v526_v55, %v525_v49 }
  0xa7   : > { %v529_v58 = vadd.f32 %v528_v13, %v527_v57 }
  0xa9   : > { %v530_v59 = vrot.slane %v529_v58, 4 }
  0xab   : > { %v531_v25 = vadd.f32 %v530_v59, %v529_v58 }
  0xad   : > { %v532_v62 = vrot.slane %v531_v25, 2 }
  0xaf   : > { %v533_v43 = vadd.f32 %v532_v62, %v531_v25 }
  0xb1   : > { %v534_v52 = vrot.slane %v533_v43, 1 }
  0xb3   : > { %v535_v48 = vadd.f32 %v534_v52, %v533_v43 }
  0xb5   : > { %v536_v0 = vadd.f32 %v535_v48, %v338_v63 }
  0xb7   : > { %537 = vst.msk [vmem:[%s1134_s2] sm:$0x1] %vm336_vm2, %v536_v0 }
  0xb8 PF: > { %s13_s9 = sadd.s32 1, %s596_s9  }
  0xb9   : > { %p10_p5 = scmp.ge.s32.totalorder %s13_s9, 6  }
  0xbb   :  { %12 = sbr.rel (!%p10_p5) target bundleno = 1 (0x1), region = 62 }

// kernel: netG_forward.22
= control target key start
LH: loop header
LB: loop body
LE: loop exit
PB: predicated region body
PF: predicated region fallthrough
CT: control target
= control target key end

     0   :  { %s614_s12 = smov 0   ;;  %s965_s0 = inlined_call_operand.vmem [shape: f32[2048,8], index: 0, kind: input, shape index: {}]   ;;  %s966_s1 = inlined_call_operand.vmem [shape: f32[1,8], index: 1, kind: input, shape index: {}]   ;;  %s967_s2 = inlined_call_operand.vmem [shape: f32[1,8], index: 2, kind: input, shape index: {}]   ;;  %s968_s3 = inlined_call_operand.vmem [shape: f32[2048,8], index: 3, kind: output, shape index: {}]  }
   0x1 LB: > { %s565_s13 = sadd.s32 4294967295, %s592_s12   ;;  %p569_p0 = scmp.ge.s32.totalorder %s592_s12, 1  ;;  %s592_s12 = sphi %s614_s12, %s13_s12  }
   0x2   : > { %p138_p1 = scmp.lt.s32.totalorder %s592_s12, 5 }
   0x4   : > { %p139_p2 = pnand %p569_p0, %p138_p1 }
   0x5   : > { %s570_s14 = sshll.u32 (!%p139_p2), %s565_s13, 6  ;;  %v625_v0 = vld [vmem:[%s966_s1] ss:$0 sm:$0xff] (!%p139_p2)  ;;  %vm444_vm0 = vcmask (!%p139_p2), 64512  }
   0x6   : > { %142 = sbr.rel (%p139_p2) target bundleno = 70 (0x46), region = 32  ;;  %p163_p3 = scmp.lt.s32.totalorder (!%p139_p2), %s570_s14, 255  ;;  %v635_v1 = vld [vmem:[%s967_s2] ss:$0 sm:$0xff] (!%p139_p2) }
   0xd   : > { %s970_s14 = smov (!%p163_p3, %s570_s14), 255 }
   0xe   : > { %s571_s15 = sshll.u32 %s970_s14, 3 }
   0xf   : > { %s630_s20 = scalar_lea.vmem %s965_s0, %s571_s15  ;;  %s658_s25 = scalar_lea.vmem %s968_s3, %s571_s15 }
  0x10   : > { %v174_v2 = vld [vmem:[%s630_s20] sm:$0xff]  ;;  %v175_v3 = vld [vmem:[%s630_s20 + $0x8] sm:$0xff]  ;;  %v176_v4 = vld [vmem:[%s630_s20 + $0x10] sm:$0xff] }
  0x11   : > { %v245_v5 = vmul.f32 %v625_v0, %v174_v2  ;;  %v246_v6 = vmul.f32 %v625_v0, %v175_v3  ;;  %v247_v7 = vmul.f32 %v625_v0, %v176_v4  ;;  %v177_v8 = vld [vmem:[%s630_s20 + $0x18] sm:$0xff]  ;;  %v178_v9 = vld [vmem:[%s630_s20 + $0x20] sm:$0xff]  ;;  %v179_v10 = vld [vmem:[%s630_s20 + $0x28] sm:$0xff] }
  0x12   : > { %v248_v11 = vmul.f32 %v625_v0, %v177_v8  ;;  %v249_v12 = vmul.f32 %v625_v0, %v178_v9  ;;  %v250_v13 = vmul.f32 %v625_v0, %v179_v10  ;;  %v180_v14 = vld [vmem:[%s630_s20 + $0x30] sm:$0xff]  ;;  %v181_v15 = vld [vmem:[%s630_s20 + $0x38] sm:$0xff]  ;;  %v182_v24 = vld [vmem:[%s630_s20 + $0x40] sm:$0xff] }
  0x13   : > { %v316_v16 = vadd.f32 %v635_v1, %v245_v5  ;;  %v317_v17 = vadd.f32 %v635_v1, %v246_v6  ;;  %v318_v18 = vadd.f32 %v635_v1, %v247_v7  ;;  %v251_v19 = vmul.f32 %v625_v0, %v180_v14  ;;  %v183_v25 = vld [vmem:[%s630_s20 + $0x48] sm:$0xff]  ;;  %v184_v26 = vld [vmem:[%s630_s20 + $0x50] sm:$0xff]  ;;  %v185_v31 = vld [vmem:[%s630_s20 + $0x58] sm:$0xff] }
  0x14   : > { %v319_v20 = vadd.f32 %v635_v1, %v248_v11  ;;  %v320_v21 = vadd.f32 %v635_v1, %v249_v12  ;;  %v321_v22 = vadd.f32 %v635_v1, %v250_v13  ;;  %v252_v23 = vmul.f32 %v625_v0, %v181_v15  ;;  %v186_v32 = vld [vmem:[%s630_s20 + $0x60] sm:$0xff]  ;;  %v187_v33 = vld [vmem:[%s630_s20 + $0x68] sm:$0xff]  ;;  %v188_v38 = vld [vmem:[%s630_s20 + $0x70] sm:$0xff] }
  0x15   : > { %v380_v27 = vmax.f32 %v316_v16, 0.0  ;;  %v381_v28 = vmax.f32 %v317_v17, 0.0  ;;  %v382_v29 = vmax.f32 %v318_v18, 0.0  ;;  %v322_v30 = vadd.f32 %v635_v1, %v251_v19  ;;  %v189_v43 = vld [vmem:[%s630_s20 + $0x78] sm:$0xff]  ;;  %v190_v56 = vld [vmem:[%s630_s20 + $0x80] sm:$0xff]  ;;  %v191_v57 = vld [vmem:[%s630_s20 + $0x88] sm:$0xff] }
  0x16   : > { %v383_v34 = vmax.f32 %v319_v20, 0.0  ;;  %v384_v35 = vmax.f32 %v320_v21, 0.0  ;;  %v385_v36 = vmax.f32 %v321_v22, 0.0  ;;  %v323_v37 = vadd.f32 %v635_v1, %v252_v23  ;;  %v192_v58 = vld [vmem:[%s630_s20 + $0x90] sm:$0xff]  ;;  %v193_v63 = vld [vmem:[%s630_s20 + $0x98] sm:$0xff]  ;;  %v194_v2 = vld [vmem:[%s630_s20 + $0xa0] sm:$0xff] }
  0x17   : > { %445 = vst.msk [vmem:[%s658_s25] sm:$0xff] %vm444_vm0, %v380_v27  ;;  %446 = vst.msk [vmem:[%s658_s25 + $0x8] sm:$0xff] %vm444_vm0, %v381_v28  ;;  %v386_v39 = vmax.f32 %v322_v30, 0.0  ;;  %v253_v40 = vmul.f32 %v625_v0, %v182_v24  ;;  %v254_v41 = vmul.f32 %v625_v0, %v183_v25  ;;  %v255_v42 = vmul.f32 %v625_v0, %v184_v26  ;;  %v195_v3 = vld [vmem:[%s630_s20 + $0xa8] sm:$0xff]  ;;  %v196_v8 = vld [vmem:[%s630_s20 + $0xb0] sm:$0xff] }
  0x18   : > { %447 = vst.msk [vmem:[%s658_s25 + $0x10] sm:$0xff] %vm444_vm0, %v382_v29  ;;  %448 = vst.msk [vmem:[%s658_s25 + $0x18] sm:$0xff] %vm444_vm0, %v383_v34  ;;  %v387_v44 = vmax.f32 %v323_v37, 0.0  ;;  %v256_v45 = vmul.f32 %v625_v0, %v185_v31  ;;  %v257_v46 = vmul.f32 %v625_v0, %v186_v32  ;;  %v258_v47 = vmul.f32 %v625_v0, %v187_v33  ;;  %v197_v13 = vld [vmem:[%s630_s20 + $0xb8] sm:$0xff]  ;;  %v198_v26 = vld [vmem:[%s630_s20 + $0xc0] sm:$0xff] }
  0x19   : > { %449 = vst.msk [vmem:[%s658_s25 + $0x20] sm:$0xff] %vm444_vm0, %v384_v35  ;;  %450 = vst.msk [vmem:[%s658_s25 + $0x28] sm:$0xff] %vm444_vm0, %v385_v36  ;;  %v324_v48 = vadd.f32 %v635_v1, %v253_v40  ;;  %v325_v49 = vadd.f32 %v635_v1, %v254_v41  ;;  %v326_v50 = vadd.f32 %v635_v1, %v255_v42  ;;  %v199_v27 = vld [vmem:[%s630_s20 + $0xc8] sm:$0xff]  ;;  %v200_v28 = vld [vmem:[%s630_s20 + $0xd0] sm:$0xff] }
  0x1a   : > { %451 = vst.msk [vmem:[%s658_s25 + $0x30] sm:$0xff] %vm444_vm0, %v386_v39  ;;  %v259_v51 = vmul.f32 %v625_v0, %v188_v38  ;;  %452 = vst.msk [vmem:[%s658_s25 + $0x38] sm:$0xff] %vm444_vm0, %v387_v44  ;;  %v327_v52 = vadd.f32 %v635_v1, %v256_v45  ;;  %v328_v53 = vadd.f32 %v635_v1, %v257_v46  ;;  %v201_v33 = vld [vmem:[%s630_s20 + $0xd8] sm:$0xff]  ;;  %v202_v34 = vld [vmem:[%s630_s20 + $0xe0] sm:$0xff] }
  0x1b   : > { %v329_v54 = vadd.f32 %v635_v1, %v258_v47  ;;  %v260_v55 = vmul.f32 %v625_v0, %v189_v43  ;;  %v388_v59 = vmax.f32 %v324_v48, 0.0  ;;  %v389_v60 = vmax.f32 %v325_v49, 0.0  ;;  %v203_v35 = vld [vmem:[%s630_s20 + $0xe8] sm:$0xff]  ;;  %v204_v40 = vld [vmem:[%s630_s20 + $0xf0] sm:$0xff]  ;;  %v205_v45 = vld [vmem:[%s630_s20 + $0xf8] sm:$0xff] }
  0x1c   : > { %v390_v61 = vmax.f32 %v326_v50, 0.0  ;;  %v330_v62 = vadd.f32 %v635_v1, %v259_v51  ;;  %v391_v4 = vmax.f32 %v327_v52, 0.0  ;;  %v392_v5 = vmax.f32 %v328_v53, 0.0 }
  0x1d   : > { %v393_v6 = vmax.f32 %v329_v54, 0.0  ;;  %v331_v7 = vadd.f32 %v635_v1, %v260_v55  ;;  %453 = vst.msk [vmem:[%s658_s25 + $0x40] sm:$0xff] %vm444_vm0, %v388_v59  ;;  %454 = vst.msk [vmem:[%s658_s25 + $0x48] sm:$0xff] %vm444_vm0, %v389_v60  ;;  %v261_v10 = vmul.f32 %v625_v0, %v190_v56  ;;  %v262_v11 = vmul.f32 %v625_v0, %v191_v57  ;;  %v207_v59 = vld [vmem:[%s630_s20 + $0x108] sm:$0xff]  ;;  %v208_v60 = vld [vmem:[%s630_s20 + $0x110] sm:$0xff] }
  0x1e   : > { %455 = vst.msk [vmem:[%s658_s25 + $0x50] sm:$0xff] %vm444_vm0, %v390_v61  ;;  %v394_v9 = vmax.f32 %v330_v62, 0.0  ;;  %v263_v12 = vmul.f32 %v625_v0, %v192_v58  ;;  %456 = vst.msk [vmem:[%s658_s25 + $0x58] sm:$0xff] %vm444_vm0, %v391_v4  ;;  %v264_v15 = vmul.f32 %v625_v0, %v193_v63  ;;  %v265_v16 = vmul.f32 %v625_v0, %v194_v2  ;;  %v206_v58 = vld [vmem:[%s630_s20 + $0x100] sm:$0xff] }
  0x1f   : > { %457 = vst.msk [vmem:[%s658_s25 + $0x60] sm:$0xff] %vm444_vm0, %v392_v5  ;;  %458 = vst.msk [vmem:[%s658_s25 + $0x68] sm:$0xff] %vm444_vm0, %v393_v6  ;;  %v395_v14 = vmax.f32 %v331_v7, 0.0  ;;  %v266_v17 = vmul.f32 %v625_v0, %v195_v3  ;;  %v332_v18 = vadd.f32 %v635_v1, %v261_v10  ;;  %v333_v19 = vadd.f32 %v635_v1, %v262_v11  ;;  %v209_v3 = vld [vmem:[%s630_s20 + $0x118] sm:$0xff]  ;;  %v210_v4 = vld [vmem:[%s630_s20 + $0x120] sm:$0xff] }
  0x20   : > { %459 = vst.msk [vmem:[%s658_s25 + $0x70] sm:$0xff] %vm444_vm0, %v394_v9  ;;  %v334_v20 = vadd.f32 %v635_v1, %v263_v12  ;;  %v267_v21 = vmul.f32 %v625_v0, %v196_v8  ;;  %v335_v22 = vadd.f32 %v635_v1, %v264_v15  ;;  %v336_v23 = vadd.f32 %v635_v1, %v265_v16  ;;  %v211_v5 = vld [vmem:[%s630_s20 + $0x128] sm:$0xff]  ;;  %v212_v10 = vld [vmem:[%s630_s20 + $0x130] sm:$0xff]  ;;  %v213_v15 = vld [vmem:[%s630_s20 + $0x138] sm:$0xff] }
  0x21   : > { %460 = vst.msk [vmem:[%s658_s25 + $0x78] sm:$0xff] %vm444_vm0, %v395_v14  ;;  %v337_v24 = vadd.f32 %v635_v1, %v266_v17  ;;  %v268_v25 = vmul.f32 %v625_v0, %v197_v13  ;;  %v396_v29 = vmax.f32 %v332_v18, 0.0  ;;  %v397_v30 = vmax.f32 %v333_v19, 0.0 }
  0x22   : > { %v398_v31 = vmax.f32 %v334_v20, 0.0  ;;  %v338_v32 = vadd.f32 %v635_v1, %v267_v21  ;;  %v399_v36 = vmax.f32 %v335_v22, 0.0  ;;  %v400_v37 = vmax.f32 %v336_v23, 0.0 }
  0x23   : > { %v401_v38 = vmax.f32 %v337_v24, 0.0  ;;  %v339_v39 = vadd.f32 %v635_v1, %v268_v25  ;;  %461 = vst.msk [vmem:[%s658_s25 + $0x80] sm:$0xff] %vm444_vm0, %v396_v29  ;;  %462 = vst.msk [vmem:[%s658_s25 + $0x88] sm:$0xff] %vm444_vm0, %v397_v30  ;;  %v269_v42 = vmul.f32 %v625_v0, %v198_v26  ;;  %v270_v43 = vmul.f32 %v625_v0, %v199_v27  ;;  %v215_v29 = vld [vmem:[%s630_s20 + $0x148] sm:$0xff]  ;;  %v216_v30 = vld [vmem:[%s630_s20 + $0x150] sm:$0xff] }
  0x24   : > { %463 = vst.msk [vmem:[%s658_s25 + $0x90] sm:$0xff] %vm444_vm0, %v398_v31  ;;  %v402_v41 = vmax.f32 %v338_v32, 0.0  ;;  %v271_v44 = vmul.f32 %v625_v0, %v200_v28  ;;  %464 = vst.msk [vmem:[%s658_s25 + $0x98] sm:$0xff] %vm444_vm0, %v399_v36  ;;  %v272_v47 = vmul.f32 %v625_v0, %v201_v33  ;;  %v273_v48 = vmul.f32 %v625_v0, %v202_v34  ;;  %v214_v28 = vld [vmem:[%s630_s20 + $0x140] sm:$0xff] }
  0x25   : > { %465 = vst.msk [vmem:[%s658_s25 + $0xa0] sm:$0xff] %vm444_vm0, %v400_v37  ;;  %466 = vst.msk [vmem:[%s658_s25 + $0xa8] sm:$0xff] %vm444_vm0, %v401_v38  ;;  %v403_v46 = vmax.f32 %v339_v39, 0.0  ;;  %v274_v49 = vmul.f32 %v625_v0, %v203_v35  ;;  %v340_v50 = vadd.f32 %v635_v1, %v269_v42  ;;  %v341_v51 = vadd.f32 %v635_v1, %v270_v43  ;;  %v217_v35 = vld [vmem:[%s630_s20 + $0x158] sm:$0xff]  ;;  %v218_v36 = vld [vmem:[%s630_s20 + $0x160] sm:$0xff] }
  0x26   : > { %467 = vst.msk [vmem:[%s658_s25 + $0xb0] sm:$0xff] %vm444_vm0, %v402_v41  ;;  %v342_v52 = vadd.f32 %v635_v1, %v271_v44  ;;  %v275_v53 = vmul.f32 %v625_v0, %v204_v40  ;;  %v343_v54 = vadd.f32 %v635_v1, %v272_v47  ;;  %v344_v55 = vadd.f32 %v635_v1, %v273_v48  ;;  %v219_v37 = vld [vmem:[%s630_s20 + $0x168] sm:$0xff]  ;;  %v220_v42 = vld [vmem:[%s630_s20 + $0x170] sm:$0xff]  ;;  %v221_v47 = vld [vmem:[%s630_s20 + $0x178] sm:$0xff] }
  0x27   : > { %468 = vst.msk [vmem:[%s658_s25 + $0xb8] sm:$0xff] %vm444_vm0, %v403_v46  ;;  %v345_v56 = vadd.f32 %v635_v1, %v274_v49  ;;  %v276_v57 = vmul.f32 %v625_v0, %v205_v45  ;;  %v404_v61 = vmax.f32 %v340_v50, 0.0  ;;  %v405_v62 = vmax.f32 %v341_v51, 0.0 }
  0x28   : > { %v406_v63 = vmax.f32 %v342_v52, 0.0  ;;  %v346_v2 = vadd.f32 %v635_v1, %v275_v53  ;;  %v407_v6 = vmax.f32 %v343_v54, 0.0  ;;  %v408_v7 = vmax.f32 %v344_v55, 0.0 }
  0x29   : > { %v409_v8 = vmax.f32 %v345_v56, 0.0  ;;  %v347_v9 = vadd.f32 %v635_v1, %v276_v57  ;;  %469 = vst.msk [vmem:[%s658_s25 + $0xc0] sm:$0xff] %vm444_vm0, %v404_v61  ;;  %470 = vst.msk [vmem:[%s658_s25 + $0xc8] sm:$0xff] %vm444_vm0, %v405_v62  ;;  %v277_v12 = vmul.f32 %v625_v0, %v206_v58  ;;  %v278_v13 = vmul.f32 %v625_v0, %v207_v59  ;;  %v223_v61 = vld [vmem:[%s630_s20 + $0x188] sm:$0xff]  ;;  %v224_v62 = vld [vmem:[%s630_s20 + $0x190] sm:$0xff] }
  0x2a   : > { %471 = vst.msk [vmem:[%s658_s25 + $0xd0] sm:$0xff] %vm444_vm0, %v406_v63  ;;  %v410_v11 = vmax.f32 %v346_v2, 0.0  ;;  %v279_v14 = vmul.f32 %v625_v0, %v208_v60  ;;  %472 = vst.msk [vmem:[%s658_s25 + $0xd8] sm:$0xff] %vm444_vm0, %v407_v6  ;;  %v280_v17 = vmul.f32 %v625_v0, %v209_v3  ;;  %v281_v18 = vmul.f32 %v625_v0, %v210_v4  ;;  %v222_v60 = vld [vmem:[%s630_s20 + $0x180] sm:$0xff] }
  0x2b   : > { %473 = vst.msk [vmem:[%s658_s25 + $0xe0] sm:$0xff] %vm444_vm0, %v408_v7  ;;  %474 = vst.msk [vmem:[%s658_s25 + $0xe8] sm:$0xff] %vm444_vm0, %v409_v8  ;;  %v411_v16 = vmax.f32 %v347_v9, 0.0  ;;  %v282_v19 = vmul.f32 %v625_v0, %v211_v5  ;;  %v348_v20 = vadd.f32 %v635_v1, %v277_v12  ;;  %v349_v21 = vadd.f32 %v635_v1, %v278_v13  ;;  %v225_v5 = vld [vmem:[%s630_s20 + $0x198] sm:$0xff]  ;;  %v226_v6 = vld [vmem:[%s630_s20 + $0x1a0] sm:$0xff] }
  0x2c   : > { %475 = vst.msk [vmem:[%s658_s25 + $0xf0] sm:$0xff] %vm444_vm0, %v410_v11  ;;  %v350_v22 = vadd.f32 %v635_v1, %v279_v14  ;;  %v283_v23 = vmul.f32 %v625_v0, %v212_v10  ;;  %v351_v24 = vadd.f32 %v635_v1, %v280_v17  ;;  %v352_v25 = vadd.f32 %v635_v1, %v281_v18  ;;  %v227_v7 = vld [vmem:[%s630_s20 + $0x1a8] sm:$0xff]  ;;  %v228_v12 = vld [vmem:[%s630_s20 + $0x1b0] sm:$0xff]  ;;  %v229_v17 = vld [vmem:[%s630_s20 + $0x1b8] sm:$0xff] }
  0x2d   : > { %476 = vst.msk [vmem:[%s658_s25 + $0xf8] sm:$0xff] %vm444_vm0, %v411_v16  ;;  %v353_v26 = vadd.f32 %v635_v1, %v282_v19  ;;  %v284_v27 = vmul.f32 %v625_v0, %v213_v15  ;;  %v412_v31 = vmax.f32 %v348_v20, 0.0  ;;  %v413_v32 = vmax.f32 %v349_v21, 0.0 }
  0x2e   : > { %v414_v33 = vmax.f32 %v350_v22, 0.0  ;;  %v354_v34 = vadd.f32 %v635_v1, %v283_v23  ;;  %v415_v38 = vmax.f32 %v351_v24, 0.0  ;;  %v416_v39 = vmax.f32 %v352_v25, 0.0 }
  0x2f   : > { %v417_v40 = vmax.f32 %v353_v26, 0.0  ;;  %v355_v41 = vadd.f32 %v635_v1, %v284_v27  ;;  %477 = vst.msk [vmem:[%s658_s25 + $0x100] sm:$0xff] %vm444_vm0, %v412_v31  ;;  %478 = vst.msk [vmem:[%s658_s25 + $0x108] sm:$0xff] %vm444_vm0, %v413_v32  ;;  %v285_v44 = vmul.f32 %v625_v0, %v214_v28  ;;  %v286_v45 = vmul.f32 %v625_v0, %v215_v29  ;;  %v231_v31 = vld [vmem:[%s630_s20 + $0x1c8] sm:$0xff]  ;;  %v232_v32 = vld [vmem:[%s630_s20 + $0x1d0] sm:$0xff] }
  0x30   : > { %479 = vst.msk [vmem:[%s658_s25 + $0x110] sm:$0xff] %vm444_vm0, %v414_v33  ;;  %v418_v43 = vmax.f32 %v354_v34, 0.0  ;;  %v287_v46 = vmul.f32 %v625_v0, %v216_v30  ;;  %480 = vst.msk [vmem:[%s658_s25 + $0x118] sm:$0xff] %vm444_vm0, %v415_v38  ;;  %v288_v49 = vmul.f32 %v625_v0, %v217_v35  ;;  %v289_v50 = vmul.f32 %v625_v0, %v218_v36  ;;  %v230_v30 = vld [vmem:[%s630_s20 + $0x1c0] sm:$0xff] }
  0x31   : > { %481 = vst.msk [vmem:[%s658_s25 + $0x120] sm:$0xff] %vm444_vm0, %v416_v39  ;;  %482 = vst.msk [vmem:[%s658_s25 + $0x128] sm:$0xff] %vm444_vm0, %v417_v40  ;;  %v419_v48 = vmax.f32 %v355_v41, 0.0  ;;  %v290_v51 = vmul.f32 %v625_v0, %v219_v37  ;;  %v356_v52 = vadd.f32 %v635_v1, %v285_v44  ;;  %v357_v53 = vadd.f32 %v635_v1, %v286_v45  ;;  %v233_v37 = vld [vmem:[%s630_s20 + $0x1d8] sm:$0xff]  ;;  %v234_v38 = vld [vmem:[%s630_s20 + $0x1e0] sm:$0xff] }
  0x32   : > { %483 = vst.msk [vmem:[%s658_s25 + $0x130] sm:$0xff] %vm444_vm0, %v418_v43  ;;  %v358_v54 = vadd.f32 %v635_v1, %v287_v46  ;;  %v291_v55 = vmul.f32 %v625_v0, %v220_v42  ;;  %v359_v56 = vadd.f32 %v635_v1, %v288_v49  ;;  %v360_v57 = vadd.f32 %v635_v1, %v289_v50  ;;  %v235_v39 = vld [vmem:[%s630_s20 + $0x1e8] sm:$0xff]  ;;  %v236_v44 = vld [vmem:[%s630_s20 + $0x1f0] sm:$0xff]  ;;  %v237_v49 = vld [vmem:[%s630_s20 + $0x1f8] sm:$0xff] }
  0x33   : > { %484 = vst.msk [vmem:[%s658_s25 + $0x138] sm:$0xff] %vm444_vm0, %v419_v48  ;;  %v361_v58 = vadd.f32 %v635_v1, %v290_v51  ;;  %v292_v59 = vmul.f32 %v625_v0, %v221_v47  ;;  %v420_v63 = vmax.f32 %v356_v52, 0.0  ;;  %v421_v2 = vmax.f32 %v357_v53, 0.0 }
  0x34   : > { %v422_v3 = vmax.f32 %v358_v54, 0.0  ;;  %v362_v4 = vadd.f32 %v635_v1, %v291_v55  ;;  %v423_v8 = vmax.f32 %v359_v56, 0.0  ;;  %v424_v9 = vmax.f32 %v360_v57, 0.0 }
  0x35   : > { %v425_v10 = vmax.f32 %v361_v58, 0.0  ;;  %v363_v11 = vadd.f32 %v635_v1, %v292_v59  ;;  %485 = vst.msk [vmem:[%s658_s25 + $0x140] sm:$0xff] %vm444_vm0, %v420_v63  ;;  %486 = vst.msk [vmem:[%s658_s25 + $0x148] sm:$0xff] %vm444_vm0, %v421_v2  ;;  %v293_v14 = vmul.f32 %v625_v0, %v222_v60  ;;  %v294_v15 = vmul.f32 %v625_v0, %v223_v61 }
  0x36   : > { %487 = vst.msk [vmem:[%s658_s25 + $0x150] sm:$0xff] %vm444_vm0, %v422_v3  ;;  %v426_v13 = vmax.f32 %v362_v4, 0.0  ;;  %v295_v16 = vmul.f32 %v625_v0, %v224_v62  ;;  %488 = vst.msk [vmem:[%s658_s25 + $0x158] sm:$0xff] %vm444_vm0, %v423_v8  ;;  %v296_v19 = vmul.f32 %v625_v0, %v225_v5  ;;  %v297_v20 = vmul.f32 %v625_v0, %v226_v6 }
  0x37   : > { %489 = vst.msk [vmem:[%s658_s25 + $0x160] sm:$0xff] %vm444_vm0, %v424_v9  ;;  %490 = vst.msk [vmem:[%s658_s25 + $0x168] sm:$0xff] %vm444_vm0, %v425_v10  ;;  %v427_v18 = vmax.f32 %v363_v11, 0.0  ;;  %v298_v21 = vmul.f32 %v625_v0, %v227_v7  ;;  %v364_v22 = vadd.f32 %v635_v1, %v293_v14  ;;  %v365_v23 = vadd.f32 %v635_v1, %v294_v15 }
  0x38   : > { %491 = vst.msk [vmem:[%s658_s25 + $0x170] sm:$0xff] %vm444_vm0, %v426_v13  ;;  %v366_v24 = vadd.f32 %v635_v1, %v295_v16  ;;  %v299_v25 = vmul.f32 %v625_v0, %v228_v12  ;;  %v367_v26 = vadd.f32 %v635_v1, %v296_v19  ;;  %v368_v27 = vadd.f32 %v635_v1, %v297_v20 }
  0x39   : > { %492 = vst.msk [vmem:[%s658_s25 + $0x178] sm:$0xff] %vm444_vm0, %v427_v18  ;;  %v369_v28 = vadd.f32 %v635_v1, %v298_v21  ;;  %v300_v29 = vmul.f32 %v625_v0, %v229_v17  ;;  %v428_v33 = vmax.f32 %v364_v22, 0.0  ;;  %v429_v34 = vmax.f32 %v365_v23, 0.0 }
  0x3a   : > { %v430_v35 = vmax.f32 %v366_v24, 0.0  ;;  %v370_v36 = vadd.f32 %v635_v1, %v299_v25  ;;  %v431_v40 = vmax.f32 %v367_v26, 0.0  ;;  %v432_v41 = vmax.f32 %v368_v27, 0.0 }
  0x3b   : > { %v433_v42 = vmax.f32 %v369_v28, 0.0  ;;  %v371_v43 = vadd.f32 %v635_v1, %v300_v29  ;;  %493 = vst.msk [vmem:[%s658_s25 + $0x180] sm:$0xff] %vm444_vm0, %v428_v33  ;;  %494 = vst.msk [vmem:[%s658_s25 + $0x188] sm:$0xff] %vm444_vm0, %v429_v34  ;;  %v301_v46 = vmul.f32 %v625_v0, %v230_v30  ;;  %v302_v47 = vmul.f32 %v625_v0, %v231_v31 }
  0x3c   : > { %495 = vst.msk [vmem:[%s658_s25 + $0x190] sm:$0xff] %vm444_vm0, %v430_v35  ;;  %v434_v45 = vmax.f32 %v370_v36, 0.0  ;;  %v303_v48 = vmul.f32 %v625_v0, %v232_v32  ;;  %496 = vst.msk [vmem:[%s658_s25 + $0x198] sm:$0xff] %vm444_vm0, %v431_v40  ;;  %v304_v51 = vmul.f32 %v625_v0, %v233_v37  ;;  %v305_v52 = vmul.f32 %v625_v0, %v234_v38 }
  0x3d   : > { %497 = vst.msk [vmem:[%s658_s25 + $0x1a0] sm:$0xff] %vm444_vm0, %v432_v41  ;;  %498 = vst.msk [vmem:[%s658_s25 + $0x1a8] sm:$0xff] %vm444_vm0, %v433_v42  ;;  %v435_v50 = vmax.f32 %v371_v43, 0.0  ;;  %v306_v53 = vmul.f32 %v625_v0, %v235_v39  ;;  %v372_v54 = vadd.f32 %v635_v1, %v301_v46  ;;  %v373_v55 = vadd.f32 %v635_v1, %v302_v47 }
  0x3e   : > { %499 = vst.msk [vmem:[%s658_s25 + $0x1b0] sm:$0xff] %vm444_vm0, %v434_v45  ;;  %v374_v56 = vadd.f32 %v635_v1, %v303_v48  ;;  %v307_v57 = vmul.f32 %v625_v0, %v236_v44  ;;  %v375_v58 = vadd.f32 %v635_v1, %v304_v51  ;;  %v376_v59 = vadd.f32 %v635_v1, %v305_v52 }
  0x3f   : > { %500 = vst.msk [vmem:[%s658_s25 + $0x1b8] sm:$0xff] %vm444_vm0, %v435_v50  ;;  %v377_v60 = vadd.f32 %v635_v1, %v306_v53  ;;  %v308_v61 = vmul.f32 %v625_v0, %v237_v49  ;;  %v436_v62 = vmax.f32 %v372_v54, 0.0  ;;  %v437_v63 = vmax.f32 %v373_v55, 0.0 }
  0x40   : > { %v438_v2 = vmax.f32 %v374_v56, 0.0  ;;  %v378_v3 = vadd.f32 %v635_v1, %v307_v57  ;;  %v439_v4 = vmax.f32 %v375_v58, 0.0  ;;  %v440_v5 = vmax.f32 %v376_v59, 0.0 }
  0x41   : > { %v441_v6 = vmax.f32 %v377_v60, 0.0  ;;  %v379_v7 = vadd.f32 %v635_v1, %v308_v61  ;;  %501 = vst.msk [vmem:[%s658_s25 + $0x1c0] sm:$0xff] %vm444_vm0, %v436_v62  ;;  %502 = vst.msk [vmem:[%s658_s25 + $0x1c8] sm:$0xff] %vm444_vm0, %v437_v63 }
  0x42   : > { %503 = vst.msk [vmem:[%s658_s25 + $0x1d0] sm:$0xff] %vm444_vm0, %v438_v2  ;;  %v442_v8 = vmax.f32 %v378_v3, 0.0  ;;  %504 = vst.msk [vmem:[%s658_s25 + $0x1d8] sm:$0xff] %vm444_vm0, %v439_v4 }
  0x43   : > { %505 = vst.msk [vmem:[%s658_s25 + $0x1e0] sm:$0xff] %vm444_vm0, %v440_v5  ;;  %506 = vst.msk [vmem:[%s658_s25 + $0x1e8] sm:$0xff] %vm444_vm0, %v441_v6  ;;  %v443_v0 = vmax.f32 %v379_v7, 0.0 }
  0x44   : > { %507 = vst.msk [vmem:[%s658_s25 + $0x1f0] sm:$0xff] %vm444_vm0, %v442_v8 }
  0x45   : > { %508 = vst.msk [vmem:[%s658_s25 + $0x1f8] sm:$0xff] %vm444_vm0, %v443_v0 }
  0x46 PF: > { %s13_s12 = sadd.s32 1, %s592_s12  }
  0x47   : > { %p10_p4 = scmp.ge.s32.totalorder %s13_s12, 6  }
  0x49   :  { %12 = sbr.rel (!%p10_p4) target bundleno = 1 (0x1), region = 62 }

// kernel: netG_forward.23
= control target key start
LH: loop header
LB: loop body
LE: loop exit
PB: predicated region body
PF: predicated region fallthrough
CT: control target
= control target key end

     0   :  { %s1136_s9 = smov 0   ;;  %s1138_s10 = smov 0   ;;  %s1247_s0 = inlined_call_operand.vmem [shape: bf16[2304,32], index: 0, kind: input, shape index: {}]   ;;  %s1248_s1 = inlined_call_operand.vmem [shape: bf16[32,128], index: 1, kind: input, shape index: {}]   ;;  %s1249_s2 = inlined_call_operand.vmem [shape: f32[2304,128], index: 2, kind: output, shape index: {}]  }
   0x1   :  { %s1140_s11 = smov 0  }
   0x2 LB: > { %s31_s12 = sadd.s32 1, %s1115_s10  ;;  %p892_p0 = scmp.ge.s32.totalorder %s1119_s11, 1  ;;  %s1119_s11 = sphi %s1140_s11, %s12_s11   ;;  %s1115_s10 = sphi %s1138_s10, %s1251_s10   ;;  %s1111_s9 = sphi %s1136_s9, %s1250_s9  }
   0x3   : > { %p33_p1 = scmp.ge.s32.totalorder %s31_s12, 9  ;;  %p155_p2 = scmp.lt.s32.totalorder %s1119_s11, 10 }
   0x5   : > { %s1253_s12 = smov (%p33_p1, %s31_s12), 0  ;;  %p156_p3 = pnand %p892_p0, %p155_p2 }
   0x6   : > { %v1015_v0 = vld [vmem:[%s1248_s1] sm:$0xff] (!%p156_p3)   ;;  %s893_s15 = sshll.u32 (!%p156_p3), %s1111_s9, 5  ;;  %v1016_v1 = vld [vmem:[%s1248_s1 + $0x8] sm:$0xff] (!%p156_p3)   ;;  %vm415_vm0 = vcmask (!%p156_p3), 261120  }
   0x7   : > { %159 = sbr.rel (%p156_p3) target bundleno = 276 (0x114), region = 28  ;;  %p192_p4 = scmp.lt.s32.totalorder (!%p156_p3), %s893_s15, 287  ;;  %951 = vmatprep.subr.bf16.mxu0 (!%p156_p3), %v1015_v0  ;;  %987 = vmatprep.subr.bf16.mxu1 (!%p156_p3), %v1015_v0 }
   0x8   : > { %952 = vmatpush3.bf16.msra.mxu0 (!%p156_p3), %v1015_v0  ;;  %989 = vmatpush3.bf16.msra.mxu1 (!%p156_p3), %v1015_v0 }
   0x9   : > { %953 = vmatprep.subr.bf16.mxu0 (!%p156_p3), %v1016_v1  ;;  %988 = vmatprep.subr.bf16.mxu1 (!%p156_p3), %v1016_v1 }
   0xc   : > { %954 = vmatpush3.bf16.msra.mxu0 (!%p156_p3), %v1016_v1  ;;  %990 = vmatpush3.bf16.msra.mxu1 (!%p156_p3), %v1016_v1 }
   0xe   : > { %s1255_s15 = smov (!%p192_p4, %s893_s15), 287 }
   0xf   : > { %s894_s18 = sshll.u32 %s1255_s15, 2  ;;  %s896_s22 = sshll.u32 %s1255_s15, 3 }
  0x10   : > { %s1166_s21 = scalar_lea.vmem %s1247_s0, %s894_s18  ;;  %s1204_s25 = scalar_lea.vmem %s1249_s2, %s896_s22 }
  0x11   : > { %v1017_v2 = vld [vmem:[%s1166_s21] sm:$0xff]   ;;  %v1019_v4 = vld [vmem:[%s1166_s21 + $0x8] sm:$0xff]   ;;  %v1021_v6 = vld [vmem:[%s1166_s21 + $0x10] sm:$0xff]  }
  0x12   : > { %v1018_v3 = vld [vmem:[%s1166_s21 + $0x40] sm:$0xff]   ;;  %955 = vmatprep.mubr.msk.bf16.mxu0 %vm415_vm0, %v1017_v2  ;;  %v1020_v5 = vld [vmem:[%s1166_s21 + $0x48] sm:$0xff]   ;;  %v1022_v7 = vld [vmem:[%s1166_s21 + $0x50] sm:$0xff]  }
  0x13   : > { %971 = vmatprep.mubr.msk.bf16.mxu1 %vm415_vm0, %v1018_v3  ;;  %956 = vmatmul.mubr.msk.bf16.vlgmr.msra.gmra.mrb[0].mxu0 %vm415_vm0, %v1019_v4  ;;  %v1023_v8 = vld [vmem:[%s1166_s21 + $0x18] sm:$0xff]   ;;  %v1025_v10 = vld [vmem:[%s1166_s21 + $0x20] sm:$0xff]   ;;  %v1027_v12 = vld [vmem:[%s1166_s21 + $0x28] sm:$0xff]  }
  0x14   : > { %972 = vmatmul.mubr.msk.bf16.vlgmr.msra.gmra.mrb[0].mxu1 %vm415_vm0, %v1020_v5  ;;  %959 = vmatprep.mubr.msk.bf16.mxu0 %vm415_vm0, %v1021_v6  ;;  %v1024_v9 = vld [vmem:[%s1166_s21 + $0x58] sm:$0xff]   ;;  %v1026_v11 = vld [vmem:[%s1166_s21 + $0x60] sm:$0xff]   ;;  %v1028_v13 = vld [vmem:[%s1166_s21 + $0x68] sm:$0xff]  }
  0x15   : > { %975 = vmatprep.mubr.msk.bf16.mxu1 %vm415_vm0, %v1022_v7  ;;  %v1029_v14 = vld [vmem:[%s1166_s21 + $0x30] sm:$0xff]   ;;  %v1031_v16 = vld [vmem:[%s1166_s21 + $0x38] sm:$0xff]  }
  0x16   : > { %v1030_v15 = vld [vmem:[%s1166_s21 + $0x70] sm:$0xff]   ;;  %v1032_v17 = vld [vmem:[%s1166_s21 + $0x78] sm:$0xff]  }
  0x1b   : > { %960 = vmatmul.mubr.msk.bf16.gmra.mrb[4].mxu0 %vm415_vm0, %v1023_v8 }
  0x1c   : > { %976 = vmatmul.mubr.msk.bf16.gmra.mrb[4].mxu1 %vm415_vm0, %v1024_v9  ;;  %963 = vmatprep.mubr.msk.bf16.mxu0 %vm415_vm0, %v1025_v10 }
  0x1d   : > { %979 = vmatprep.mubr.msk.bf16.mxu1 %vm415_vm0, %v1026_v11 }
  0x23   : > { %964 = vmatmul.mubr.msk.bf16.gmra.mrb[8].mxu0 %vm415_vm0, %v1027_v12 }
  0x24   : > { %980 = vmatmul.mubr.msk.bf16.gmra.mrb[8].mxu1 %vm415_vm0, %v1028_v13  ;;  %967 = vmatprep.mubr.msk.bf16.mxu0 %vm415_vm0, %v1029_v14 }
  0x25   : > { %983 = vmatprep.mubr.msk.bf16.mxu1 %vm415_vm0, %v1030_v15 }
  0x2b   : > { %968 = vmatmul.mubr.msk.bf16.gmra.mrb[12].mxu0 %vm415_vm0, %v1031_v16 }
  0x2c   : > { %984 = vmatmul.mubr.msk.bf16.gmra.mrb[12].mxu1 %vm415_vm0, %v1032_v17 }
  0xe6   : > { %v957_v18 = vpop.f32.mrb[0].mxu0 }
  0xe7   : > { %1033 = vtanh.f32 %v957_v18  ;;  %v973_v19 = vpop.f32.mrb[0].mxu1  ;;  %v498_v20 = vpop.f32.mrb[1].mxu0 }
  0xe8   : > { %1035 = vtanh.f32 %v973_v19  ;;  %v562_v21 = vpop.f32.mrb[1].mxu1  ;;  %v958_v22 = vpop.f32.mrb[2].mxu0 }
  0xe9   : > { %1037 = vtanh.f32 %v498_v20  ;;  %v974_v23 = vpop.f32.mrb[2].mxu1  ;;  %v501_v24 = vpop.f32.mrb[3].mxu0 }
  0xea   : > { %1039 = vtanh.f32 %v562_v21  ;;  %v565_v25 = vpop.f32.mrb[3].mxu1 }
  0xeb   : > { %1041 = vtanh.f32 %v958_v22 }
  0xec   : > { %1043 = vtanh.f32 %v974_v23 }
  0xed   : > { %1045 = vtanh.f32 %v501_v24 }
  0xee   : > { %1047 = vtanh.f32 %v565_v25  ;;  %v961_v26 = vpop.f32.mrb[4].mxu0 }
  0xef   : > { %1049 = vtanh.f32 %v961_v26  ;;  %v977_v27 = vpop.f32.mrb[4].mxu1  ;;  %v514_v28 = vpop.f32.mrb[5].mxu0 }
  0xf0   : > { %1051 = vtanh.f32 %v977_v27  ;;  %v578_v29 = vpop.f32.mrb[5].mxu1  ;;  %v962_v30 = vpop.f32.mrb[6].mxu0 }
  0xf1   : > { %v1034_v31 = vpop.eup %1033  ;;  %1053 = vtanh.f32 %v514_v28  ;;  %v978_v32 = vpop.f32.mrb[6].mxu1 }
  0xf2   : > { %v517_v33 = vpop.f32.mrb[7].mxu0  ;;  %v1036_v34 = vpop.eup %1035  ;;  %758 = vst [vmem:[%s1204_s25 + $0x10] sm:$0xff] %v1034_v31  ;;  %1055 = vtanh.f32 %v578_v29 }
  0xf3   : > { %v581_v35 = vpop.f32.mrb[7].mxu1  ;;  %v1038_v36 = vpop.eup %1037  ;;  %774 = vst [vmem:[%s1204_s25 + $0x90] sm:$0xff] %v1036_v34  ;;  %1057 = vtanh.f32 %v962_v30 }
  0xf4   : > { %v1040_v37 = vpop.eup %1039  ;;  %756 = vst [vmem:[%s1204_s25] sm:$0xff] %v1038_v36  ;;  %1059 = vtanh.f32 %v978_v32 }
  0xf5   : > { %v1042_v38 = vpop.eup %1041  ;;  %772 = vst [vmem:[%s1204_s25 + $0x80] sm:$0xff] %v1040_v37  ;;  %1061 = vtanh.f32 %v517_v33 }
  0xf6   : > { %v1044_v39 = vpop.eup %1043  ;;  %759 = vst [vmem:[%s1204_s25 + $0x18] sm:$0xff] %v1042_v38  ;;  %1063 = vtanh.f32 %v581_v35  ;;  %v965_v40 = vpop.f32.mrb[8].mxu0 }
  0xf7   : > { %v1046_v41 = vpop.eup %1045  ;;  %775 = vst [vmem:[%s1204_s25 + $0x98] sm:$0xff] %v1044_v39  ;;  %1065 = vtanh.f32 %v965_v40  ;;  %v981_v42 = vpop.f32.mrb[8].mxu1 }
  0xf8   : > { %v530_v43 = vpop.f32.mrb[9].mxu0  ;;  %v1048_v44 = vpop.eup %1047  ;;  %757 = vst [vmem:[%s1204_s25 + $0x8] sm:$0xff] %v1046_v41  ;;  %1067 = vtanh.f32 %v981_v42 }
  0xf9   : > { %v594_v45 = vpop.f32.mrb[9].mxu1  ;;  %v966_v46 = vpop.f32.mrb[10].mxu0  ;;  %773 = vst [vmem:[%s1204_s25 + $0x88] sm:$0xff] %v1048_v44  ;;  %1069 = vtanh.f32 %v530_v43 }
  0xfa   : > { %v1050_v47 = vpop.eup %1049  ;;  %v982_v48 = vpop.f32.mrb[10].mxu1  ;;  %1071 = vtanh.f32 %v594_v45 }
  0xfb   : > { %v533_v49 = vpop.f32.mrb[11].mxu0  ;;  %v1052_v50 = vpop.eup %1051  ;;  %762 = vst [vmem:[%s1204_s25 + $0x30] sm:$0xff] %v1050_v47  ;;  %1073 = vtanh.f32 %v966_v46 }
  0xfc   : > { %v597_v51 = vpop.f32.mrb[11].mxu1  ;;  %v1054_v52 = vpop.eup %1053  ;;  %778 = vst [vmem:[%s1204_s25 + $0xb0] sm:$0xff] %v1052_v50  ;;  %1075 = vtanh.f32 %v982_v48 }
  0xfd   : > { %v1056_v53 = vpop.eup %1055  ;;  %760 = vst [vmem:[%s1204_s25 + $0x20] sm:$0xff] %v1054_v52  ;;  %1077 = vtanh.f32 %v533_v49 }
  0xfe   : > { %v1058_v54 = vpop.eup %1057  ;;  %776 = vst [vmem:[%s1204_s25 + $0xa0] sm:$0xff] %v1056_v53  ;;  %1079 = vtanh.f32 %v597_v51  ;;  %v969_v56 = vpop.f32.mrb[12].mxu0 }
  0xff   : > { %v1060_v55 = vpop.eup %1059  ;;  %763 = vst [vmem:[%s1204_s25 + $0x38] sm:$0xff] %v1058_v54  ;;  %1081 = vtanh.f32 %v969_v56  ;;  %v985_v58 = vpop.f32.mrb[12].mxu1 }
 0x100   : > { %v1062_v57 = vpop.eup %1061  ;;  %779 = vst [vmem:[%s1204_s25 + $0xb8] sm:$0xff] %v1060_v55  ;;  %v546_v59 = vpop.f32.mrb[13].mxu0  ;;  %1083 = vtanh.f32 %v985_v58 }
 0x101   : > { %v1064_v60 = vpop.eup %1063  ;;  %761 = vst [vmem:[%s1204_s25 + $0x28] sm:$0xff] %v1062_v57  ;;  %v610_v61 = vpop.f32.mrb[13].mxu1  ;;  %1085 = vtanh.f32 %v546_v59 }
 0x102   : > { %v970_v62 = vpop.f32.mrb[14].mxu0  ;;  %v1066_v63 = vpop.eup %1065  ;;  %777 = vst [vmem:[%s1204_s25 + $0xa8] sm:$0xff] %v1064_v60  ;;  %1087 = vtanh.f32 %v610_v61 }
 0x103   : > { %v986_v0 = vpop.f32.mrb[14].mxu1  ;;  %v549_v1 = vpop.f32.mrb[15].mxu0  ;;  %766 = vst [vmem:[%s1204_s25 + $0x50] sm:$0xff] %v1066_v63  ;;  %1089 = vtanh.f32 %v970_v62 }
 0x104   : > { %v1068_v2 = vpop.eup %1067  ;;  %v613_v3 = vpop.f32.mrb[15].mxu1  ;;  %1091 = vtanh.f32 %v986_v0 }
 0x105   : > { %v1070_v4 = vpop.eup %1069  ;;  %782 = vst [vmem:[%s1204_s25 + $0xd0] sm:$0xff] %v1068_v2  ;;  %1093 = vtanh.f32 %v549_v1 }
 0x106   : > { %v1072_v5 = vpop.eup %1071  ;;  %764 = vst [vmem:[%s1204_s25 + $0x40] sm:$0xff] %v1070_v4  ;;  %1095 = vtanh.f32 %v613_v3 }
 0x107   : > { %v1074_v6 = vpop.eup %1073  ;;  %780 = vst [vmem:[%s1204_s25 + $0xc0] sm:$0xff] %v1072_v5 }
 0x108   : > { %v1076_v7 = vpop.eup %1075  ;;  %767 = vst [vmem:[%s1204_s25 + $0x58] sm:$0xff] %v1074_v6 }
 0x109   : > { %v1078_v8 = vpop.eup %1077  ;;  %783 = vst [vmem:[%s1204_s25 + $0xd8] sm:$0xff] %v1076_v7 }
 0x10a   : > { %v1080_v9 = vpop.eup %1079  ;;  %765 = vst [vmem:[%s1204_s25 + $0x48] sm:$0xff] %v1078_v8 }
 0x10b   : > { %v1082_v10 = vpop.eup %1081  ;;  %781 = vst [vmem:[%s1204_s25 + $0xc8] sm:$0xff] %v1080_v9 }
 0x10c   : > { %v1084_v11 = vpop.eup %1083  ;;  %770 = vst [vmem:[%s1204_s25 + $0x70] sm:$0xff] %v1082_v10 }
 0x10d   : > { %v1086_v12 = vpop.eup %1085  ;;  %786 = vst [vmem:[%s1204_s25 + $0xf0] sm:$0xff] %v1084_v11 }
 0x10e   : > { %v1088_v13 = vpop.eup %1087  ;;  %768 = vst [vmem:[%s1204_s25 + $0x60] sm:$0xff] %v1086_v12 }
 0x10f   : > { %v1090_v14 = vpop.eup %1089  ;;  %784 = vst [vmem:[%s1204_s25 + $0xe0] sm:$0xff] %v1088_v13 }
 0x110   : > { %v1092_v15 = vpop.eup %1091  ;;  %771 = vst [vmem:[%s1204_s25 + $0x78] sm:$0xff] %v1090_v14 }
 0x111   : > { %v1094_v16 = vpop.eup %1093  ;;  %787 = vst [vmem:[%s1204_s25 + $0xf8] sm:$0xff] %v1092_v15 }
 0x112   : > { %v1096_v17 = vpop.eup %1095  ;;  %769 = vst [vmem:[%s1204_s25 + $0x68] sm:$0xff] %v1094_v16 }
 0x113   : > { %785 = vst [vmem:[%s1204_s25 + $0xe8] sm:$0xff] %v1096_v17 }
 0x114 PF: > { %s12_s11 = sadd.s32 1, %s1119_s11   ;;  %s1250_s9 = smov %s1115_s10 }
 0x115   : > { %p9_p5 = scmp.ge.s32.totalorder %s12_s11, 11   ;;  %s1251_s10 = smov %s1253_s12 }
 0x117   :  { %11 = sbr.rel (!%p9_p5) target bundleno = 2 (0x2), region = 69 }

</bundles_post_ra>
